<compile_context>
chip_gen: v6e
topology: v6e:2x2x1
jax: 0.10.0
libtpu: 0.0.40
codegen_flags: <defaults>
</compile_context>

<pallas_src>
from functools import partial

import jax
import jax.numpy as jnp
from jax.experimental import pallas as pl
from jax.experimental.pallas import tpu as pltpu


def _node_decoder_kernel(
    x0_ref,        # (B, R, Fin)  reset states (times 0, P, 2P, ...), rows r = s*N + n
    zg_ref,        # (R, Z)
    za_ref,        # (R, Z)
    mask_rn_ref,   # (R, N)   mask_rn[s*N+dst, src] = 1 iff edge src->dst exists
    deg_ref,       # (R, 1)   in-degree per dst row
    r_sel_ref,     # (E, R)   edge-slot -> dst row   (one-hot)
    t_sel_ref,     # (E, R)   edge-slot -> src row   (one-hot)
    g_sel_ref,     # (R, E)   dst row   -> incoming edge-slots (0/1 sum selector)
    c_sel_ref,     # (E, N)   edge-slot -> within-sample src index (one-hot)
    w_attn_ref,    # (Z, 2*K*H)  [attn_s_0..attn_s_{K-1} | attn_d_0..attn_d_{K-1}]
    w_xf2_ref,     # (Fin, 2*K*H) x_enc folded into F2 layer-1, src/dst halves tiled K-wide
    b_xf2_ref,     # (1, 2*K*H)
    w_f1a_ref,     # (K*H, H)  F2 layer-2 folded into F1 layer-1
    w_f1b_o1_ref,  # (H, H)    F1 layer-2 folded into out_fc layer-1 (deltax branch)
    w_o1_za_ref,   # (Z, H)    out_fc layer-1, zA branch
    b_o1_ref,      # (1, H)
    w_o2_ref,      # (H, Fin)
    b_o2_ref,      # (1, Fin)
    preds_ref,     # (T, R, Fin) output
):
    B, R, Fin = x0_ref.shape
    N = mask_rn_ref.shape[1]
    E = r_sel_ref.shape[0]
    H = w_f1b_o1_ref.shape[0]
    KH = w_xf2_ref.shape[1] // 2          # K * H
    K = KH // H
    T = preds_ref.shape[0]
    P = T // B                            # pred_steps

    f32 = jnp.float32
    dot = lambda a, b: jnp.dot(a, b, preferred_element_type=f32)

    # ---- hoisted loads (everything below is traced once / fully unrolled) ----
    r_sel = r_sel_ref[...]
    t_sel = t_sel_ref[...]
    g_sel = g_sel_ref[...]
    c_sel = c_sel_ref[...]
    mask_rn = mask_rn_ref[...]
    deg = deg_ref[...]

    # ============ GAT.attn + softmax + 1/deg mailbox mean (hoisted, runs once) ============
    a_all = dot(zg_ref[...], w_attn_ref[...])          # (R, 2KH) fused projection, all heads
    as_e = dot(t_sel, a_all[:, :KH])                   # (E, KH)  src projections per edge slot
    ad_e = dot(r_sel, a_all[:, KH:])                   # (E, KH)  dst projections per edge slot
    prod = as_e * ad_e

    alpha_cols = []
    for k in range(K):
        logit = jnp.sum(prod[:, k * H:(k + 1) * H], axis=-1, keepdims=True)   # (E, 1)
        logit = jnp.where(logit >= 0.0, logit, 0.01 * logit)                  # leaky_relu
        # exact scatter into (dst-row, src) layout: one edge slot per (r, j) entry,
        # so the per-DESTINATION softmax max and sum are plain lane reductions.
        e_rn = dot(g_sel, logit * c_sel)                                      # (R, N)
        e_rn = jnp.where(mask_rn > 0.0, e_rn, -1e30)
        m_r = jnp.max(e_rn, axis=-1, keepdims=True)                           # per-dst max
        ex = jnp.exp(e_rn - m_r) * mask_rn
        denom = jnp.sum(ex, axis=-1, keepdims=True) * deg                     # softmax norm * in-degree
        denom = jnp.where(denom > 0.0, denom, 1.0)
        a_rn = ex / denom                                                     # (R, N)
        # exact gather back to the flat edge-slot layout used by the rollout
        a_e = jnp.sum(c_sel * dot(r_sel, a_rn), axis=-1, keepdims=True)       # (E, 1)
        alpha_cols.append(jnp.broadcast_to(a_e, (E, H)))
    alpha_wide = jnp.concatenate(alpha_cols, axis=-1)                         # (E, K*H)

    # ---- rollout-invariant operands hoisted out of the unrolled loop ----
    w_xf2 = w_xf2_ref[...]
    b_xf2 = jnp.broadcast_to(b_xf2_ref[...], (R, 2 * KH))
    w_f1a = w_f1a_ref[...]
    w_f1b_o1 = w_f1b_o1_ref[...]
    w_o2 = w_o2_ref[...]
    b_o2 = jnp.broadcast_to(b_o2_ref[...], (R, Fin))
    za_term = dot(za_ref[...], w_o1_za_ref[...]) + jnp.broadcast_to(b_o1_ref[...], (R, H))

    # ============ rollout: P steps, B independent chains interleaved per step ============
    xts = [x0_ref[b] for b in range(B)]
    for step in range(P):
        for b in range(B):                                   # interleave independent chains
            xt = xts[b]
            p = dot(xt, w_xf2) + b_xf2                                        # (R, 2KH)
            msg = jnp.maximum(dot(t_sel, p[:, :KH]) + dot(r_sel, p[:, KH:]), 0.0)   # (E, KH)
            res = dot(g_sel, alpha_wide * msg)               # attn-weighted mailbox mean (R, KH)
            t1 = jnp.maximum(dot(res, w_f1a), 0.0)                            # (R, H)
            h1 = jnp.maximum(dot(t1, w_f1b_o1) + za_term, 0.0)                # (R, H)
            xt = xt + dot(h1, w_o2) + b_o2                                    # (R, Fin)
            xts[b] = xt
            preds_ref[b * P + step] = xt


def _graph_plumbing(mask, N, S):
    """Dense-graph selector matrices (pure function of (mask, N, S); cache at scale)."""
    f32 = jnp.float32
    eye = jnp.eye(N, dtype=f32)
    r_one = jnp.repeat(eye, N, axis=0)                       # (N^2, N) edge -> dst (per sample)
    t_one = jnp.tile(eye, (N, 1))                            # (N^2, N) edge -> src (per sample)
    eye_s = jnp.eye(S, dtype=f32)
    r_sel = jnp.kron(eye_s, r_one)                           # (E, R)
    t_sel = jnp.kron(eye_s, t_one)                           # (E, R)
    g_sel = r_sel.T                                          # (R, E)
    c_sel = jnp.tile(eye, (S * N, 1))                        # (E, N) edge -> within-sample src slot
    mask_rn = jnp.tile(mask.T, (S, 1))                       # (R, N): [dst-row, src]
    deg = jnp.tile(jnp.sum(mask, axis=0).reshape(N, 1), (S, 1))   # (R, 1) in-degree per dst
    return r_sel, t_sel, g_sel, c_sel, mask_rn, deg


@partial(jax.jit, static_argnames=("pred_steps",))
def node_decoder_forward(inputs, mask, zG, zA, params, pred_steps):
    """inputs: (N, T, 4); mask: dense (N_src, N_dst) 0/1 edges; zG, zA: (N, S, Z).

    Returns preds of shape (N, T, S, 4)  ==  preds_out.transpose(0, 1) of the module.
    """
    N, T, Fin = inputs.shape
    S = zA.shape[1]
    Z = zG.shape[-1]
    H = params["w_xe"].shape[1]
    K = len(params["w_s"])
    assert T % pred_steps == 0, "forecast=False path assumes pred_steps divides T"
    B = T // pred_steps
    R, E = S * N, S * N * N
    KH = K * H
    f32 = jnp.float32
    mask = mask.astype(f32)

    # reset states: inputs.transpose(0,1)[0::pred_steps], replicated over samples (rows r=s*N+n)
    x_tm = jnp.transpose(inputs, (1, 0, 2)).astype(f32)                        # (T, N, Fin)
    x0 = jnp.broadcast_to(x_tm[0::pred_steps][:, None], (B, S, N, Fin)).reshape(B, R, Fin)

    zg = jnp.transpose(zG, (1, 0, 2)).reshape(R, Z).astype(f32)                # row = s*N + n
    za = jnp.transpose(zA, (1, 0, 2)).reshape(R, Z).astype(f32)

    r_sel, t_sel, g_sel, c_sel, mask_rn, deg = _graph_plumbing(mask, N, S)

    # ---- fused / pre-transposed weights (pure trace-time weight algebra) ----
    w_attn = jnp.concatenate(list(params["w_s"]) + list(params["w_d"]), axis=1)    # (Z, 2KH)
    w_f2a = params["w_f2a"]                                                        # (2H, H)
    w_src, w_dst = w_f2a[:H, :], w_f2a[H:, :]
    w_f2a_tiled = jnp.concatenate([w_src] * K + [w_dst] * K, axis=1)               # (H, 2KH)
    w_xf2 = params["w_xe"] @ w_f2a_tiled                                           # (Fin, 2KH)
    b_xf2 = params["b_xe"] @ w_f2a_tiled                                           # (1, 2KH)
    w_f1a_fused = jnp.concatenate(
        [params["w_f2b"] @ params["w_f1a"][k * H:(k + 1) * H, :] for k in range(K)], axis=0)  # (KH, H)
    w_f1b_o1 = params["w_f1b"] @ params["w_o1"][:H, :]                             # (H, H)
    w_o1_za = params["w_o1"][H:, :]                                                # (Z, H)

    args = (
        x0, zg, za, mask_rn, deg, r_sel, t_sel, g_sel, c_sel,
        w_attn, w_xf2, b_xf2, w_f1a_fused, w_f1b_o1,
        w_o1_za, params["b_o1"], params["w_o2"], params["b_o2"],
    )

    io_bytes = int(sum(int(a.size) * a.dtype.itemsize for a in args) + T * R * Fin * 4)
    step_flops = (2 * R * Fin * 2 * KH + 2 * 2 * E * R * KH + 2 * R * E * KH
                  + 2 * R * KH * H + 2 * R * H * H + 2 * R * H * Fin)
    attn_flops = (2 * R * Z * 2 * KH + 2 * 2 * E * R * KH
                  + 2 * K * (R * E * N + E * R * N) + 2 * R * Z * H)
    cost = pl.CostEstimate(
        flops=int(T * step_flops + attn_flops),
        transcendentals=int(K * R * N),
        bytes_accessed=io_bytes,
    )
    vmem_limit = int(min(64 * 2**20, max(16 * 2**20, 8 * io_bytes)))

    vmem = pl.BlockSpec(memory_space=pltpu.MemorySpace.VMEM)   # whole-array VMEM blocks, no grid
    preds = pl.pallas_call(
        _node_decoder_kernel,
        out_shape=jax.ShapeDtypeStruct((T, R, Fin), f32),
        in_specs=[vmem] * len(args),
        out_specs=vmem,
        compiler_params=pltpu.CompilerParams(vmem_limit_bytes=vmem_limit),
        cost_estimate=cost,
    )(*args)

    # (T, S*N, Fin) -> (N, T, S, Fin)
    return jnp.transpose(preds.reshape(T, S, N, Fin), (2, 0, 1, 3))


def init_params(key, h_dim, z_dim, attn_head, n_in_node):
    """Weights stored pre-transposed to (in_features, out_features)."""
    K = attn_head
    keys = iter(jax.random.split(key, 2 * K + 10))

    def lin(k, in_f, out_f):
        s = 1.0 / (in_f ** 0.5)
        return jax.random.uniform(k, (in_f, out_f), jnp.float32, -s, s)

    def bias(k, in_f, out_f):
        s = 1.0 / (in_f ** 0.5)
        return jax.random.uniform(k, (1, out_f), jnp.float32, -s, s)

    return {
        "w_s": [lin(next(keys), z_dim, h_dim) for _ in range(K)],     # attn_s[k], no bias
        "w_d": [lin(next(keys), z_dim, h_dim) for _ in range(K)],     # attn_d[k], no bias
        "w_xe": lin(next(keys), n_in_node, h_dim),                    # x_enc
        "b_xe": bias(next(keys), n_in_node, h_dim),
        "w_f2a": lin(next(keys), 2 * h_dim, h_dim),                   # F2 (no bias)
        "w_f2b": lin(next(keys), h_dim, h_dim),
        "w_f1a": lin(next(keys), h_dim * K, h_dim),                   # F1 (no bias)
        "w_f1b": lin(next(keys), h_dim, h_dim),
        "w_o1": lin(next(keys), h_dim + z_dim, h_dim),                # out_fc
        "b_o1": bias(next(keys), h_dim + z_dim, h_dim),
        "w_o2": lin(next(keys), h_dim, n_in_node),
        "b_o2": bias(next(keys), h_dim, n_in_node),
    }


def reference_forward(inputs, mask, zG, zA, p, pred_steps):
    """Pure-JAX (dense) replica of the PyTorch/DGL forward for validation."""
    N, T, Fin = inputs.shape
    S = zA.shape[1]
    H = p["w_xe"].shape[1]
    K = len(p["w_s"])

    # GAT.attn
    e_heads = []
    for k in range(K):
        a_s = zG @ p["w_s"][k]                       # (N, S, H)
        a_d = zG @ p["w_d"][k]
        e = jnp.einsum("ush,vsh->uvs", a_s, a_d)     # (src, dst, S)
        e_heads.append(jnp.where(e >= 0, e, 0.01 * e))
    eG = jnp.stack(e_heads, axis=-1)                 # (src, dst, S, K)
    m4 = mask[:, :, None, None]
    neg = jnp.where(m4 > 0, eG, -1e30)
    ex = jnp.exp(neg - neg.max(axis=0, keepdims=True)) * m4
    alpha = ex / jnp.maximum(ex.sum(axis=0, keepdims=True), 1e-30)
    deg = jnp.maximum(mask.sum(axis=0), 1.0)

    x = jnp.transpose(inputs, (1, 0, 2))
    x = jnp.broadcast_to(x[:, :, None, :], (T, N, S, Fin))
    preds = jnp.zeros((T, N, S, Fin), jnp.float32)
    last = x[0::pred_steps]
    for b in range(last.shape[0]):
        xt = last[b]
        for step in range(pred_steps):
            xt_enc = xt @ p["w_xe"] + p["b_xe"]                               # (N, S, H)
            cat = jnp.concatenate(
                [jnp.broadcast_to(xt_enc[:, None], (N, N, S, H)),
                 jnp.broadcast_to(xt_enc[None, :], (N, N, S, H))], axis=-1)
            dA = jnp.maximum(cat @ p["w_f2a"], 0.0) @ p["w_f2b"]              # (src, dst, S, H)
            res = []
            for k in range(K):
                w = alpha[:, :, :, k][..., None] * dA
                res.append(w.sum(axis=0) / deg[:, None, None])                # (dst, S, H)
            dx = jnp.concatenate(res, axis=-1)
            dx = jnp.maximum(dx @ p["w_f1a"], 0.0) @ p["w_f1b"]
            h = jnp.concatenate([dx, zA], axis=-1)
            out = jnp.maximum(h @ p["w_o1"] + p["b_o1"], 0.0) @ p["w_o2"] + p["b_o2"]
            xt = xt + out
            preds = preds.at[step + b * pred_steps].set(xt)
    return jnp.transpose(preds, (1, 0, 2, 3))


if __name__ == "__main__":
    N, T, S, H, Z, K, FIN = 8, 8, 2, 32, 16, 2, 4    # nodes, horizon, num_sample, h_dim, z_dim, attn_head, n_in_node
    pred_steps = 4

    key = jax.random.PRNGKey(0)
    k_in, k_adj, k_zg, k_za, k_par = jax.random.split(key, 5)

    inputs = jax.random.normal(k_in, (N, T, FIN), jnp.float32)
    zG = 0.5 * jax.random.normal(k_zg, (N, S, Z), jnp.float32)
    zA = 0.5 * jax.random.normal(k_za, (N, S, Z), jnp.float32)

    # deterministic graph: random symmetric edges + self-loops (every node has in-degree >= 1)
    a = (jax.random.uniform(k_adj, (N, N)) > 0.5).astype(jnp.float32)
    a = jnp.maximum(a, a.T)
    mask = a.at[jnp.arange(N), jnp.arange(N)].set(1.0)

    params = init_params(k_par, H, Z, K, FIN)

    out = jax.block_until_ready(
        node_decoder_forward(inputs, mask, zG, zA, params, pred_steps))
    assert out.shape == (N, T, S, FIN)

    with jax.default_matmul_precision("highest"):
        ref = jax.block_until_ready(
            reference_forward(inputs, mask, zG, zA, params, pred_steps))

    max_err = float(jnp.max(jnp.abs(out - ref)))
    assert jnp.allclose(out, ref, atol=1e-2, rtol=1e-2), max_err
    print("KERNEL_OK")
</pallas_src>

<mosaic_0001>
module attributes {stable_mosaic.version = 11 : i64} {
  func.func @_node_decoder_kernel(%arg0: memref<2x16x4xf32, #tpu.memory_space<vmem>>, %arg1: memref<16x16xf32, #tpu.memory_space<vmem>>, %arg2: memref<16x16xf32, #tpu.memory_space<vmem>>, %arg3: memref<16x8xf32, #tpu.memory_space<vmem>>, %arg4: memref<16x1xf32, #tpu.memory_space<vmem>>, %arg5: memref<128x16xf32, #tpu.memory_space<vmem>>, %arg6: memref<128x16xf32, #tpu.memory_space<vmem>>, %arg7: memref<16x128xf32, #tpu.memory_space<vmem>>, %arg8: memref<128x8xf32, #tpu.memory_space<vmem>>, %arg9: memref<16x128xf32, #tpu.memory_space<vmem>>, %arg10: memref<4x128xf32, #tpu.memory_space<vmem>>, %arg11: memref<1x128xf32, #tpu.memory_space<vmem>>, %arg12: memref<64x32xf32, #tpu.memory_space<vmem>>, %arg13: memref<32x32xf32, #tpu.memory_space<vmem>>, %arg14: memref<16x32xf32, #tpu.memory_space<vmem>>, %arg15: memref<1x32xf32, #tpu.memory_space<vmem>>, %arg16: memref<32x4xf32, #tpu.memory_space<vmem>>, %arg17: memref<1x4xf32, #tpu.memory_space<vmem>>, %arg18: memref<8x16x4xf32, #tpu.memory_space<vmem>>) attributes {dimension_semantics = [], scalar_prefetch = 0 : i64, scratch_operands = 0 : i64, tpu.core_type = #tpu.core_type<tc>} {
    %c0 = arith.constant 0 : index
    %c0_0 = arith.constant 0 : index
    %0 = vector.load %arg5[%c0, %c0_0] : memref<128x16xf32, #tpu.memory_space<vmem>>, vector<128x16xf32>
    %c0_1 = arith.constant 0 : index
    %c0_2 = arith.constant 0 : index
    %1 = vector.load %arg6[%c0_1, %c0_2] : memref<128x16xf32, #tpu.memory_space<vmem>>, vector<128x16xf32>
    %c0_3 = arith.constant 0 : index
    %c0_4 = arith.constant 0 : index
    %2 = vector.load %arg7[%c0_3, %c0_4] : memref<16x128xf32, #tpu.memory_space<vmem>>, vector<16x128xf32>
    %c0_5 = arith.constant 0 : index
    %c0_6 = arith.constant 0 : index
    %3 = vector.load %arg8[%c0_5, %c0_6] : memref<128x8xf32, #tpu.memory_space<vmem>>, vector<128x8xf32>
    %c0_7 = arith.constant 0 : index
    %c0_8 = arith.constant 0 : index
    %4 = vector.load %arg3[%c0_7, %c0_8] : memref<16x8xf32, #tpu.memory_space<vmem>>, vector<16x8xf32>
    %c0_9 = arith.constant 0 : index
    %c0_10 = arith.constant 0 : index
    %5 = vector.load %arg4[%c0_9, %c0_10] : memref<16x1xf32, #tpu.memory_space<vmem>>, vector<16x1xf32>
    %c0_11 = arith.constant 0 : index
    %c0_12 = arith.constant 0 : index
    %6 = vector.load %arg1[%c0_11, %c0_12] : memref<16x16xf32, #tpu.memory_space<vmem>>, vector<16x16xf32>
    %c0_13 = arith.constant 0 : index
    %c0_14 = arith.constant 0 : index
    %7 = vector.load %arg9[%c0_13, %c0_14] : memref<16x128xf32, #tpu.memory_space<vmem>>, vector<16x128xf32>
    %cst = arith.constant dense<0.000000e+00> : vector<16x128xf32>
    %8 = tpu.matmul %6, %7, %cst {dimension_numbers = #tpu.dot_dimension_numbers<[1], [0], [0], [1], [0, 0, 1, 1], [], []>} : vector<16x16xf32>, vector<16x128xf32>, vector<16x128xf32> -> vector<16x128xf32>
    %9 = vector.extract_strided_slice %8 {offsets = [0, 0], sizes = [16, 64], strides = [1, 1]} : vector<16x128xf32> to vector<16x64xf32>
    %cst_15 = arith.constant dense<0.000000e+00> : vector<128x64xf32>
    %10 = tpu.matmul %1, %9, %cst_15 {dimension_numbers = #tpu.dot_dimension_numbers<[1], [0], [0], [1], [0, 0, 1, 1], [], []>} : vector<128x16xf32>, vector<16x64xf32>, vector<128x64xf32> -> vector<128x64xf32>
    %11 = vector.extract_strided_slice %8 {offsets = [0, 64], sizes = [16, 64], strides = [1, 1]} : vector<16x128xf32> to vector<16x64xf32>
    %cst_16 = arith.constant dense<0.000000e+00> : vector<128x64xf32>
    %12 = tpu.matmul %0, %11, %cst_16 {dimension_numbers = #tpu.dot_dimension_numbers<[1], [0], [0], [1], [0, 0, 1, 1], [], []>} : vector<128x16xf32>, vector<16x64xf32>, vector<128x64xf32> -> vector<128x64xf32>
    %13 = arith.mulf %10, %12 : vector<128x64xf32>
    %14 = vector.extract_strided_slice %13 {offsets = [0, 0], sizes = [128, 32], strides = [1, 1]} : vector<128x64xf32> to vector<128x32xf32>
    %cst_17 = arith.constant dense<0.000000e+00> : vector<128xf32>
    %15 = vector.multi_reduction <add>, %14, %cst_17 [1] : vector<128x32xf32> to vector<128xf32>
    %16 = vector.shape_cast %15 : vector<128xf32> to vector<128x1xf32>
    %cst_18 = arith.constant 0.000000e+00 : f32
    %17 = vector.broadcast %cst_18 : f32 to vector<128x1xf32>
    %18 = arith.cmpf oge, %16, %17 : vector<128x1xf32>
    %cst_19 = arith.constant 0.00999999977 : f32
    %19 = vector.broadcast %cst_19 : f32 to vector<128x1xf32>
    %20 = arith.mulf %19, %16 : vector<128x1xf32>
    %21 = arith.select %18, %16, %20 : vector<128x1xi1>, vector<128x1xf32>
    %22 = vector.broadcast %21 : vector<128x1xf32> to vector<128x8xf32>
    %23 = arith.mulf %22, %3 : vector<128x8xf32>
    %cst_20 = arith.constant dense<0.000000e+00> : vector<16x8xf32>
    %24 = tpu.matmul %2, %23, %cst_20 {dimension_numbers = #tpu.dot_dimension_numbers<[1], [0], [0], [1], [0, 0, 1, 1], [], []>} : vector<16x128xf32>, vector<128x8xf32>, vector<16x8xf32> -> vector<16x8xf32>
    %cst_21 = arith.constant 0.000000e+00 : f32
    %25 = vector.broadcast %cst_21 : f32 to vector<16x8xf32>
    %26 = arith.cmpf ogt, %4, %25 : vector<16x8xf32>
    %cst_22 = arith.constant -1.000000e+30 : f32
    %27 = vector.broadcast %cst_22 : f32 to vector<16x8xf32>
    %28 = arith.select %26, %24, %27 : vector<16x8xi1>, vector<16x8xf32>
    %cst_23 = arith.constant dense<0xFF800000> : vector<16xf32>
    %29 = vector.multi_reduction <maximumf>, %28, %cst_23 [1] : vector<16x8xf32> to vector<16xf32>
    %30 = vector.shape_cast %29 : vector<16xf32> to vector<16x1xf32>
    %31 = vector.broadcast %30 : vector<16x1xf32> to vector<16x8xf32>
    %32 = arith.subf %28, %31 : vector<16x8xf32>
    %33 = math.exp %32 : vector<16x8xf32>
    %34 = arith.mulf %33, %4 : vector<16x8xf32>
    %cst_24 = arith.constant dense<0.000000e+00> : vector<16xf32>
    %35 = vector.multi_reduction <add>, %34, %cst_24 [1] : vector<16x8xf32> to vector<16xf32>
    %36 = vector.shape_cast %35 : vector<16xf32> to vector<16x1xf32>
    %37 = arith.mulf %36, %5 : vector<16x1xf32>
    %cst_25 = arith.constant 0.000000e+00 : f32
    %38 = vector.broadcast %cst_25 : f32 to vector<16x1xf32>
    %39 = arith.cmpf ogt, %37, %38 : vector<16x1xf32>
    %cst_26 = arith.constant 1.000000e+00 : f32
    %40 = vector.broadcast %cst_26 : f32 to vector<16x1xf32>
    %41 = arith.select %39, %37, %40 : vector<16x1xi1>, vector<16x1xf32>
    %42 = vector.broadcast %41 : vector<16x1xf32> to vector<16x8xf32>
    %43 = arith.divf %34, %42 : vector<16x8xf32>
    %cst_27 = arith.constant dense<0.000000e+00> : vector<128x8xf32>
    %44 = tpu.matmul %0, %43, %cst_27 {dimension_numbers = #tpu.dot_dimension_numbers<[1], [0], [0], [1], [0, 0, 1, 1], [], []>} : vector<128x16xf32>, vector<16x8xf32>, vector<128x8xf32> -> vector<128x8xf32>
    %45 = arith.mulf %3, %44 : vector<128x8xf32>
    %cst_28 = arith.constant dense<0.000000e+00> : vector<128xf32>
    %46 = vector.multi_reduction <add>, %45, %cst_28 [1] : vector<128x8xf32> to vector<128xf32>
    %47 = vector.shape_cast %46 : vector<128xf32> to vector<128x1xf32>
    %48 = vector.shape_cast %47 : vector<128x1xf32> to vector<128x1xf32>
    %49 = vector.broadcast %48 : vector<128x1xf32> to vector<128x32xf32>
    %50 = vector.extract_strided_slice %13 {offsets = [0, 32], sizes = [128, 32], strides = [1, 1]} : vector<128x64xf32> to vector<128x32xf32>
    %cst_29 = arith.constant dense<0.000000e+00> : vector<128xf32>
    %51 = vector.multi_reduction <add>, %50, %cst_29 [1] : vector<128x32xf32> to vector<128xf32>
    %52 = vector.shape_cast %51 : vector<128xf32> to vector<128x1xf32>
    %cst_30 = arith.constant 0.000000e+00 : f32
    %53 = vector.broadcast %cst_30 : f32 to vector<128x1xf32>
    %54 = arith.cmpf oge, %52, %53 : vector<128x1xf32>
    %cst_31 = arith.constant 0.00999999977 : f32
    %55 = vector.broadcast %cst_31 : f32 to vector<128x1xf32>
    %56 = arith.mulf %55, %52 : vector<128x1xf32>
    %57 = arith.select %54, %52, %56 : vector<128x1xi1>, vector<128x1xf32>
    %58 = vector.broadcast %57 : vector<128x1xf32> to vector<128x8xf32>
    %59 = arith.mulf %58, %3 : vector<128x8xf32>
    %cst_32 = arith.constant dense<0.000000e+00> : vector<16x8xf32>
    %60 = tpu.matmul %2, %59, %cst_32 {dimension_numbers = #tpu.dot_dimension_numbers<[1], [0], [0], [1], [0, 0, 1, 1], [], []>} : vector<16x128xf32>, vector<128x8xf32>, vector<16x8xf32> -> vector<16x8xf32>
    %cst_33 = arith.constant 0.000000e+00 : f32
    %61 = vector.broadcast %cst_33 : f32 to vector<16x8xf32>
    %62 = arith.cmpf ogt, %4, %61 : vector<16x8xf32>
    %cst_34 = arith.constant -1.000000e+30 : f32
    %63 = vector.broadcast %cst_34 : f32 to vector<16x8xf32>
    %64 = arith.select %62, %60, %63 : vector<16x8xi1>, vector<16x8xf32>
    %cst_35 = arith.constant dense<0xFF800000> : vector<16xf32>
    %65 = vector.multi_reduction <maximumf>, %64, %cst_35 [1] : vector<16x8xf32> to vector<16xf32>
    %66 = vector.shape_cast %65 : vector<16xf32> to vector<16x1xf32>
    %67 = vector.broadcast %66 : vector<16x1xf32> to vector<16x8xf32>
    %68 = arith.subf %64, %67 : vector<16x8xf32>
    %69 = math.exp %68 : vector<16x8xf32>
    %70 = arith.mulf %69, %4 : vector<16x8xf32>
    %cst_36 = arith.constant dense<0.000000e+00> : vector<16xf32>
    %71 = vector.multi_reduction <add>, %70, %cst_36 [1] : vector<16x8xf32> to vector<16xf32>
    %72 = vector.shape_cast %71 : vector<16xf32> to vector<16x1xf32>
    %73 = arith.mulf %72, %5 : vector<16x1xf32>
    %cst_37 = arith.constant 0.000000e+00 : f32
    %74 = vector.broadcast %cst_37 : f32 to vector<16x1xf32>
    %75 = arith.cmpf ogt, %73, %74 : vector<16x1xf32>
    %cst_38 = arith.constant 1.000000e+00 : f32
    %76 = vector.broadcast %cst_38 : f32 to vector<16x1xf32>
    %77 = arith.select %75, %73, %76 : vector<16x1xi1>, vector<16x1xf32>
    %78 = vector.broadcast %77 : vector<16x1xf32> to vector<16x8xf32>
    %79 = arith.divf %70, %78 : vector<16x8xf32>
    %cst_39 = arith.constant dense<0.000000e+00> : vector<128x8xf32>
    %80 = tpu.matmul %0, %79, %cst_39 {dimension_numbers = #tpu.dot_dimension_numbers<[1], [0], [0], [1], [0, 0, 1, 1], [], []>} : vector<128x16xf32>, vector<16x8xf32>, vector<128x8xf32> -> vector<128x8xf32>
    %81 = arith.mulf %3, %80 : vector<128x8xf32>
    %cst_40 = arith.constant dense<0.000000e+00> : vector<128xf32>
    %82 = vector.multi_reduction <add>, %81, %cst_40 [1] : vector<128x8xf32> to vector<128xf32>
    %83 = vector.shape_cast %82 : vector<128xf32> to vector<128x1xf32>
    %84 = vector.shape_cast %83 : vector<128x1xf32> to vector<128x1xf32>
    %85 = vector.broadcast %84 : vector<128x1xf32> to vector<128x32xf32>
    %86 = tpu.concatenate %49, %85 in 1 : vector<128x32xf32>, vector<128x32xf32> -> vector<128x64xf32>
    %c0_41 = arith.constant 0 : index
    %c0_42 = arith.constant 0 : index
    %87 = vector.load %arg10[%c0_41, %c0_42] : memref<4x128xf32, #tpu.memory_space<vmem>>, vector<4x128xf32>
    %c0_43 = arith.constant 0 : index
    %c0_44 = arith.constant 0 : index
    %88 = vector.load %arg11[%c0_43, %c0_44] : memref<1x128xf32, #tpu.memory_space<vmem>>, vector<1x128xf32>
    %89 = vector.shape_cast %88 : vector<1x128xf32> to vector<1x128xf32>
    %90 = vector.broadcast %89 : vector<1x128xf32> to vector<16x128xf32>
    %c0_45 = arith.constant 0 : index
    %c0_46 = arith.constant 0 : index
    %91 = vector.load %arg12[%c0_45, %c0_46] : memref<64x32xf32, #tpu.memory_space<vmem>>, vector<64x32xf32>
    %c0_47 = arith.constant 0 : index
    %c0_48 = arith.constant 0 : index
    %92 = vector.load %arg13[%c0_47, %c0_48] : memref<32x32xf32, #tpu.memory_space<vmem>>, vector<32x32xf32>
    %c0_49 = arith.constant 0 : index
    %c0_50 = arith.constant 0 : index
    %93 = vector.load %arg16[%c0_49, %c0_50] : memref<32x4xf32, #tpu.memory_space<vmem>>, vector<32x4xf32>
    %c0_51 = arith.constant 0 : index
    %c0_52 = arith.constant 0 : index
    %94 = vector.load %arg17[%c0_51, %c0_52] : memref<1x4xf32, #tpu.memory_space<vmem>>, vector<1x4xf32>
    %95 = vector.shape_cast %94 : vector<1x4xf32> to vector<1x4xf32>
    %96 = vector.broadcast %95 : vector<1x4xf32> to vector<16x4xf32>
    %c0_53 = arith.constant 0 : index
    %c0_54 = arith.constant 0 : index
    %97 = vector.load %arg2[%c0_53, %c0_54] : memref<16x16xf32, #tpu.memory_space<vmem>>, vector<16x16xf32>
    %c0_55 = arith.constant 0 : index
    %c0_56 = arith.constant 0 : index
    %98 = vector.load %arg14[%c0_55, %c0_56] : memref<16x32xf32, #tpu.memory_space<vmem>>, vector<16x32xf32>
    %cst_57 = arith.constant dense<0.000000e+00> : vector<16x32xf32>
    %99 = tpu.matmul %97, %98, %cst_57 {dimension_numbers = #tpu.dot_dimension_numbers<[1], [0], [0], [1], [0, 0, 1, 1], [], []>} : vector<16x16xf32>, vector<16x32xf32>, vector<16x32xf32> -> vector<16x32xf32>
    %c0_58 = arith.constant 0 : index
    %c0_59 = arith.constant 0 : index
    %100 = vector.load %arg15[%c0_58, %c0_59] : memref<1x32xf32, #tpu.memory_space<vmem>>, vector<1x32xf32>
    %101 = vector.shape_cast %100 : vector<1x32xf32> to vector<1x32xf32>
    %102 = vector.broadcast %101 : vector<1x32xf32> to vector<16x32xf32>
    %103 = arith.addf %99, %102 : vector<16x32xf32>
    %c0_60 = arith.constant 0 : index
    %c0_61 = arith.constant 0 : index
    %c0_62 = arith.constant 0 : index
    %104 = vector.load %arg0[%c0_60, %c0_61, %c0_62] : memref<2x16x4xf32, #tpu.memory_space<vmem>>, vector<1x16x4xf32>
    %105 = vector.shape_cast %104 : vector<1x16x4xf32> to vector<16x4xf32>
    %c1 = arith.constant 1 : index
    %c0_63 = arith.constant 0 : index
    %c0_64 = arith.constant 0 : index
    %106 = vector.load %arg0[%c1, %c0_63, %c0_64] : memref<2x16x4xf32, #tpu.memory_space<vmem>>, vector<1x16x4xf32>
    %107 = vector.shape_cast %106 : vector<1x16x4xf32> to vector<16x4xf32>
    %cst_65 = arith.constant dense<0.000000e+00> : vector<16x128xf32>
    %108 = tpu.matmul %105, %87, %cst_65 {dimension_numbers = #tpu.dot_dimension_numbers<[1], [0], [0], [1], [0, 0, 1, 1], [], []>} : vector<16x4xf32>, vector<4x128xf32>, vector<16x128xf32> -> vector<16x128xf32>
    %109 = arith.addf %108, %90 : vector<16x128xf32>
    %110 = vector.extract_strided_slice %109 {offsets = [0, 0], sizes = [16, 64], strides = [1, 1]} : vector<16x128xf32> to vector<16x64xf32>
    %cst_66 = arith.constant dense<0.000000e+00> : vector<128x64xf32>
    %111 = tpu.matmul %1, %110, %cst_66 {dimension_numbers = #tpu.dot_dimension_numbers<[1], [0], [0], [1], [0, 0, 1, 1], [], []>} : vector<128x16xf32>, vector<16x64xf32>, vector<128x64xf32> -> vector<128x64xf32>
    %112 = vector.extract_strided_slice %109 {offsets = [0, 64], sizes = [16, 64], strides = [1, 1]} : vector<16x128xf32> to vector<16x64xf32>
    %cst_67 = arith.constant dense<0.000000e+00> : vector<128x64xf32>
    %113 = tpu.matmul %0, %112, %cst_67 {dimension_numbers = #tpu.dot_dimension_numbers<[1], [0], [0], [1], [0, 0, 1, 1], [], []>} : vector<128x16xf32>, vector<16x64xf32>, vector<128x64xf32> -> vector<128x64xf32>
    %114 = arith.addf %111, %113 : vector<128x64xf32>
    %cst_68 = arith.constant 0.000000e+00 : f32
    %115 = vector.broadcast %cst_68 : f32 to vector<128x64xf32>
    %116 = arith.maximumf %114, %115 : vector<128x64xf32>
    %117 = arith.mulf %86, %116 : vector<128x64xf32>
    %cst_69 = arith.constant dense<0.000000e+00> : vector<16x64xf32>
    %118 = tpu.matmul %2, %117, %cst_69 {dimension_numbers = #tpu.dot_dimension_numbers<[1], [0], [0], [1], [0, 0, 1, 1], [], []>} : vector<16x128xf32>, vector<128x64xf32>, vector<16x64xf32> -> vector<16x64xf32>
    %cst_70 = arith.constant dense<0.000000e+00> : vector<16x32xf32>
    %119 = tpu.matmul %118, %91, %cst_70 {dimension_numbers = #tpu.dot_dimension_numbers<[1], [0], [0], [1], [0, 0, 1, 1], [], []>} : vector<16x64xf32>, vector<64x32xf32>, vector<16x32xf32> -> vector<16x32xf32>
    %cst_71 = arith.constant 0.000000e+00 : f32
    %120 = vector.broadcast %cst_71 : f32 to vector<16x32xf32>
    %121 = arith.maximumf %119, %120 : vector<16x32xf32>
    %cst_72 = arith.constant dense<0.000000e+00> : vector<16x32xf32>
    %122 = tpu.matmul %121, %92, %cst_72 {dimension_numbers = #tpu.dot_dimension_numbers<[1], [0], [0], [1], [0, 0, 1, 1], [], []>} : vector<16x32xf32>, vector<32x32xf32>, vector<16x32xf32> -> vector<16x32xf32>
    %123 = arith.addf %122, %103 : vector<16x32xf32>
    %cst_73 = arith.constant 0.000000e+00 : f32
    %124 = vector.broadcast %cst_73 : f32 to vector<16x32xf32>
    %125 = arith.maximumf %123, %124 : vector<16x32xf32>
    %cst_74 = arith.constant dense<0.000000e+00> : vector<16x4xf32>
    %126 = tpu.matmul %125, %93, %cst_74 {dimension_numbers = #tpu.dot_dimension_numbers<[1], [0], [0], [1], [0, 0, 1, 1], [], []>} : vector<16x32xf32>, vector<32x4xf32>, vector<16x4xf32> -> vector<16x4xf32>
    %127 = arith.addf %105, %126 : vector<16x4xf32>
    %128 = arith.addf %127, %96 : vector<16x4xf32>
    %c0_75 = arith.constant 0 : index
    %c0_76 = arith.constant 0 : index
    %c0_77 = arith.constant 0 : index
    %129 = vector.load %arg18[%c0_75, %c0_76, %c0_77] : memref<8x16x4xf32, #tpu.memory_space<vmem>>, vector<1x16x4xf32>
    %130 = vector.shape_cast %129 : vector<1x16x4xf32> to vector<16x4xf32>
    %131 = vector.shape_cast %128 : vector<16x4xf32> to vector<1x16x4xf32>
    tpu.vector_store %arg18[%c0_75, %c0_76, %c0_77], %131 {strides = array<i32>} : memref<8x16x4xf32, #tpu.memory_space<vmem>>, vector<1x16x4xf32>,
    %cst_78 = arith.constant dense<0.000000e+00> : vector<16x128xf32>
    %132 = tpu.matmul %107, %87, %cst_78 {dimension_numbers = #tpu.dot_dimension_numbers<[1], [0], [0], [1], [0, 0, 1, 1], [], []>} : vector<16x4xf32>, vector<4x128xf32>, vector<16x128xf32> -> vector<16x128xf32>
    %133 = arith.addf %132, %90 : vector<16x128xf32>
    %134 = vector.extract_strided_slice %133 {offsets = [0, 0], sizes = [16, 64], strides = [1, 1]} : vector<16x128xf32> to vector<16x64xf32>
    %cst_79 = arith.constant dense<0.000000e+00> : vector<128x64xf32>
    %135 = tpu.matmul %1, %134, %cst_79 {dimension_numbers = #tpu.dot_dimension_numbers<[1], [0], [0], [1], [0, 0, 1, 1], [], []>} : vector<128x16xf32>, vector<16x64xf32>, vector<128x64xf32> -> vector<128x64xf32>
    %136 = vector.extract_strided_slice %133 {offsets = [0, 64], sizes = [16, 64], strides = [1, 1]} : vector<16x128xf32> to vector<16x64xf32>
    %cst_80 = arith.constant dense<0.000000e+00> : vector<128x64xf32>
    %137 = tpu.matmul %0, %136, %cst_80 {dimension_numbers = #tpu.dot_dimension_numbers<[1], [0], [0], [1], [0, 0, 1, 1], [], []>} : vector<128x16xf32>, vector<16x64xf32>, vector<128x64xf32> -> vector<128x64xf32>
    %138 = arith.addf %135, %137 : vector<128x64xf32>
    %cst_81 = arith.constant 0.000000e+00 : f32
    %139 = vector.broadcast %cst_81 : f32 to vector<128x64xf32>
    %140 = arith.maximumf %138, %139 : vector<128x64xf32>
    %141 = arith.mulf %86, %140 : vector<128x64xf32>
    %cst_82 = arith.constant dense<0.000000e+00> : vector<16x64xf32>
    %142 = tpu.matmul %2, %141, %cst_82 {dimension_numbers = #tpu.dot_dimension_numbers<[1], [0], [0], [1], [0, 0, 1, 1], [], []>} : vector<16x128xf32>, vector<128x64xf32>, vector<16x64xf32> -> vector<16x64xf32>
    %cst_83 = arith.constant dense<0.000000e+00> : vector<16x32xf32>
    %143 = tpu.matmul %142, %91, %cst_83 {dimension_numbers = #tpu.dot_dimension_numbers<[1], [0], [0], [1], [0, 0, 1, 1], [], []>} : vector<16x64xf32>, vector<64x32xf32>, vector<16x32xf32> -> vector<16x32xf32>
    %cst_84 = arith.constant 0.000000e+00 : f32
    %144 = vector.broadcast %cst_84 : f32 to vector<16x32xf32>
    %145 = arith.maximumf %143, %144 : vector<16x32xf32>
    %cst_85 = arith.constant dense<0.000000e+00> : vector<16x32xf32>
    %146 = tpu.matmul %145, %92, %cst_85 {dimension_numbers = #tpu.dot_dimension_numbers<[1], [0], [0], [1], [0, 0, 1, 1], [], []>} : vector<16x32xf32>, vector<32x32xf32>, vector<16x32xf32> -> vector<16x32xf32>
    %147 = arith.addf %146, %103 : vector<16x32xf32>
    %cst_86 = arith.constant 0.000000e+00 : f32
    %148 = vector.broadcast %cst_86 : f32 to vector<16x32xf32>
    %149 = arith.maximumf %147, %148 : vector<16x32xf32>
    %cst_87 = arith.constant dense<0.000000e+00> : vector<16x4xf32>
    %150 = tpu.matmul %149, %93, %cst_87 {dimension_numbers = #tpu.dot_dimension_numbers<[1], [0], [0], [1], [0, 0, 1, 1], [], []>} : vector<16x32xf32>, vector<32x4xf32>, vector<16x4xf32> -> vector<16x4xf32>
    %151 = arith.addf %107, %150 : vector<16x4xf32>
    %152 = arith.addf %151, %96 : vector<16x4xf32>
    %c4 = arith.constant 4 : index
    %c0_88 = arith.constant 0 : index
    %c0_89 = arith.constant 0 : index
    %153 = vector.load %arg18[%c4, %c0_88, %c0_89] : memref<8x16x4xf32, #tpu.memory_space<vmem>>, vector<1x16x4xf32>
    %154 = vector.shape_cast %153 : vector<1x16x4xf32> to vector<16x4xf32>
    %155 = vector.shape_cast %152 : vector<16x4xf32> to vector<1x16x4xf32>
    tpu.vector_store %arg18[%c4, %c0_88, %c0_89], %155 {strides = array<i32>} : memref<8x16x4xf32, #tpu.memory_space<vmem>>, vector<1x16x4xf32>,
    %cst_90 = arith.constant dense<0.000000e+00> : vector<16x128xf32>
    %156 = tpu.matmul %128, %87, %cst_90 {dimension_numbers = #tpu.dot_dimension_numbers<[1], [0], [0], [1], [0, 0, 1, 1], [], []>} : vector<16x4xf32>, vector<4x128xf32>, vector<16x128xf32> -> vector<16x128xf32>
    %157 = arith.addf %156, %90 : vector<16x128xf32>
    %158 = vector.extract_strided_slice %157 {offsets = [0, 0], sizes = [16, 64], strides = [1, 1]} : vector<16x128xf32> to vector<16x64xf32>
    %cst_91 = arith.constant dense<0.000000e+00> : vector<128x64xf32>
    %159 = tpu.matmul %1, %158, %cst_91 {dimension_numbers = #tpu.dot_dimension_numbers<[1], [0], [0], [1], [0, 0, 1, 1], [], []>} : vector<128x16xf32>, vector<16x64xf32>, vector<128x64xf32> -> vector<128x64xf32>
    %160 = vector.extract_strided_slice %157 {offsets = [0, 64], sizes = [16, 64], strides = [1, 1]} : vector<16x128xf32> to vector<16x64xf32>
    %cst_92 = arith.constant dense<0.000000e+00> : vector<128x64xf32>
    %161 = tpu.matmul %0, %160, %cst_92 {dimension_numbers = #tpu.dot_dimension_numbers<[1], [0], [0], [1], [0, 0, 1, 1], [], []>} : vector<128x16xf32>, vector<16x64xf32>, vector<128x64xf32> -> vector<128x64xf32>
    %162 = arith.addf %159, %161 : vector<128x64xf32>
    %cst_93 = arith.constant 0.000000e+00 : f32
    %163 = vector.broadcast %cst_93 : f32 to vector<128x64xf32>
    %164 = arith.maximumf %162, %163 : vector<128x64xf32>
    %165 = arith.mulf %86, %164 : vector<128x64xf32>
    %cst_94 = arith.constant dense<0.000000e+00> : vector<16x64xf32>
    %166 = tpu.matmul %2, %165, %cst_94 {dimension_numbers = #tpu.dot_dimension_numbers<[1], [0], [0], [1], [0, 0, 1, 1], [], []>} : vector<16x128xf32>, vector<128x64xf32>, vector<16x64xf32> -> vector<16x64xf32>
    %cst_95 = arith.constant dense<0.000000e+00> : vector<16x32xf32>
    %167 = tpu.matmul %166, %91, %cst_95 {dimension_numbers = #tpu.dot_dimension_numbers<[1], [0], [0], [1], [0, 0, 1, 1], [], []>} : vector<16x64xf32>, vector<64x32xf32>, vector<16x32xf32> -> vector<16x32xf32>
    %cst_96 = arith.constant 0.000000e+00 : f32
    %168 = vector.broadcast %cst_96 : f32 to vector<16x32xf32>
    %169 = arith.maximumf %167, %168 : vector<16x32xf32>
    %cst_97 = arith.constant dense<0.000000e+00> : vector<16x32xf32>
    %170 = tpu.matmul %169, %92, %cst_97 {dimension_numbers = #tpu.dot_dimension_numbers<[1], [0], [0], [1], [0, 0, 1, 1], [], []>} : vector<16x32xf32>, vector<32x32xf32>, vector<16x32xf32> -> vector<16x32xf32>
    %171 = arith.addf %170, %103 : vector<16x32xf32>
    %cst_98 = arith.constant 0.000000e+00 : f32
    %172 = vector.broadcast %cst_98 : f32 to vector<16x32xf32>
    %173 = arith.maximumf %171, %172 : vector<16x32xf32>
    %cst_99 = arith.constant dense<0.000000e+00> : vector<16x4xf32>
    %174 = tpu.matmul %173, %93, %cst_99 {dimension_numbers = #tpu.dot_dimension_numbers<[1], [0], [0], [1], [0, 0, 1, 1], [], []>} : vector<16x32xf32>, vector<32x4xf32>, vector<16x4xf32> -> vector<16x4xf32>
    %175 = arith.addf %128, %174 : vector<16x4xf32>
    %176 = arith.addf %175, %96 : vector<16x4xf32>
    %c1_100 = arith.constant 1 : index
    %c0_101 = arith.constant 0 : index
    %c0_102 = arith.constant 0 : index
    %177 = vector.load %arg18[%c1_100, %c0_101, %c0_102] : memref<8x16x4xf32, #tpu.memory_space<vmem>>, vector<1x16x4xf32>
    %178 = vector.shape_cast %177 : vector<1x16x4xf32> to vector<16x4xf32>
    %179 = vector.shape_cast %176 : vector<16x4xf32> to vector<1x16x4xf32>
    tpu.vector_store %arg18[%c1_100, %c0_101, %c0_102], %179 {strides = array<i32>} : memref<8x16x4xf32, #tpu.memory_space<vmem>>, vector<1x16x4xf32>,
    %cst_103 = arith.constant dense<0.000000e+00> : vector<16x128xf32>
    %180 = tpu.matmul %152, %87, %cst_103 {dimension_numbers = #tpu.dot_dimension_numbers<[1], [0], [0], [1], [0, 0, 1, 1], [], []>} : vector<16x4xf32>, vector<4x128xf32>, vector<16x128xf32> -> vector<16x128xf32>
    %181 = arith.addf %180, %90 : vector<16x128xf32>
    %182 = vector.extract_strided_slice %181 {offsets = [0, 0], sizes = [16, 64], strides = [1, 1]} : vector<16x128xf32> to vector<16x64xf32>
    %cst_104 = arith.constant dense<0.000000e+00> : vector<128x64xf32>
    %183 = tpu.matmul %1, %182, %cst_104 {dimension_numbers = #tpu.dot_dimension_numbers<[1], [0], [0], [1], [0, 0, 1, 1], [], []>} : vector<128x16xf32>, vector<16x64xf32>, vector<128x64xf32> -> vector<128x64xf32>
    %184 = vector.extract_strided_slice %181 {offsets = [0, 64], sizes = [16, 64], strides = [1, 1]} : vector<16x128xf32> to vector<16x64xf32>
    %cst_105 = arith.constant dense<0.000000e+00> : vector<128x64xf32>
    %185 = tpu.matmul %0, %184, %cst_105 {dimension_numbers = #tpu.dot_dimension_numbers<[1], [0], [0], [1], [0, 0, 1, 1], [], []>} : vector<128x16xf32>, vector<16x64xf32>, vector<128x64xf32> -> vector<128x64xf32>
    %186 = arith.addf %183, %185 : vector<128x64xf32>
    %cst_106 = arith.constant 0.000000e+00 : f32
    %187 = vector.broadcast %cst_106 : f32 to vector<128x64xf32>
    %188 = arith.maximumf %186, %187 : vector<128x64xf32>
    %189 = arith.mulf %86, %188 : vector<128x64xf32>
    %cst_107 = arith.constant dense<0.000000e+00> : vector<16x64xf32>
    %190 = tpu.matmul %2, %189, %cst_107 {dimension_numbers = #tpu.dot_dimension_numbers<[1], [0], [0], [1], [0, 0, 1, 1], [], []>} : vector<16x128xf32>, vector<128x64xf32>, vector<16x64xf32> -> vector<16x64xf32>
    %cst_108 = arith.constant dense<0.000000e+00> : vector<16x32xf32>
    %191 = tpu.matmul %190, %91, %cst_108 {dimension_numbers = #tpu.dot_dimension_numbers<[1], [0], [0], [1], [0, 0, 1, 1], [], []>} : vector<16x64xf32>, vector<64x32xf32>, vector<16x32xf32> -> vector<16x32xf32>
    %cst_109 = arith.constant 0.000000e+00 : f32
    %192 = vector.broadcast %cst_109 : f32 to vector<16x32xf32>
    %193 = arith.maximumf %191, %192 : vector<16x32xf32>
    %cst_110 = arith.constant dense<0.000000e+00> : vector<16x32xf32>
    %194 = tpu.matmul %193, %92, %cst_110 {dimension_numbers = #tpu.dot_dimension_numbers<[1], [0], [0], [1], [0, 0, 1, 1], [], []>} : vector<16x32xf32>, vector<32x32xf32>, vector<16x32xf32> -> vector<16x32xf32>
    %195 = arith.addf %194, %103 : vector<16x32xf32>
    %cst_111 = arith.constant 0.000000e+00 : f32
    %196 = vector.broadcast %cst_111 : f32 to vector<16x32xf32>
    %197 = arith.maximumf %195, %196 : vector<16x32xf32>
    %cst_112 = arith.constant dense<0.000000e+00> : vector<16x4xf32>
    %198 = tpu.matmul %197, %93, %cst_112 {dimension_numbers = #tpu.dot_dimension_numbers<[1], [0], [0], [1], [0, 0, 1, 1], [], []>} : vector<16x32xf32>, vector<32x4xf32>, vector<16x4xf32> -> vector<16x4xf32>
    %199 = arith.addf %152, %198 : vector<16x4xf32>
    %200 = arith.addf %199, %96 : vector<16x4xf32>
    %c5 = arith.constant 5 : index
    %c0_113 = arith.constant 0 : index
    %c0_114 = arith.constant 0 : index
    %201 = vector.load %arg18[%c5, %c0_113, %c0_114] : memref<8x16x4xf32, #tpu.memory_space<vmem>>, vector<1x16x4xf32>
    %202 = vector.shape_cast %201 : vector<1x16x4xf32> to vector<16x4xf32>
    %203 = vector.shape_cast %200 : vector<16x4xf32> to vector<1x16x4xf32>
    tpu.vector_store %arg18[%c5, %c0_113, %c0_114], %203 {strides = array<i32>} : memref<8x16x4xf32, #tpu.memory_space<vmem>>, vector<1x16x4xf32>,
    %cst_115 = arith.constant dense<0.000000e+00> : vector<16x128xf32>
    %204 = tpu.matmul %176, %87, %cst_115 {dimension_numbers = #tpu.dot_dimension_numbers<[1], [0], [0], [1], [0, 0, 1, 1], [], []>} : vector<16x4xf32>, vector<4x128xf32>, vector<16x128xf32> -> vector<16x128xf32>
    %205 = arith.addf %204, %90 : vector<16x128xf32>
    %206 = vector.extract_strided_slice %205 {offsets = [0, 0], sizes = [16, 64], strides = [1, 1]} : vector<16x128xf32> to vector<16x64xf32>
    %cst_116 = arith.constant dense<0.000000e+00> : vector<128x64xf32>
    %207 = tpu.matmul %1, %206, %cst_116 {dimension_numbers = #tpu.dot_dimension_numbers<[1], [0], [0], [1], [0, 0, 1, 1], [], []>} : vector<128x16xf32>, vector<16x64xf32>, vector<128x64xf32> -> vector<128x64xf32>
    %208 = vector.extract_strided_slice %205 {offsets = [0, 64], sizes = [16, 64], strides = [1, 1]} : vector<16x128xf32> to vector<16x64xf32>
    %cst_117 = arith.constant dense<0.000000e+00> : vector<128x64xf32>
    %209 = tpu.matmul %0, %208, %cst_117 {dimension_numbers = #tpu.dot_dimension_numbers<[1], [0], [0], [1], [0, 0, 1, 1], [], []>} : vector<128x16xf32>, vector<16x64xf32>, vector<128x64xf32> -> vector<128x64xf32>
    %210 = arith.addf %207, %209 : vector<128x64xf32>
    %cst_118 = arith.constant 0.000000e+00 : f32
    %211 = vector.broadcast %cst_118 : f32 to vector<128x64xf32>
    %212 = arith.maximumf %210, %211 : vector<128x64xf32>
    %213 = arith.mulf %86, %212 : vector<128x64xf32>
    %cst_119 = arith.constant dense<0.000000e+00> : vector<16x64xf32>
    %214 = tpu.matmul %2, %213, %cst_119 {dimension_numbers = #tpu.dot_dimension_numbers<[1], [0], [0], [1], [0, 0, 1, 1], [], []>} : vector<16x128xf32>, vector<128x64xf32>, vector<16x64xf32> -> vector<16x64xf32>
    %cst_120 = arith.constant dense<0.000000e+00> : vector<16x32xf32>
    %215 = tpu.matmul %214, %91, %cst_120 {dimension_numbers = #tpu.dot_dimension_numbers<[1], [0], [0], [1], [0, 0, 1, 1], [], []>} : vector<16x64xf32>, vector<64x32xf32>, vector<16x32xf32> -> vector<16x32xf32>
    %cst_121 = arith.constant 0.000000e+00 : f32
    %216 = vector.broadcast %cst_121 : f32 to vector<16x32xf32>
    %217 = arith.maximumf %215, %216 : vector<16x32xf32>
    %cst_122 = arith.constant dense<0.000000e+00> : vector<16x32xf32>
    %218 = tpu.matmul %217, %92, %cst_122 {dimension_numbers = #tpu.dot_dimension_numbers<[1], [0], [0], [1], [0, 0, 1, 1], [], []>} : vector<16x32xf32>, vector<32x32xf32>, vector<16x32xf32> -> vector<16x32xf32>
    %219 = arith.addf %218, %103 : vector<16x32xf32>
    %cst_123 = arith.constant 0.000000e+00 : f32
    %220 = vector.broadcast %cst_123 : f32 to vector<16x32xf32>
    %221 = arith.maximumf %219, %220 : vector<16x32xf32>
    %cst_124 = arith.constant dense<0.000000e+00> : vector<16x4xf32>
    %222 = tpu.matmul %221, %93, %cst_124 {dimension_numbers = #tpu.dot_dimension_numbers<[1], [0], [0], [1], [0, 0, 1, 1], [], []>} : vector<16x32xf32>, vector<32x4xf32>, vector<16x4xf32> -> vector<16x4xf32>
    %223 = arith.addf %176, %222 : vector<16x4xf32>
    %224 = arith.addf %223, %96 : vector<16x4xf32>
    %c2 = arith.constant 2 : index
    %c0_125 = arith.constant 0 : index
    %c0_126 = arith.constant 0 : index
    %225 = vector.load %arg18[%c2, %c0_125, %c0_126] : memref<8x16x4xf32, #tpu.memory_space<vmem>>, vector<1x16x4xf32>
    %226 = vector.shape_cast %225 : vector<1x16x4xf32> to vector<16x4xf32>
    %227 = vector.shape_cast %224 : vector<16x4xf32> to vector<1x16x4xf32>
    tpu.vector_store %arg18[%c2, %c0_125, %c0_126], %227 {strides = array<i32>} : memref<8x16x4xf32, #tpu.memory_space<vmem>>, vector<1x16x4xf32>,
    %cst_127 = arith.constant dense<0.000000e+00> : vector<16x128xf32>
    %228 = tpu.matmul %200, %87, %cst_127 {dimension_numbers = #tpu.dot_dimension_numbers<[1], [0], [0], [1], [0, 0, 1, 1], [], []>} : vector<16x4xf32>, vector<4x128xf32>, vector<16x128xf32> -> vector<16x128xf32>
    %229 = arith.addf %228, %90 : vector<16x128xf32>
    %230 = vector.extract_strided_slice %229 {offsets = [0, 0], sizes = [16, 64], strides = [1, 1]} : vector<16x128xf32> to vector<16x64xf32>
    %cst_128 = arith.constant dense<0.000000e+00> : vector<128x64xf32>
    %231 = tpu.matmul %1, %230, %cst_128 {dimension_numbers = #tpu.dot_dimension_numbers<[1], [0], [0], [1], [0, 0, 1, 1], [], []>} : vector<128x16xf32>, vector<16x64xf32>, vector<128x64xf32> -> vector<128x64xf32>
    %232 = vector.extract_strided_slice %229 {offsets = [0, 64], sizes = [16, 64], strides = [1, 1]} : vector<16x128xf32> to vector<16x64xf32>
    %cst_129 = arith.constant dense<0.000000e+00> : vector<128x64xf32>
    %233 = tpu.matmul %0, %232, %cst_129 {dimension_numbers = #tpu.dot_dimension_numbers<[1], [0], [0], [1], [0, 0, 1, 1], [], []>} : vector<128x16xf32>, vector<16x64xf32>, vector<128x64xf32> -> vector<128x64xf32>
    %234 = arith.addf %231, %233 : vector<128x64xf32>
    %cst_130 = arith.constant 0.000000e+00 : f32
    %235 = vector.broadcast %cst_130 : f32 to vector<128x64xf32>
    %236 = arith.maximumf %234, %235 : vector<128x64xf32>
    %237 = arith.mulf %86, %236 : vector<128x64xf32>
    %cst_131 = arith.constant dense<0.000000e+00> : vector<16x64xf32>
    %238 = tpu.matmul %2, %237, %cst_131 {dimension_numbers = #tpu.dot_dimension_numbers<[1], [0], [0], [1], [0, 0, 1, 1], [], []>} : vector<16x128xf32>, vector<128x64xf32>, vector<16x64xf32> -> vector<16x64xf32>
    %cst_132 = arith.constant dense<0.000000e+00> : vector<16x32xf32>
    %239 = tpu.matmul %238, %91, %cst_132 {dimension_numbers = #tpu.dot_dimension_numbers<[1], [0], [0], [1], [0, 0, 1, 1], [], []>} : vector<16x64xf32>, vector<64x32xf32>, vector<16x32xf32> -> vector<16x32xf32>
    %cst_133 = arith.constant 0.000000e+00 : f32
    %240 = vector.broadcast %cst_133 : f32 to vector<16x32xf32>
    %241 = arith.maximumf %239, %240 : vector<16x32xf32>
    %cst_134 = arith.constant dense<0.000000e+00> : vector<16x32xf32>
    %242 = tpu.matmul %241, %92, %cst_134 {dimension_numbers = #tpu.dot_dimension_numbers<[1], [0], [0], [1], [0, 0, 1, 1], [], []>} : vector<16x32xf32>, vector<32x32xf32>, vector<16x32xf32> -> vector<16x32xf32>
    %243 = arith.addf %242, %103 : vector<16x32xf32>
    %cst_135 = arith.constant 0.000000e+00 : f32
    %244 = vector.broadcast %cst_135 : f32 to vector<16x32xf32>
    %245 = arith.maximumf %243, %244 : vector<16x32xf32>
    %cst_136 = arith.constant dense<0.000000e+00> : vector<16x4xf32>
    %246 = tpu.matmul %245, %93, %cst_136 {dimension_numbers = #tpu.dot_dimension_numbers<[1], [0], [0], [1], [0, 0, 1, 1], [], []>} : vector<16x32xf32>, vector<32x4xf32>, vector<16x4xf32> -> vector<16x4xf32>
    %247 = arith.addf %200, %246 : vector<16x4xf32>
    %248 = arith.addf %247, %96 : vector<16x4xf32>
    %c6 = arith.constant 6 : index
    %c0_137 = arith.constant 0 : index
    %c0_138 = arith.constant 0 : index
    %249 = vector.load %arg18[%c6, %c0_137, %c0_138] : memref<8x16x4xf32, #tpu.memory_space<vmem>>, vector<1x16x4xf32>
    %250 = vector.shape_cast %249 : vector<1x16x4xf32> to vector<16x4xf32>
    %251 = vector.shape_cast %248 : vector<16x4xf32> to vector<1x16x4xf32>
    tpu.vector_store %arg18[%c6, %c0_137, %c0_138], %251 {strides = array<i32>} : memref<8x16x4xf32, #tpu.memory_space<vmem>>, vector<1x16x4xf32>,
    %cst_139 = arith.constant dense<0.000000e+00> : vector<16x128xf32>
    %252 = tpu.matmul %224, %87, %cst_139 {dimension_numbers = #tpu.dot_dimension_numbers<[1], [0], [0], [1], [0, 0, 1, 1], [], []>} : vector<16x4xf32>, vector<4x128xf32>, vector<16x128xf32> -> vector<16x128xf32>
    %253 = arith.addf %252, %90 : vector<16x128xf32>
    %254 = vector.extract_strided_slice %253 {offsets = [0, 0], sizes = [16, 64], strides = [1, 1]} : vector<16x128xf32> to vector<16x64xf32>
    %cst_140 = arith.constant dense<0.000000e+00> : vector<128x64xf32>
    %255 = tpu.matmul %1, %254, %cst_140 {dimension_numbers = #tpu.dot_dimension_numbers<[1], [0], [0], [1], [0, 0, 1, 1], [], []>} : vector<128x16xf32>, vector<16x64xf32>, vector<128x64xf32> -> vector<128x64xf32>
    %256 = vector.extract_strided_slice %253 {offsets = [0, 64], sizes = [16, 64], strides = [1, 1]} : vector<16x128xf32> to vector<16x64xf32>
    %cst_141 = arith.constant dense<0.000000e+00> : vector<128x64xf32>
    %257 = tpu.matmul %0, %256, %cst_141 {dimension_numbers = #tpu.dot_dimension_numbers<[1], [0], [0], [1], [0, 0, 1, 1], [], []>} : vector<128x16xf32>, vector<16x64xf32>, vector<128x64xf32> -> vector<128x64xf32>
    %258 = arith.addf %255, %257 : vector<128x64xf32>
    %cst_142 = arith.constant 0.000000e+00 : f32
    %259 = vector.broadcast %cst_142 : f32 to vector<128x64xf32>
    %260 = arith.maximumf %258, %259 : vector<128x64xf32>
    %261 = arith.mulf %86, %260 : vector<128x64xf32>
    %cst_143 = arith.constant dense<0.000000e+00> : vector<16x64xf32>
    %262 = tpu.matmul %2, %261, %cst_143 {dimension_numbers = #tpu.dot_dimension_numbers<[1], [0], [0], [1], [0, 0, 1, 1], [], []>} : vector<16x128xf32>, vector<128x64xf32>, vector<16x64xf32> -> vector<16x64xf32>
    %cst_144 = arith.constant dense<0.000000e+00> : vector<16x32xf32>
    %263 = tpu.matmul %262, %91, %cst_144 {dimension_numbers = #tpu.dot_dimension_numbers<[1], [0], [0], [1], [0, 0, 1, 1], [], []>} : vector<16x64xf32>, vector<64x32xf32>, vector<16x32xf32> -> vector<16x32xf32>
    %cst_145 = arith.constant 0.000000e+00 : f32
    %264 = vector.broadcast %cst_145 : f32 to vector<16x32xf32>
    %265 = arith.maximumf %263, %264 : vector<16x32xf32>
    %cst_146 = arith.constant dense<0.000000e+00> : vector<16x32xf32>
    %266 = tpu.matmul %265, %92, %cst_146 {dimension_numbers = #tpu.dot_dimension_numbers<[1], [0], [0], [1], [0, 0, 1, 1], [], []>} : vector<16x32xf32>, vector<32x32xf32>, vector<16x32xf32> -> vector<16x32xf32>
    %267 = arith.addf %266, %103 : vector<16x32xf32>
    %cst_147 = arith.constant 0.000000e+00 : f32
    %268 = vector.broadcast %cst_147 : f32 to vector<16x32xf32>
    %269 = arith.maximumf %267, %268 : vector<16x32xf32>
    %cst_148 = arith.constant dense<0.000000e+00> : vector<16x4xf32>
    %270 = tpu.matmul %269, %93, %cst_148 {dimension_numbers = #tpu.dot_dimension_numbers<[1], [0], [0], [1], [0, 0, 1, 1], [], []>} : vector<16x32xf32>, vector<32x4xf32>, vector<16x4xf32> -> vector<16x4xf32>
    %271 = arith.addf %224, %270 : vector<16x4xf32>
    %272 = arith.addf %271, %96 : vector<16x4xf32>
    %c3 = arith.constant 3 : index
    %c0_149 = arith.constant 0 : index
    %c0_150 = arith.constant 0 : index
    %273 = vector.load %arg18[%c3, %c0_149, %c0_150] : memref<8x16x4xf32, #tpu.memory_space<vmem>>, vector<1x16x4xf32>
    %274 = vector.shape_cast %273 : vector<1x16x4xf32> to vector<16x4xf32>
    %275 = vector.shape_cast %272 : vector<16x4xf32> to vector<1x16x4xf32>
    tpu.vector_store %arg18[%c3, %c0_149, %c0_150], %275 {strides = array<i32>} : memref<8x16x4xf32, #tpu.memory_space<vmem>>, vector<1x16x4xf32>,
    %cst_151 = arith.constant dense<0.000000e+00> : vector<16x128xf32>
    %276 = tpu.matmul %248, %87, %cst_151 {dimension_numbers = #tpu.dot_dimension_numbers<[1], [0], [0], [1], [0, 0, 1, 1], [], []>} : vector<16x4xf32>, vector<4x128xf32>, vector<16x128xf32> -> vector<16x128xf32>
    %277 = arith.addf %276, %90 : vector<16x128xf32>
    %278 = vector.extract_strided_slice %277 {offsets = [0, 0], sizes = [16, 64], strides = [1, 1]} : vector<16x128xf32> to vector<16x64xf32>
    %cst_152 = arith.constant dense<0.000000e+00> : vector<128x64xf32>
    %279 = tpu.matmul %1, %278, %cst_152 {dimension_numbers = #tpu.dot_dimension_numbers<[1], [0], [0], [1], [0, 0, 1, 1], [], []>} : vector<128x16xf32>, vector<16x64xf32>, vector<128x64xf32> -> vector<128x64xf32>
    %280 = vector.extract_strided_slice %277 {offsets = [0, 64], sizes = [16, 64], strides = [1, 1]} : vector<16x128xf32> to vector<16x64xf32>
    %cst_153 = arith.constant dense<0.000000e+00> : vector<128x64xf32>
    %281 = tpu.matmul %0, %280, %cst_153 {dimension_numbers = #tpu.dot_dimension_numbers<[1], [0], [0], [1], [0, 0, 1, 1], [], []>} : vector<128x16xf32>, vector<16x64xf32>, vector<128x64xf32> -> vector<128x64xf32>
    %282 = arith.addf %279, %281 : vector<128x64xf32>
    %cst_154 = arith.constant 0.000000e+00 : f32
    %283 = vector.broadcast %cst_154 : f32 to vector<128x64xf32>
    %284 = arith.maximumf %282, %283 : vector<128x64xf32>
    %285 = arith.mulf %86, %284 : vector<128x64xf32>
    %cst_155 = arith.constant dense<0.000000e+00> : vector<16x64xf32>
    %286 = tpu.matmul %2, %285, %cst_155 {dimension_numbers = #tpu.dot_dimension_numbers<[1], [0], [0], [1], [0, 0, 1, 1], [], []>} : vector<16x128xf32>, vector<128x64xf32>, vector<16x64xf32> -> vector<16x64xf32>
    %cst_156 = arith.constant dense<0.000000e+00> : vector<16x32xf32>
    %287 = tpu.matmul %286, %91, %cst_156 {dimension_numbers = #tpu.dot_dimension_numbers<[1], [0], [0], [1], [0, 0, 1, 1], [], []>} : vector<16x64xf32>, vector<64x32xf32>, vector<16x32xf32> -> vector<16x32xf32>
    %cst_157 = arith.constant 0.000000e+00 : f32
    %288 = vector.broadcast %cst_157 : f32 to vector<16x32xf32>
    %289 = arith.maximumf %287, %288 : vector<16x32xf32>
    %cst_158 = arith.constant dense<0.000000e+00> : vector<16x32xf32>
    %290 = tpu.matmul %289, %92, %cst_158 {dimension_numbers = #tpu.dot_dimension_numbers<[1], [0], [0], [1], [0, 0, 1, 1], [], []>} : vector<16x32xf32>, vector<32x32xf32>, vector<16x32xf32> -> vector<16x32xf32>
    %291 = arith.addf %290, %103 : vector<16x32xf32>
    %cst_159 = arith.constant 0.000000e+00 : f32
    %292 = vector.broadcast %cst_159 : f32 to vector<16x32xf32>
    %293 = arith.maximumf %291, %292 : vector<16x32xf32>
    %cst_160 = arith.constant dense<0.000000e+00> : vector<16x4xf32>
    %294 = tpu.matmul %293, %93, %cst_160 {dimension_numbers = #tpu.dot_dimension_numbers<[1], [0], [0], [1], [0, 0, 1, 1], [], []>} : vector<16x32xf32>, vector<32x4xf32>, vector<16x4xf32> -> vector<16x4xf32>
    %295 = arith.addf %248, %294 : vector<16x4xf32>
    %296 = arith.addf %295, %96 : vector<16x4xf32>
    %c7 = arith.constant 7 : index
    %c0_161 = arith.constant 0 : index
    %c0_162 = arith.constant 0 : index
    %297 = vector.load %arg18[%c7, %c0_161, %c0_162] : memref<8x16x4xf32, #tpu.memory_space<vmem>>, vector<1x16x4xf32>
    %298 = vector.shape_cast %297 : vector<1x16x4xf32> to vector<16x4xf32>
    %299 = vector.shape_cast %296 : vector<16x4xf32> to vector<1x16x4xf32>
    tpu.vector_store %arg18[%c7, %c0_161, %c0_162], %299 {strides = array<i32>} : memref<8x16x4xf32, #tpu.memory_space<vmem>>, vector<1x16x4xf32>,
    return
  }
}

</mosaic_0001>

<bundles_post_ra>
// kernel: node_decoder_forward.1
= control target key start
LH: loop header
LB: loop body
LE: loop exit
PB: predicated region body
PF: predicated region fallthrough
CT: control target
= control target key end

     0   :  { %vm117_vm0 = vcmask 130048   ;;  %s10247_s27 = smov 64   ;;  %s10248_s22 = smov 96   ;;  %vm609_vm1 = vcmask 261120   ;;  %s13259_s9 = inlined_call_operand.vmem [shape: f32[16,128], index: 9, kind: input, shape index: {}]   ;;  %s13260_s1 = inlined_call_operand.vmem [shape: f32[16,16], index: 1, kind: input, shape index: {}]   ;;  %s13261_s6 = inlined_call_operand.vmem [shape: f32[128,16], index: 6, kind: input, shape index: {}]   ;;  %s13262_s5 = inlined_call_operand.vmem [shape: f32[128,16], index: 5, kind: input, shape index: {}]   ;;  %s13263_s7 = inlined_call_operand.vmem [shape: f32[16,128], index: 7, kind: input, shape index: {}]   ;;  %s13264_s8 = inlined_call_operand.vmem [shape: f32[128,8], index: 8, kind: input, shape index: {}]   ;;  %s13265_s3 = inlined_call_operand.vmem [shape: f32[16,8], index: 3, kind: input, shape index: {}]   ;;  %s13266_s14 = inlined_call_operand.vmem [shape: f32[16,32], index: 14, kind: input, shape index: {}]   ;;  %s13267_s2 = inlined_call_operand.vmem [shape: f32[16,16], index: 2, kind: input, shape index: {}]   ;;  %s13268_s10 = inlined_call_operand.vmem [shape: f32[4,128], index: 10, kind: input, shape index: {}]   ;;  %s13269_s0 = inlined_call_operand.vmem [shape: f32[2,16,4], index: 0, kind: input, shape index: {}]   ;;  %s13270_s4 = inlined_call_operand.vmem [shape: f32[16,1], index: 4, kind: input, shape index: {}]   ;;  %s13271_s11 = inlined_call_operand.vmem [shape: f32[1,128], index: 11, kind: input, shape index: {}]   ;;  %s13272_s12 = inlined_call_operand.vmem [shape: f32[64,32], index: 12, kind: input, shape index: {}]   ;;  %s13273_s13 = inlined_call_operand.vmem [shape: f32[32,32], index: 13, kind: input, shape index: {}]   ;;  %s13274_s16 = inlined_call_operand.vmem [shape: f32[32,4], index: 16, kind: input, shape index: {}]   ;;  %s13275_s15 = inlined_call_operand.vmem [shape: f32[1,32], index: 15, kind: input, shape index: {}]   ;;  %s13276_s17 = inlined_call_operand.vmem [shape: f32[1,4], index: 17, kind: input, shape index: {}]   ;;  %s13277_s18 = inlined_call_operand.vmem [shape: f32[8,16,4], index: 18, kind: output, shape index: {}]  }
   0x1   :  { %13601 = sst [smem:[#allocation55_spill]] %s13259_s9  ;;  %v10366_v5 = vld [vmem:[%s13262_s5] sm:$0xff]  ;;  %v60_v25 = vld [vmem:[%s13262_s5 + $0x8] sm:$0xff]  ;;  %v61_v26 = vld [vmem:[%s13262_s5 + $0x10] sm:$0xff] }
   0x2   :  { %13602 = sst [smem:[#allocation56_spill]] %s13260_s1  ;;  %v62_v27 = vld [vmem:[%s13262_s5 + $0x18] sm:$0xff]  ;;  %v63_v28 = vld [vmem:[%s13262_s5 + $0x20] sm:$0xff]  ;;  %v64_v29 = vld [vmem:[%s13262_s5 + $0x28] sm:$0xff] }
   0x3   :  { %13603 = sst [smem:[#allocation57_spill]] %s13261_s6  ;;  %v65_v30 = vld [vmem:[%s13262_s5 + $0x30] sm:$0xff]  ;;  %v66_v31 = vld [vmem:[%s13262_s5 + $0x38] sm:$0xff]  ;;  %v67_v32 = vld [vmem:[%s13262_s5 + $0x40] sm:$0xff] }
   0x4   :  { %s13604_s29 = sld [smem:[#allocation55_spill]]  ;;  %v68_v33 = vld [vmem:[%s13262_s5 + $0x48] sm:$0xff]  ;;  %v69_v34 = vld [vmem:[%s13262_s5 + $0x50] sm:$0xff]  ;;  %v70_v35 = vld [vmem:[%s13262_s5 + $0x58] sm:$0xff] }
   0x5   :  { %s13605_s20 = sld [smem:[#allocation56_spill]]  ;;  %v71_v36 = vld [vmem:[%s13262_s5 + $0x60] sm:$0xff]  ;;  %v72_v37 = vld [vmem:[%s13262_s5 + $0x68] sm:$0xff]  ;;  %v73_v38 = vld [vmem:[%s13262_s5 + $0x70] sm:$0xff] }
   0x6   :  { %s13606_s24 = sld [smem:[#allocation57_spill]]  ;;  %v74_v39 = vld [vmem:[%s13262_s5 + $0x78] sm:$0xff] }
   0xa   :  { %v116_v0 = vld [vmem:[%s13604_s29 + $0x8] sm:$0xff]  ;;  %v115_v1 = vld [vmem:[%s13604_s29] sm:$0xff] }
   0xb   :  { %v113_v2 = vld [vmem:[%s13605_s20] sm:$0xff]  ;;  %8789 = vmatprep.subr.mxu0 %v116_v0  ;;  %v114_v3 = vld [vmem:[%s13605_s20 + $0x8] sm:$0xff] }
   0xc   :  { %8793 = vmatprep.mubr.msk.f32.mxu0 %vm117_vm0, %v113_v2  ;;  %8790 = vmatpush3.msra.mxu0 %v116_v0  ;;  %v75_v4 = vld [vmem:[%s13606_s24] sm:$0xff]  ;;  %v76_v8 = vld [vmem:[%s13606_s24 + $0x8] sm:$0xff]  ;;  %v77_v9 = vld [vmem:[%s13606_s24 + $0x10] sm:$0xff] }
   0xd   :  { %8791 = vmatprep.subr.mxu0 %v115_v1  ;;  %8800 = vmatprep.mubr.msk.f32.mxu1 %vm117_vm0, %v75_v4  ;;  %v78_v10 = vld [vmem:[%s13606_s24 + $0x18] sm:$0xff]  ;;  %v79_v11 = vld [vmem:[%s13606_s24 + $0x20] sm:$0xff]  ;;  %v80_v12 = vld [vmem:[%s13606_s24 + $0x28] sm:$0xff] }
   0xe   :  { %8792 = vmatpush3.msra.mxu0 %v115_v1  ;;  %v81_v13 = vld [vmem:[%s13606_s24 + $0x30] sm:$0xff]  ;;  %v82_v14 = vld [vmem:[%s13606_s24 + $0x38] sm:$0xff]  ;;  %v83_v15 = vld [vmem:[%s13606_s24 + $0x40] sm:$0xff] }
   0xf   :  { %8794 = vmatmul.mubr.msk.f32.vlgmr.msra.gmra.mxu0 %vm117_vm0, %v114_v3  ;;  %v84_v16 = vld [vmem:[%s13606_s24 + $0x48] sm:$0xff]  ;;  %v85_v17 = vld [vmem:[%s13606_s24 + $0x50] sm:$0xff]  ;;  %v86_v18 = vld [vmem:[%s13606_s24 + $0x58] sm:$0xff] }
  0x10   :  { %8828 = vmatprep.mubr.msk.f32.mxu0 %vm117_vm0, %v10366_v5  ;;  %v87_v19 = vld [vmem:[%s13606_s24 + $0x60] sm:$0xff]  ;;  %v88_v20 = vld [vmem:[%s13606_s24 + $0x68] sm:$0xff]  ;;  %v89_v21 = vld [vmem:[%s13606_s24 + $0x70] sm:$0xff] }
  0x11   :  { %v90_v22 = vld [vmem:[%s13606_s24 + $0x78] sm:$0xff] }
  0xcf   :  { %v8795_v6 = vpop.f32.mrf.mxu0 }
  0xd0   :  { %396 = vrot.lane.b32.xlu0 %v8795_v6, %s10247_s27  ;;  %8796 = vmatprep.subr.mxu1 %v8795_v6 }
  0xd1   :  { %v190_v7 = vpop.f32.mrf.mxu0  ;;  %8797 = vmatpush3.msra.mxu1 %v8795_v6 }
  0xd2   :  { %8798 = vmatprep.subr.mxu1 %v190_v7 }
  0xd3   :  { %8799 = vmatpush3.msra.mxu1 %v190_v7 }
  0xd4   :  { %394 = vrot.lane.b32.xlu0 %v190_v7, %s10247_s27  ;;  %8801 = vmatmul.mubr.msk.f32.vlgmr.msra.gmra.mxu1 %vm117_vm0, %v76_v8 }
  0xd5   :  { %8803 = vmatprep.mubr.msk.f32.mxu1 %vm117_vm0, %v77_v9 }
  0xd8   :  { %8804 = vmatmul.mubr.msk.f32.gmra.mxu1 %vm117_vm0, %v78_v10 }
  0xd9   :  { %8806 = vmatprep.mubr.msk.f32.mxu1 %vm117_vm0, %v79_v11 }
  0xdc   :  { %8807 = vmatmul.mubr.msk.f32.gmra.mxu1 %vm117_vm0, %v80_v12 }
  0xdd   :  { %8809 = vmatprep.mubr.msk.f32.mxu1 %vm117_vm0, %v81_v13 }
  0xe0   :  { %8810 = vmatmul.mubr.msk.f32.gmra.mxu1 %vm117_vm0, %v82_v14 }
  0xe1   :  { %8812 = vmatprep.mubr.msk.f32.mxu1 %vm117_vm0, %v83_v15 }
  0xe4   :  { %8813 = vmatmul.mubr.msk.f32.gmra.mxu1 %vm117_vm0, %v84_v16 }
  0xe5   :  { %8815 = vmatprep.mubr.msk.f32.mxu1 %vm117_vm0, %v85_v17 }
  0xe8   :  { %8816 = vmatmul.mubr.msk.f32.gmra.mxu1 %vm117_vm0, %v86_v18 }
  0xe9   :  { %8818 = vmatprep.mubr.msk.f32.mxu1 %vm117_vm0, %v87_v19 }
  0xec   :  { %8819 = vmatmul.mubr.msk.f32.gmra.mxu1 %vm117_vm0, %v88_v20 }
  0xed   :  { %8821 = vmatprep.mubr.msk.f32.mxu1 %vm117_vm0, %v89_v21 }
  0xf0   :  { %8822 = vmatmul.mubr.msk.f32.gmra.mxu1 %vm117_vm0, %v90_v22 }
 0x142   :  { %v397_v23 = vpop.permute.xlu0 %396 }
 0x143   :  { %8824 = vmatprep.subr.mxu0 %v397_v23 }
 0x144   :  { %8825 = vmatpush3.msra.mxu0 %v397_v23 }
 0x146   :  { %v395_v24 = vpop.permute.xlu0 %394 }
 0x147   :  { %8826 = vmatprep.subr.mxu0 %v395_v24 }
 0x148   :  { %8827 = vmatpush3.msra.mxu0 %v395_v24 }
 0x149   :  { %8829 = vmatmul.mubr.msk.f32.vlgmr.msra.gmra.mxu0 %vm117_vm0, %v60_v25 }
 0x14a   :  { %8831 = vmatprep.mubr.msk.f32.mxu0 %vm117_vm0, %v61_v26 }
 0x14d   :  { %8832 = vmatmul.mubr.msk.f32.gmra.mxu0 %vm117_vm0, %v62_v27 }
 0x14e   :  { %8834 = vmatprep.mubr.msk.f32.mxu0 %vm117_vm0, %v63_v28 }
 0x151   :  { %8835 = vmatmul.mubr.msk.f32.gmra.mxu0 %vm117_vm0, %v64_v29 }
 0x152   :  { %8837 = vmatprep.mubr.msk.f32.mxu0 %vm117_vm0, %v65_v30 }
 0x155   :  { %8838 = vmatmul.mubr.msk.f32.gmra.mxu0 %vm117_vm0, %v66_v31 }
 0x156   :  { %8840 = vmatprep.mubr.msk.f32.mxu0 %vm117_vm0, %v67_v32 }
 0x159   :  { %8841 = vmatmul.mubr.msk.f32.gmra.mxu0 %vm117_vm0, %v68_v33 }
 0x15a   :  { %8843 = vmatprep.mubr.msk.f32.mxu0 %vm117_vm0, %v69_v34 }
 0x15d   :  { %8844 = vmatmul.mubr.msk.f32.gmra.mxu0 %vm117_vm0, %v70_v35 }
 0x15e   :  { %8846 = vmatprep.mubr.msk.f32.mxu0 %vm117_vm0, %v71_v36 }
 0x161   :  { %8847 = vmatmul.mubr.msk.f32.gmra.mxu0 %vm117_vm0, %v72_v37 }
 0x162   :  { %8849 = vmatprep.mubr.msk.f32.mxu0 %vm117_vm0, %v73_v38 }
 0x165   :  { %8850 = vmatmul.mubr.msk.f32.gmra.mxu0 %vm117_vm0, %v74_v39 }
 0x166   :  { %8891 = vmatprep.mubr.msk.f32.mxu0 %vm117_vm0, %v10366_v5 }
 0x194   :  { %v8802_v40 = vpop.f32.mrf.mxu1 }
 0x196   :  { %v10494_v41 = vpop.f32.mrf.mxu1 }
 0x198   :  { %v8805_v42 = vpop.f32.mrf.mxu1 }
 0x19a   :  { %v323_v43 = vpop.f32.mrf.mxu1 }
 0x19c   :  { %v8808_v44 = vpop.f32.mrf.mxu1 }
 0x19e   :  { %v333_v45 = vpop.f32.mrf.mxu1 }
 0x1a0   :  { %v8811_v46 = vpop.f32.mrf.mxu1 }
 0x1a2   :  { %v343_v50 = vpop.f32.mrf.mxu1 }
 0x1a4   :  { %v8814_v54 = vpop.f32.mrf.mxu1 }
 0x1a6   :  { %v353_v59 = vpop.f32.mrf.mxu1 }
 0x1a8   :  { %v8817_v0 = vpop.f32.mrf.mxu1 }
 0x1aa   :  { %v363_v5 = vpop.f32.mrf.mxu1 }
 0x1ac   :  { %v8820_v9 = vpop.f32.mrf.mxu1 }
 0x1ae   :  { %v373_v14 = vpop.f32.mrf.mxu1 }
 0x1b0   :  { %v8823_v17 = vpop.f32.mrf.mxu1 }
 0x1b2   :  { %v383_v24 = vpop.f32.mrf.mxu1 }
 0x209   :  { %v8830_v47 = vpop.f32.mrf.mxu0 }
 0x20a   :  { %v10496_v48 = vmul.f32 %v8830_v47, %v8802_v40 }
 0x20b   :  { %v514_v49 = vpop.f32.mrf.mxu0 }
 0x20c   :  { %1069 = vrot.lane.b32.xlu1 %v10496_v48, %s10248_s22  ;;  %v593_v23 = vmul.f32 %v514_v49, %v10494_v41  ;;  %v613_v28 = vsel %vm609_vm1, %v10496_v48, 0.0 }
 0x20d   :  { %v8833_v51 = vpop.f32.mrf.mxu0 }
 0x20e   :  { %v10500_v52 = vmul.f32 %v8833_v51, %v8805_v42 }
 0x20f   :  { %v524_v53 = vpop.f32.mrf.mxu0 }
 0x210   :  { %v10502_v55 = vmul.f32 %v524_v53, %v323_v43  ;;  %1073 = vrot.lane.b32.xlu0 %v10500_v52, %s10248_s22 }
 0x211   :  { %v8836_v56 = vpop.f32.mrf.mxu0 }
 0x212   :  { %v10506_v57 = vmul.f32 %v8836_v56, %v8808_v44  ;;  %1071 = vrot.lane.b32.xlu1 %v10502_v55, %s10248_s22  ;;  %v619_v56 = vsel %vm609_vm1, %v10500_v52, 0.0 }
 0x213   :  { %v534_v58 = vpop.f32.mrf.mxu0 }
 0x214   :  { %v10510_v60 = vmul.f32 %v534_v58, %v333_v45  ;;  %1077 = vrot.lane.b32.xlu0 %v10506_v57, %s10248_s22 }
 0x215   :  { %v8839_v61 = vpop.f32.mrf.mxu0 }
 0x216   :  { %v10514_v62 = vmul.f32 %v8839_v61, %v8811_v46  ;;  %1075 = vrot.lane.b32.xlu1 %v10510_v60, %s10248_s22  ;;  %v622_v53 = vsel %vm609_vm1, %v10510_v60, 0.0  ;;  %v610_v60 = vsel %vm609_vm1, %v593_v23, 0.0 }
 0x217   :  { %v544_v63 = vpop.f32.mrf.mxu0 }
 0x218   :  { %v10518_v1 = vmul.f32 %v544_v63, %v343_v50  ;;  %1081 = vrot.lane.b32.xlu0 %v10514_v62, %s10248_s22  ;;  %v631_v43 = vsel %vm609_vm1, %v10514_v62, 0.0  ;;  %v625_v50 = vsel %vm609_vm1, %v10506_v57, 0.0  ;;  %v616_v57 = vsel %vm609_vm1, %v10502_v55, 0.0  ;;  %v10574_v55 = vld [vmem:[%s13263_s7] sm:$0xff] }
 0x219   :  { %v8842_v2 = vpop.f32.mrf.mxu0  ;;  %8884 = vmatprep.mubr.f32.mxu1 %v10574_v55 }
 0x21a   :  { %v602_v3 = vmul.f32 %v8842_v2, %v8814_v54  ;;  %1079 = vrot.lane.b32.xlu1 %v10518_v1, %s10248_s22  ;;  %v628_v46 = vsel %vm609_vm1, %v10518_v1, 0.0  ;;  %v10580_v1 = vld [vmem:[%s13264_s8 + $0x78] sm:$0xff] }
 0x21b   :  { %v554_v4 = vpop.f32.mrf.mxu0 }
 0x21c   :  { %v601_v6 = vmul.f32 %v554_v4, %v353_v59  ;;  %1085 = vrot.lane.b32.xlu0 %v602_v3, %s10248_s22  ;;  %v637_v27 = vsel %vm609_vm1, %v602_v3, 0.0 }
 0x21d   :  { %v8845_v7 = vpop.f32.mrf.mxu0 }
 0x21e   :  { %v604_v8 = vmul.f32 %v8845_v7, %v8817_v0  ;;  %1083 = vrot.lane.b32.xlu1 %v601_v6, %s10248_s22  ;;  %v634_v38 = vsel %vm609_vm1, %v601_v6, 0.0 }
 0x21f   :  { %v564_v10 = vpop.f32.mrf.mxu0 }
 0x220   :  { %v603_v11 = vmul.f32 %v564_v10, %v363_v5  ;;  %1089 = vrot.lane.b32.xlu0 %v604_v8, %s10248_s22  ;;  %v643_v33 = vsel %vm609_vm1, %v604_v8, 0.0 }
 0x221   :  { %v8848_v12 = vpop.f32.mrf.mxu0 }
 0x222   :  { %v606_v13 = vmul.f32 %v8848_v12, %v8820_v9  ;;  %1087 = vrot.lane.b32.xlu1 %v603_v11, %s10248_s22  ;;  %v640_v35 = vsel %vm609_vm1, %v603_v11, 0.0 }
 0x223   :  { %v574_v15 = vpop.f32.mrf.mxu0 }
 0x224   :  { %v605_v16 = vmul.f32 %v574_v15, %v373_v14  ;;  %1093 = vrot.lane.b32.xlu0 %v606_v13, %s10248_s22  ;;  %v649_v21 = vsel %vm609_vm1, %v606_v13, 0.0 }
 0x225   :  { %v8851_v18 = vpop.f32.mrf.mxu0 }
 0x226   :  { %v608_v19 = vmul.f32 %v8851_v18, %v8823_v17  ;;  %1091 = vrot.lane.b32.xlu1 %v605_v16, %s10248_s22  ;;  %v646_v22 = vsel %vm609_vm1, %v605_v16, 0.0 }
 0x227   :  { %v584_v25 = vpop.f32.mrf.mxu0 }
 0x228   :  { %v655_v20 = vsel %vm609_vm1, %v608_v19, 0.0  ;;  %v607_v26 = vmul.f32 %v584_v25, %v383_v24 }
 0x22a   :  { %1097 = vrot.lane.b32.xlu1 %v608_v19, %s10248_s22  ;;  %v652_v41 = vsel %vm609_vm1, %v607_v26, 0.0 }
 0x243   :  { %656 = vadd.xlane.f32.xlu0 %v655_v20 }
 0x24e   :  { %650 = vadd.xlane.f32.xlu1 %v649_v21 }
 0x252   :  { %647 = vadd.xlane.f32.xlu1 %v646_v22 }
 0x259   :  { %1067 = vrot.lane.b32.xlu0 %v593_v23, %s10248_s22  ;;  %v10597_v23 = vld [vmem:[%s13264_s8 + $0x70] sm:$0xff] }
 0x263   :  { %1095 = vrot.lane.b32.xlu1 %v607_v26, %s10248_s22  ;;  %v10602_v26 = vld [vmem:[%s13264_s8 + $0x68] sm:$0xff] }
 0x278   :  { %638 = vadd.xlane.f32.xlu0 %v637_v27 }
 0x27c   :  { %614 = vadd.xlane.f32.xlu0 %v613_v28 }
 0x27e   :  { %v1070_v29 = vpop.permute.xlu1 %1069 }
 0x27f   :  { %v1118_v52 = vsel %vm609_vm1, %v1070_v29, 0.0 }
 0x282   :  { %v1074_v30 = vpop.permute.xlu0 %1073 }
 0x283   :  { %v1124_v62 = vsel %vm609_vm1, %v1074_v30, 0.0 }
 0x284   :  { %v10540_v31 = vpop.permute.xlu1 %1071 }
 0x285   :  { %v1121_v13 = vsel %vm609_vm1, %v10540_v31, 0.0 }
 0x286   :  { %v1078_v32 = vpop.permute.xlu0 %1077 }
 0x287   :  { %644 = vadd.xlane.f32.xlu1 %v643_v33  ;;  %v1130_v61 = vsel %vm609_vm1, %v1078_v32, 0.0  ;;  %v10608_v32 = vld [vmem:[%s13264_s8 + $0x60] sm:$0xff] }
 0x288   :  { %v10543_v34 = vpop.permute.xlu1 %1075 }
 0x289   :  { %v1127_v12 = vsel %vm609_vm1, %v10543_v34, 0.0 }
 0x28a   :  { %v1082_v36 = vpop.permute.xlu0 %1081 }
 0x28b   :  { %641 = vadd.xlane.f32.xlu1 %v640_v35  ;;  %v1136_v59 = vsel %vm609_vm1, %v1082_v36, 0.0  ;;  %v10614_v36 = vld [vmem:[%s13264_s8 + $0x58] sm:$0xff] }
 0x28c   :  { %v10546_v37 = vpop.permute.xlu1 %1079 }
 0x28d   :  { %v1133_v11 = vsel %vm609_vm1, %v10546_v37, 0.0 }
 0x28e   :  { %v1086_v40 = vpop.permute.xlu0 %1085 }
 0x28f   :  { %635 = vadd.xlane.f32.xlu1 %v634_v38  ;;  %v1142_v58 = vsel %vm609_vm1, %v1086_v40, 0.0 }
 0x290   :  { %v1084_v39 = vpop.permute.xlu1 %1083 }
 0x291   :  { %v1139_v10 = vsel %vm609_vm1, %v1084_v39, 0.0 }
 0x292   :  { %v1090_v44 = vpop.permute.xlu0 %1089 }
 0x293   :  { %653 = vadd.xlane.f32.xlu1 %v652_v41  ;;  %v1148_v54 = vsel %vm609_vm1, %v1090_v44, 0.0  ;;  %v10620_v41 = vld [vmem:[%s13264_s8 + $0x50] sm:$0xff] }
 0x294   :  { %v1088_v42 = vpop.permute.xlu1 %1087 }
 0x295   :  { %v1145_v9 = vsel %vm609_vm1, %v1088_v42, 0.0 }
 0x296   :  { %v1094_v49 = vpop.permute.xlu0 %1093 }
 0x297   :  { %632 = vadd.xlane.f32.xlu1 %v631_v43  ;;  %v1154_v51 = vsel %vm609_vm1, %v1094_v49, 0.0 }
 0x298   :  { %v1092_v45 = vpop.permute.xlu1 %1091 }
 0x299   :  { %v1151_v8 = vsel %vm609_vm1, %v1092_v45, 0.0 }
 0x29b   :  { %629 = vadd.xlane.f32.xlu1 %v628_v46  ;;  %v10626_v46 = vld [vmem:[%s13264_s8 + $0x48] sm:$0xff] }
 0x29c   :  { %v1098_v47 = vpop.permute.xlu1 %1097 }
 0x29d   :  { %v1160_v48 = vsel %vm609_vm1, %v1098_v47, 0.0 }
 0x29e   :  { %1161 = vadd.xlane.f32.xlu0 %v1160_v48 }
 0x29f   :  { %626 = vadd.xlane.f32.xlu1 %v625_v50  ;;  %v10632_v50 = vld [vmem:[%s13264_s8 + $0x40] sm:$0xff] }
 0x2a2   :  { %1155 = vadd.xlane.f32.xlu0 %v1154_v51 }
 0x2a3   :  { %623 = vadd.xlane.f32.xlu1 %v622_v53 }
 0x2a6   :  { %1149 = vadd.xlane.f32.xlu0 %v1148_v54 }
 0x2a7   :  { %620 = vadd.xlane.f32.xlu1 %v619_v56 }
 0x2aa   :  { %1143 = vadd.xlane.f32.xlu0 %v1142_v58  ;;  %v10638_v58 = vld [vmem:[%s13264_s8 + $0x38] sm:$0xff] }
 0x2ab   :  { %617 = vadd.xlane.f32.xlu1 %v616_v57 }
 0x2ae   :  { %1137 = vadd.xlane.f32.xlu0 %v1136_v59 }
 0x2af   :  { %611 = vadd.xlane.f32.xlu1 %v610_v60 }
 0x2b2   :  { %1131 = vadd.xlane.f32.xlu0 %v1130_v61 }
 0x2b6   :  { %1125 = vadd.xlane.f32.xlu0 %v1124_v62  ;;  %v10644_v62 = vld [vmem:[%s13264_s8 + $0x30] sm:$0xff] }
 0x2ba   :  { %1119 = vadd.xlane.f32.xlu0 %v1118_v52 }
 0x2cc   :  { %v657_v63 = vpop.xlane.xlu0 %656 }
 0x2cd   :  { %vm673_vm2 = vcmp.ge.f32.partialorder %v657_v63, 0.0  ;;  %v689_v0 = vmul.f32 0.01, %v657_v63 }
 0x2cf   :  { %v705_v2 = vsel %vm673_vm2, %v657_v63, %v689_v0  ;;  %v10650_v0 = vld [vmem:[%s13264_s8 + $0x28] sm:$0xff] }
 0x2d0   :  { %v721_v3 = vmul.f32 %v705_v2, %v10580_v1  ;;  %v1068_v14 = vpop.permute.xlu0 %1067 }
 0x2d1   :  { %v1115_v15 = vsel %vm609_vm1, %v1068_v14, 0.0 }
 0x2d2   :  { %8852 = vmatprep.subr.mxu1 %v721_v3 }
 0x2d3   :  { %8853 = vmatpush3.msra.mxu1 %v721_v3 }
 0x2d7   :  { %v651_v4 = vpop.xlane.xlu1 %650 }
 0x2d8   :  { %v687_v19 = vmul.f32 0.01, %v651_v4  ;;  %vm671_vm3 = vcmp.ge.f32.partialorder %v651_v4, 0.0 }
 0x2da   :  { %v703_v27 = vsel %vm671_vm3, %v651_v4, %v687_v19 }
 0x2db   :  { %v648_v5 = vpop.xlane.xlu1 %647  ;;  %v719_v34 = vmul.f32 %v703_v27, %v10602_v26  ;;  %v10680_v27 = vld [vmem:[%s13264_s8] sm:$0xff] }
 0x2dc   :  { %v686_v21 = vmul.f32 0.01, %v648_v5  ;;  %vm670_vm5 = vcmp.ge.f32.partialorder %v648_v5, 0.0 }
 0x2de   :  { %v702_v33 = vsel %vm670_vm5, %v648_v5, %v686_v21  ;;  %v10674_v21 = vld [vmem:[%s13264_s8 + $0x8] sm:$0xff] }
 0x2df   :  { %v1096_v6 = vpop.permute.xlu1 %1095  ;;  %v718_v39 = vmul.f32 %v702_v33, %v10608_v32  ;;  %v10687_v33 = vld [vmem:[%s13263_s7 + $0x8] sm:$0xff] }
 0x2e0   :  { %v1157_v7 = vsel %vm609_vm1, %v1096_v6, 0.0 }
 0x2e1   :  { %1158 = vadd.xlane.f32.xlu1 %v1157_v7  ;;  %v10656_v7 = vld [vmem:[%s13264_s8 + $0x20] sm:$0xff] }
 0x2e5   :  { %1152 = vadd.xlane.f32.xlu1 %v1151_v8 }
 0x2e9   :  { %1146 = vadd.xlane.f32.xlu1 %v1145_v9 }
 0x2ed   :  { %1140 = vadd.xlane.f32.xlu1 %v1139_v10 }
 0x2f1   :  { %1134 = vadd.xlane.f32.xlu1 %v1133_v11  ;;  %v10662_v11 = vld [vmem:[%s13264_s8 + $0x18] sm:$0xff] }
 0x2f5   :  { %1128 = vadd.xlane.f32.xlu1 %v1127_v12 }
 0x2f9   :  { %1122 = vadd.xlane.f32.xlu1 %v1121_v13 }
 0x2fd   :  { %1116 = vadd.xlane.f32.xlu1 %v1115_v15 }
 0x301   :  { %v639_v28 = vpop.xlane.xlu0 %638 }
 0x302   :  { %v683_v35 = vmul.f32 0.01, %v639_v28  ;;  %vm667_vm8 = vcmp.ge.f32.partialorder %v639_v28, 0.0 }
 0x304   :  { %v699_v44 = vsel %vm667_vm8, %v639_v28, %v683_v35 }
 0x305   :  { %v715_v53 = vmul.f32 %v699_v44, %v10626_v46  ;;  %v615_v2 = vpop.xlane.xlu0 %614 }
 0x306   :  { %v675_v9 = vmul.f32 0.01, %v615_v2  ;;  %vm659_vm15 = vcmp.ge.f32.partialorder %v615_v2, 0.0 }
 0x310   :  { %v645_v16 = vpop.xlane.xlu1 %644 }
 0x311   :  { %v685_v24 = vmul.f32 0.01, %v645_v16  ;;  %vm669_vm6 = vcmp.ge.f32.partialorder %v645_v16, 0.0 }
 0x313   :  { %v701_v37 = vsel %vm669_vm6, %v645_v16, %v685_v24  ;;  %v10668_v16 = vld [vmem:[%s13264_s8 + $0x10] sm:$0xff] }
 0x314   :  { %v642_v17 = vpop.xlane.xlu1 %641  ;;  %v717_v43 = vmul.f32 %v701_v37, %v10614_v36 }
 0x315   :  { %v684_v31 = vmul.f32 0.01, %v642_v17  ;;  %vm668_vm7 = vcmp.ge.f32.partialorder %v642_v17, 0.0 }
 0x317   :  { %v700_v42 = vsel %vm668_vm7, %v642_v17, %v684_v31 }
 0x318   :  { %v636_v18 = vpop.xlane.xlu1 %635  ;;  %v716_v48 = vmul.f32 %v700_v42, %v10620_v41 }
 0x319   :  { %v682_v40 = vmul.f32 0.01, %v636_v18  ;;  %vm666_vm9 = vcmp.ge.f32.partialorder %v636_v18, 0.0 }
 0x31b   :  { %v698_v51 = vsel %vm666_vm9, %v636_v18, %v682_v40  ;;  %v691_v18 = vsel %vm659_vm15, %v615_v2, %v675_v9 }
 0x31c   :  { %v654_v20 = vpop.xlane.xlu1 %653  ;;  %v714_v59 = vmul.f32 %v698_v51, %v10632_v50  ;;  %v707_v28 = vmul.f32 %v691_v18, %v10674_v21 }
 0x31d   :  { %vm672_vm4 = vcmp.ge.f32.partialorder %v654_v20, 0.0  ;;  %v688_v22 = vmul.f32 0.01, %v654_v20 }
 0x31f   :  { %v704_v25 = vsel %vm672_vm4, %v654_v20, %v688_v22 }
 0x320   :  { %v633_v29 = vpop.xlane.xlu1 %632  ;;  %v720_v30 = vmul.f32 %v704_v25, %v10597_v23 }
 0x321   :  { %v681_v45 = vmul.f32 0.01, %v633_v29  ;;  %vm665_vm10 = vcmp.ge.f32.partialorder %v633_v29, 0.0 }
 0x322   :  { %8854 = vmatprep.subr.mxu1 %v720_v30 }
 0x323   :  { %8855 = vmatpush3.msra.mxu1 %v720_v30  ;;  %v697_v54 = vsel %vm665_vm10, %v633_v29, %v681_v45 }
 0x324   :  { %8856 = vmatprep.subr.mxu1 %v719_v34  ;;  %v630_v38 = vpop.xlane.xlu1 %629  ;;  %v713_v52 = vmul.f32 %v697_v54, %v10638_v58 }
 0x325   :  { %8857 = vmatpush3.msra.mxu1 %v719_v34  ;;  %v680_v49 = vmul.f32 0.01, %v630_v38  ;;  %vm664_vm11 = vcmp.ge.f32.partialorder %v630_v38, 0.0 }
 0x326   :  { %8858 = vmatprep.subr.mxu1 %v718_v39 }
 0x327   :  { %8859 = vmatpush3.msra.mxu1 %v718_v39  ;;  %v696_v60 = vsel %vm664_vm11, %v630_v38, %v680_v49  ;;  %v1162_v12 = vpop.xlane.xlu0 %1161 }
 0x328   :  { %8860 = vmatprep.subr.mxu1 %v717_v43  ;;  %v627_v47 = vpop.xlane.xlu1 %626  ;;  %v712_v4 = vmul.f32 %v696_v60, %v10644_v62  ;;  %v1194_v19 = vmul.f32 0.01, %v1162_v12  ;;  %vm1178_vm3 = vcmp.ge.f32.partialorder %v1162_v12, 0.0 }
 0x329   :  { %8861 = vmatpush3.msra.mxu1 %v717_v43  ;;  %v679_v56 = vmul.f32 0.01, %v627_v47  ;;  %vm663_vm12 = vcmp.ge.f32.partialorder %v627_v47, 0.0 }
 0x32a   :  { %8862 = vmatprep.subr.mxu1 %v716_v48  ;;  %v1210_v29 = vsel %vm1178_vm3, %v1162_v12, %v1194_v19 }
 0x32b   :  { %8863 = vmatpush3.msra.mxu1 %v716_v48  ;;  %v695_v63 = vsel %vm663_vm12, %v627_v47, %v679_v56  ;;  %v1226_v34 = vmul.f32 %v1210_v29, %v10580_v1  ;;  %v1156_v35 = vpop.xlane.xlu0 %1155 }
 0x32c   :  { %8864 = vmatprep.subr.mxu1 %v715_v53  ;;  %v624_v57 = vpop.xlane.xlu1 %623  ;;  %v711_v8 = vmul.f32 %v695_v63, %v10650_v0  ;;  %v1192_v39 = vmul.f32 0.01, %v1156_v35  ;;  %vm1176_vm5 = vcmp.ge.f32.partialorder %v1156_v35, 0.0 }
 0x32d   :  { %v678_v61 = vmul.f32 0.01, %v624_v57  ;;  %8865 = vmatpush3.msra.mxu1 %v715_v53  ;;  %vm662_vm13 = vcmp.ge.f32.partialorder %v624_v57, 0.0 }
 0x32e   :  { %8866 = vmatprep.subr.mxu1 %v714_v59  ;;  %v1208_v44 = vsel %vm1176_vm5, %v1156_v35, %v1192_v39 }
 0x32f   :  { %8867 = vmatpush3.msra.mxu1 %v714_v59  ;;  %v694_v5 = vsel %vm662_vm13, %v624_v57, %v678_v61  ;;  %v1150_v37 = vpop.xlane.xlu0 %1149  ;;  %v1224_v53 = vmul.f32 %v1208_v44, %v10602_v26 }
 0x330   :  { %8868 = vmatprep.subr.mxu1 %v713_v52  ;;  %v621_v3 = vpop.xlane.xlu1 %620  ;;  %v710_v14 = vmul.f32 %v694_v5, %v10656_v7  ;;  %v1190_v45 = vmul.f32 0.01, %v1150_v37  ;;  %vm1174_vm7 = vcmp.ge.f32.partialorder %v1150_v37, 0.0 }
 0x331   :  { %vm661_vm14 = vcmp.ge.f32.partialorder %v621_v3, 0.0  ;;  %v677_v6 = vmul.f32 0.01, %v621_v3  ;;  %8869 = vmatpush3.msra.mxu1 %v713_v52 }
 0x332   :  { %8870 = vmatprep.subr.mxu1 %v712_v4  ;;  %v1206_v54 = vsel %vm1174_vm7, %v1150_v37, %v1190_v45  ;;  %vm801_vm7 = vcmask 64512  }
 0x333   :  { %v693_v10 = vsel %vm661_vm14, %v621_v3, %v677_v6  ;;  %8871 = vmatpush3.msra.mxu1 %v712_v4  ;;  %v1144_v38 = vpop.xlane.xlu0 %1143  ;;  %v1222_v63 = vmul.f32 %v1206_v54, %v10614_v36  ;;  %v10711_v54 = vld [vmem:[%s13265_s3 + $0x8] sm:$0xff] }
 0x334   :  { %8872 = vmatprep.subr.mxu1 %v711_v8  ;;  %v618_v13 = vpop.xlane.xlu1 %617  ;;  %v709_v17 = vmul.f32 %v693_v10, %v10662_v11  ;;  %v1188_v56 = vmul.f32 0.01, %v1144_v38  ;;  %vm1172_vm9 = vcmp.ge.f32.partialorder %v1144_v38, 0.0 }
 0x335   :  { %vm660_vm2 = vcmp.ge.f32.partialorder %v618_v13, 0.0  ;;  %v676_v15 = vmul.f32 0.01, %v618_v13  ;;  %8873 = vmatpush3.msra.mxu1 %v711_v8 }
 0x336   :  { %8874 = vmatprep.subr.mxu1 %v710_v14  ;;  %v1204_v2 = vsel %vm1172_vm9, %v1144_v38, %v1188_v56  ;;  %v10716_v56 = vld [vmem:[%s13265_s3] sm:$0xff]  ;;  %vm1704_vm9 = vcmask 1043456  }
 0x337   :  { %v692_v20 = vsel %vm660_vm2, %v618_v13, %v676_v15  ;;  %8875 = vmatpush3.msra.mxu1 %v710_v14  ;;  %v1138_v43 = vpop.xlane.xlu0 %1137  ;;  %v1220_v10 = vmul.f32 %v1204_v2, %v10626_v46 }
 0x338   :  { %8876 = vmatprep.subr.mxu1 %v709_v17  ;;  %v612_v22 = vpop.xlane.xlu1 %611  ;;  %v708_v24 = vmul.f32 %v692_v20, %v10668_v16  ;;  %v1186_v3 = vmul.f32 0.01, %v1138_v43  ;;  %vm1170_vm11 = vcmp.ge.f32.partialorder %v1138_v43, 0.0 }
 0x339   :  { %vm658_vm4 = vcmp.ge.f32.partialorder %v612_v22, 0.0  ;;  %v674_v25 = vmul.f32 0.01, %v612_v22  ;;  %8877 = vmatpush3.msra.mxu1 %v709_v17 }
 0x33a   :  { %8878 = vmatprep.subr.mxu1 %v708_v24  ;;  %v1202_v12 = vsel %vm1170_vm11, %v1138_v43, %v1186_v3 }
 0x33b   :  { %v690_v30 = vsel %vm658_vm4, %v612_v22, %v674_v25  ;;  %8879 = vmatpush3.msra.mxu1 %v708_v24  ;;  %v1132_v59 = vpop.xlane.xlu0 %1131  ;;  %v1218_v19 = vmul.f32 %v1202_v12, %v10638_v58 }
 0x33c   :  { %8880 = vmatprep.subr.mxu1 %v707_v28  ;;  %v706_v31 = vmul.f32 %v690_v30, %v10680_v27  ;;  %v1184_v13 = vmul.f32 0.01, %v1132_v59  ;;  %vm1168_vm13 = vcmp.ge.f32.partialorder %v1132_v59, 0.0 }
 0x33d   :  { %8881 = vmatpush3.msra.mxu1 %v707_v28 }
 0x33e   :  { %8882 = vmatprep.subr.mxu1 %v706_v31  ;;  %v1200_v20 = vsel %vm1168_vm13, %v1132_v59, %v1184_v13 }
 0x33f   :  { %8883 = vmatpush3.msra.mxu1 %v706_v31  ;;  %v1126_v9 = vpop.xlane.xlu0 %1125  ;;  %v1216_v31 = vmul.f32 %v1200_v20, %v10650_v0 }
 0x340   :  { %8885 = vmatmul.mubr.f32.vlgmr.msra.gmra.mxu1 %v10687_v33  ;;  %8915 = vmatprep.subr.mxu1 %v1226_v34  ;;  %v1182_v22 = vmul.f32 0.01, %v1126_v9  ;;  %vm1166_vm15 = vcmp.ge.f32.partialorder %v1126_v9, 0.0 }
 0x341   :  { %8916 = vmatpush3.msra.mxu1 %v1226_v34  ;;  %8947 = vmatprep.mubr.f32.mxu1 %v10574_v55 }
 0x342   :  { %v1198_v34 = vsel %vm1166_vm15, %v1126_v9, %v1182_v22  ;;  %vm2188_vm15 = vcmask 523264  }
 0x343   :  { %v1120_v25 = vpop.xlane.xlu0 %1119 }
 0x344   :  { %v1180_v35 = vmul.f32 0.01, %v1120_v25  ;;  %vm1164_vm3 = vcmp.ge.f32.partialorder %v1120_v25, 0.0 }
 0x346   :  { %v1196_v43 = vsel %vm1164_vm3, %v1120_v25, %v1180_v35  ;;  %v1603_v25 = vld [vmem:[%s13266_s14 + $0x8] sm:$0xff] }
 0x347   :  { %v1693_v35 = vld [vmem:[%s13269_s0 + $0x8] sm:$0xff] }
 0x36a   :  { %v1159_v40 = vpop.xlane.xlu1 %1158 }
 0x36b   :  { %vm1177_vm6 = vcmp.ge.f32.partialorder %v1159_v40, 0.0  ;;  %v1193_v42 = vmul.f32 0.01, %v1159_v40 }
 0x36d   :  { %v1209_v47 = vsel %vm1177_vm6, %v1159_v40, %v1193_v42  ;;  %v1214_v42 = vmul.f32 %v1198_v34, %v10662_v11  ;;  %vm798_vm6 = vcmp.gt.f32.partialorder %v10711_v54, 0.0  ;;  %v1692_v34 = vld [vmem:[%s13269_s0] sm:$0xff] }
 0x36e   :  { %v1153_v48 = vpop.xlane.xlu1 %1152  ;;  %v1225_v49 = vmul.f32 %v1209_v47, %v10597_v23 }
 0x36f   :  { %vm1175_vm8 = vcmp.ge.f32.partialorder %v1153_v48, 0.0  ;;  %v1191_v51 = vmul.f32 0.01, %v1153_v48 }
 0x370   :  { %8917 = vmatprep.subr.mxu1 %v1225_v49 }
 0x371   :  { %v1207_v57 = vsel %vm1175_vm8, %v1153_v48, %v1191_v51  ;;  %8918 = vmatpush3.msra.mxu1 %v1225_v49  ;;  %v1212_v49 = vmul.f32 %v1196_v43, %v10674_v21  ;;  %vm797_vm8 = vcmp.gt.f32.partialorder %v10716_v56, 0.0 }
 0x372   :  { %8919 = vmatprep.subr.mxu1 %v1224_v53  ;;  %v1147_v60 = vpop.xlane.xlu1 %1146  ;;  %v1223_v61 = vmul.f32 %v1207_v57, %v10608_v32 }
 0x373   :  { %vm1173_vm10 = vcmp.ge.f32.partialorder %v1147_v60, 0.0  ;;  %v1189_v52 = vmul.f32 0.01, %v1147_v60  ;;  %8920 = vmatpush3.msra.mxu1 %v1224_v53 }
 0x374   :  { %8921 = vmatprep.subr.mxu1 %v1223_v61 }
 0x375   :  { %v1205_v4 = vsel %vm1173_vm10, %v1147_v60, %v1189_v52  ;;  %8922 = vmatpush3.msra.mxu1 %v1223_v61  ;;  %vm1697_vm10 = vcmask 31744  }
 0x376   :  { %8923 = vmatprep.subr.mxu1 %v1222_v63  ;;  %v1141_v5 = vpop.xlane.xlu1 %1140  ;;  %v1221_v6 = vmul.f32 %v1205_v4, %v10620_v41 }
 0x377   :  { %vm1171_vm12 = vcmp.ge.f32.partialorder %v1141_v5, 0.0  ;;  %v1187_v8 = vmul.f32 0.01, %v1141_v5  ;;  %8924 = vmatpush3.msra.mxu1 %v1222_v63 }
 0x378   :  { %8925 = vmatprep.subr.mxu1 %v1221_v6 }
 0x379   :  { %v1203_v14 = vsel %vm1171_vm12, %v1141_v5, %v1187_v8  ;;  %8926 = vmatpush3.msra.mxu1 %v1221_v6 }
 0x37a   :  { %8927 = vmatprep.subr.mxu1 %v1220_v10  ;;  %v1135_v15 = vpop.xlane.xlu1 %1134  ;;  %v1219_v17 = vmul.f32 %v1203_v14, %v10632_v50 }
 0x37b   :  { %vm1169_vm14 = vcmp.ge.f32.partialorder %v1135_v15, 0.0  ;;  %v1185_v18 = vmul.f32 0.01, %v1135_v15  ;;  %8928 = vmatpush3.msra.mxu1 %v1220_v10 }
 0x37c   :  { %8929 = vmatprep.subr.mxu1 %v1219_v17 }
 0x37d   :  { %v1201_v24 = vsel %vm1169_vm14, %v1135_v15, %v1185_v18  ;;  %8930 = vmatpush3.msra.mxu1 %v1219_v17 }
 0x37e   :  { %8931 = vmatprep.subr.mxu1 %v1218_v19  ;;  %v1129_v28 = vpop.xlane.xlu1 %1128  ;;  %v1217_v29 = vmul.f32 %v1201_v24, %v10644_v62  ;;  %v10249_v24 = vmov 0  }
 0x37f   :  { %vm1167_vm2 = vcmp.ge.f32.partialorder %v1129_v28, 0.0  ;;  %v1183_v30 = vmul.f32 0.01, %v1129_v28  ;;  %8932 = vmatpush3.msra.mxu1 %v1218_v19  ;;  %10084 = vset.pattern.permute.xlu0 %v10249_v24 }
 0x380   :  { %8933 = vmatprep.subr.mxu1 %v1217_v29  ;;  %10085 = vset.pattern.permute.xlu1 %v10249_v24 }
 0x381   :  { %v1199_v37 = vsel %vm1167_vm2, %v1129_v28, %v1183_v30  ;;  %8934 = vmatpush3.msra.mxu1 %v1217_v29  ;;  %v1602_v28 = vld [vmem:[%s13266_s14] sm:$0xff]  ;;  %v1601_v30 = vld [vmem:[%s13267_s2 + $0x8] sm:$0xff] }
 0x382   :  { %8935 = vmatprep.subr.mxu1 %v1216_v31  ;;  %v1123_v38 = vpop.xlane.xlu1 %1122  ;;  %v1215_v39 = vmul.f32 %v1199_v37, %v10656_v7  ;;  %v1600_v29 = vld [vmem:[%s13267_s2] sm:$0xff] }
 0x383   :  { %vm1165_vm4 = vcmp.ge.f32.partialorder %v1123_v38, 0.0  ;;  %v1181_v40 = vmul.f32 0.01, %v1123_v38  ;;  %8936 = vmatpush3.msra.mxu1 %v1216_v31  ;;  %v10750_v31 = vld [vmem:[%s13268_s10] sm:$0xf] }
 0x384   :  { %8937 = vmatprep.subr.mxu1 %v1215_v39  ;;  %v10768_v37 = vld [vmem:[%s13262_s5] sm:$0xff] }
 0x385   :  { %v1197_v44 = vsel %vm1165_vm4, %v1123_v38, %v1181_v40  ;;  %8938 = vmatpush3.msra.mxu1 %v1215_v39 }
 0x386   :  { %8939 = vmatprep.subr.mxu1 %v1214_v42  ;;  %v1117_v45 = vpop.xlane.xlu1 %1116  ;;  %v1213_v47 = vmul.f32 %v1197_v44, %v10668_v16 }
 0x387   :  { %vm1163_vm5 = vcmp.ge.f32.partialorder %v1117_v45, 0.0  ;;  %v1179_v48 = vmul.f32 0.01, %v1117_v45  ;;  %8940 = vmatpush3.msra.mxu1 %v1214_v42 }
 0x388   :  { %8941 = vmatprep.subr.mxu1 %v1213_v47 }
 0x389   :  { %v1195_v51 = vsel %vm1163_vm5, %v1117_v45, %v1179_v48  ;;  %8942 = vmatpush3.msra.mxu1 %v1213_v47 }
 0x38a   :  { %8943 = vmatprep.subr.mxu1 %v1212_v49  ;;  %v1211_v53 = vmul.f32 %v1195_v51, %v10680_v27 }
 0x38b   :  { %8944 = vmatpush3.msra.mxu1 %v1212_v49 }
 0x38c   :  { %8945 = vmatprep.subr.mxu1 %v1211_v53 }
 0x38d   :  { %8946 = vmatpush3.msra.mxu1 %v1211_v53 }
 0x38e   :  { %8948 = vmatmul.mubr.f32.vlgmr.msra.gmra.mxu1 %v10687_v33  ;;  %8978 = vmatprep.subr.mxu1 %v1603_v25 }
 0x38f   :  { %8982 = vmatprep.mubr.msk.f32.mxu1 %vm117_vm0, %v1600_v29  ;;  %8979 = vmatpush3.msra.mxu1 %v1603_v25  ;;  %v10809_v29 = vld [vmem:[%s13262_s5 + $0x8] sm:$0xff] }
 0x390   :  { %8980 = vmatprep.subr.mxu1 %v1602_v28  ;;  %13607 = vst [vmem:[#allocation2_spill] sm:$0xff] %v10809_v29 }
 0x391   :  { %8981 = vmatpush3.msra.mxu1 %v1602_v28 }
 0x392   :  { %8983 = vmatmul.mubr.msk.f32.vlgmr.msra.gmra.mxu1 %vm117_vm0, %v1601_v30  ;;  %8985 = vmatprep.subr.msk.mxu1 %vm1704_vm9, %v10750_v31  ;;  %v10816_v30 = vld [vmem:[%s13262_s5 + $0x10] sm:$0xff] }
 0x393   :  { %8986 = vmatpush3.msk.msra.mxu1 %vm1704_vm9, %v10750_v31  ;;  %8987 = vmatprep.mubr.msk.f32.mxu1 %vm1697_vm10, %v1692_v34  ;;  %13608 = vst [vmem:[#allocation3_spill] sm:$0xff] %v10816_v30  ;;  %v10837_v34 = vld [vmem:[%s13262_s5 + $0x28] sm:$0xff] }
 0x394   :  { %13611 = vst [vmem:[#allocation6_spill] sm:$0xff] %v10837_v34 }
 0x396   :  { %8988 = vmatmul.mubr.msk.f32.vlgmr.msra.gmra.mxu1 %vm1697_vm10, %v1693_v35  ;;  %v10844_v35 = vld [vmem:[%s13262_s5 + $0x30] sm:$0xff] }
 0x397   :  { %8994 = vmatprep.mubr.msk.f32.mxu1 %vm117_vm0, %v10768_v37  ;;  %13612 = vst [vmem:[#allocation7_spill] sm:$0xff] %v10844_v35 }
 0x400   :  { %v8886_v57 = vpop.f32.mrf.mxu1 }
 0x401   :  { %v800_v59 = vsel %vm798_vm6, %v8886_v57, -1e+30  ;;  %v112_v57 = vld [vmem:[%s13270_s4 + $0x8] sm:$0xff] }
 0x402   :  { %v788_v60 = vpop.f32.mrf.mxu1  ;;  %v805_v33 = vsel %vm801_vm7, %v800_v59, -inf }
 0x403   :  { %806 = vmax.xlane.f32.xlu0 %v805_v33  ;;  %v799_v61 = vsel %vm797_vm8, %v788_v60, -1e+30 }
 0x404   :  { %v802_v52 = vsel %vm801_vm7, %v799_v61, -inf }
 0x405   :  { %803 = vmax.xlane.f32.xlu1 %v802_v52 }
 0x44e   :  { %v8949_v63 = vpop.f32.mrf.mxu1 }
 0x44f   :  { %v1303_v2 = vsel %vm798_vm6, %v8949_v63, -1e+30 }
 0x450   :  { %v1293_v3 = vpop.f32.mrf.mxu1  ;;  %v1307_v4 = vsel %vm801_vm7, %v1303_v2, -inf }
 0x451   :  { %1308 = vmax.xlane.f32.xlu0 %v1307_v4  ;;  %v1302_v5 = vsel %vm797_vm8, %v1293_v3, -1e+30 }
 0x452   :  { %v1304_v6 = vsel %vm801_vm7, %v1302_v5, -inf }
 0x453   :  { %1305 = vmax.xlane.f32.xlu1 %v1304_v6 }
 0x48c   :  { %v807_v8 = vpop.xlane.xlu0 %806 }
 0x48d   :  { %v809_v9 = vsub.f32 %v800_v59, %v807_v8  ;;  %v10788_v8 = vpop.f32.mrf.mxu1 }
 0x48e   :  { %v804_v10 = vpop.xlane.xlu1 %803 }
 0x48f   :  { %v812_v12 = vmul.f32 1.442695, %v809_v9  ;;  %v808_v13 = vsub.f32 %v799_v61, %v804_v10  ;;  %v10790_v9 = vpop.f32.mrf.mxu1  ;;  %v10795_v10 = vld [vmem:[%s13271_s11] ss:$0 sm:$0xff] }
 0x491   :  { %10086 = vpow2.f32 %v812_v12  ;;  %v810_v14 = vmul.f32 1.442695, %v808_v13  ;;  %v8989_v12 = vpop.f32.mrf.mxu1 }
 0x492   :  { %v10798_v13 = vadd.f32 %v8989_v12, %v10795_v10  ;;  %v11058_v12 = vld [vmem:[%s13606_s24 + $0x58] sm:$0xff] }
 0x493   :  { %10088 = vpow2.f32 %v810_v14  ;;  %v1774_v14 = vpop.f32.mrf.mxu1  ;;  %13631 = vst [vmem:[#allocation26_spill] sm:$0xff] %v11058_v12 }
 0x49e   :  { %v10087_v15 = vpop.eup %10086 }
 0x49f   :  { %v10725_v17 = vmul.f32 %v10087_v15, %v10711_v54  ;;  %v1775_v15 = vadd.f32 %v10795_v10, %v1774_v14  ;;  %v11072_v14 = vld [vmem:[%s13606_s24 + $0x68] sm:$0xff] }
 0x4a0   :  { %v10089_v18 = vpop.eup %10088  ;;  %13633 = vst [vmem:[#allocation28_spill] sm:$0xff] %v11072_v14 }
 0x4a1   :  { %v819_v19 = vsel %vm801_vm7, %v10725_v17, 0.0  ;;  %v10730_v20 = vmul.f32 %v10089_v18, %v10716_v56 }
 0x4a2   :  { %820 = vadd.xlane.f32.xlu0 %v819_v19 }
 0x4a3   :  { %v816_v22 = vsel %vm801_vm7, %v10730_v20, 0.0 }
 0x4a4   :  { %817 = vadd.xlane.f32.xlu1 %v816_v22 }
 0x4da   :  { %v1309_v38 = vpop.xlane.xlu0 %1308 }
 0x4db   :  { %v1311_v39 = vsub.f32 %v1303_v2, %v1309_v38  ;;  %v10851_v38 = vld [vmem:[%s13262_s5 + $0x38] sm:$0xff] }
 0x4dc   :  { %v1306_v40 = vpop.xlane.xlu1 %1305  ;;  %13613 = vst [vmem:[#allocation8_spill] sm:$0xff] %v10851_v38 }
 0x4dd   :  { %v1314_v42 = vmul.f32 1.442695, %v1311_v39  ;;  %v1310_v43 = vsub.f32 %v1302_v5, %v1306_v40  ;;  %v10858_v39 = vld [vmem:[%s13262_s5 + $0x40] sm:$0xff]  ;;  %v10865_v40 = vld [vmem:[%s13262_s5 + $0x48] sm:$0xff] }
 0x4de   :  { %13614 = vst [vmem:[#allocation9_spill] sm:$0xff] %v10858_v39  ;;  %13615 = vst [vmem:[#allocation10_spill] sm:$0xff] %v10865_v40 }
 0x4df   :  { %10090 = vpow2.f32 %v1314_v42  ;;  %v1312_v44 = vmul.f32 1.442695, %v1310_v43  ;;  %v10872_v42 = vld [vmem:[%s13262_s5 + $0x50] sm:$0xff]  ;;  %v10879_v43 = vld [vmem:[%s13262_s5 + $0x58] sm:$0xff] }
 0x4e0   :  { %13616 = vst [vmem:[#allocation11_spill] sm:$0xff] %v10872_v42  ;;  %13617 = vst [vmem:[#allocation12_spill] sm:$0xff] %v10879_v43 }
 0x4e1   :  { %10092 = vpow2.f32 %v1312_v44  ;;  %v10886_v44 = vld [vmem:[%s13262_s5 + $0x60] sm:$0xff] }
 0x4e2   :  { %13618 = vst [vmem:[#allocation13_spill] sm:$0xff] %v10886_v44 }
 0x4ec   :  { %v10091_v45 = vpop.eup %10090 }
 0x4ed   :  { %v10773_v47 = vmul.f32 %v10091_v45, %v10711_v54  ;;  %v111_v54 = vld [vmem:[%s13270_s4] sm:$0xff]  ;;  %v10893_v45 = vld [vmem:[%s13262_s5 + $0x68] sm:$0xff] }
 0x4ee   :  { %v10093_v48 = vpop.eup %10092  ;;  %13619 = vst [vmem:[#allocation14_spill] sm:$0xff] %v10893_v45 }
 0x4ef   :  { %v1321_v49 = vsel %vm801_vm7, %v10773_v47, 0.0  ;;  %v10778_v51 = vmul.f32 %v10093_v48, %v10716_v56  ;;  %v10900_v48 = vld [vmem:[%s13262_s5 + $0x70] sm:$0xff] }
 0x4f0   :  { %1322 = vadd.xlane.f32.xlu0 %v1321_v49  ;;  %13620 = vst [vmem:[#allocation15_spill] sm:$0xff] %v10900_v48  ;;  %v10907_v49 = vld [vmem:[%s13262_s5 + $0x78] sm:$0xff] }
 0x4f1   :  { %v1318_v53 = vsel %vm801_vm7, %v10778_v51, 0.0  ;;  %13621 = vst [vmem:[#allocation16_spill] sm:$0xff] %v10907_v49 }
 0x4f2   :  { %1319 = vadd.xlane.f32.xlu1 %v1318_v53 }
 0x52b   :  { %v821_v59 = vpop.xlane.xlu0 %820 }
 0x52c   :  { %v823_v60 = vmul.f32 %v821_v59, %v112_v57 }
 0x52d   :  { %v818_v33 = vpop.xlane.xlu1 %817 }
 0x52e   :  { %vm825_vm11 = vcmp.gt.f32.partialorder %v823_v60, 0.0  ;;  %v822_v61 = vmul.f32 %v818_v33, %v111_v54 }
 0x52f   :  { %v827_v56 = vsel %vm825_vm11, %v823_v60, 1.0 }
 0x530   :  { %vm824_vm12 = vcmp.gt.f32.partialorder %v822_v61, 0.0  ;;  %835 = vperm.xlu0 %10084, %v827_v56   ;;  %v10988_v56 = vld [vmem:[%s13606_s24 + $0x10] sm:$0xff] }
 0x531   :  { %v826_v52 = vsel %vm824_vm12, %v822_v61, 1.0  ;;  %v10981_v61 = vld [vmem:[%s13606_s24 + $0x8] sm:$0xff]  ;;  %13622 = vst [vmem:[#allocation17_spill] sm:$0xff] %v10988_v56 }
 0x532   :  { %830 = vperm.xlu1 %10085, %v826_v52   ;;  %v10999_v52 = vld [vmem:[%s13606_s24 + $0x18] sm:$0xff] }
 0x533   :  { %13623 = vst [vmem:[#allocation18_spill] sm:$0xff] %v10999_v52 }
 0x579   :  { %v1323_v63 = vpop.xlane.xlu0 %1322 }
 0x57a   :  { %v1325_v2 = vmul.f32 %v1323_v63, %v112_v57  ;;  %v11006_v63 = vld [vmem:[%s13606_s24 + $0x20] sm:$0xff] }
 0x57b   :  { %v1320_v3 = vpop.xlane.xlu1 %1319  ;;  %13624 = vst [vmem:[#allocation19_spill] sm:$0xff] %v11006_v63 }
 0x57c   :  { %vm1327_vm13 = vcmp.gt.f32.partialorder %v1325_v2, 0.0  ;;  %v1324_v4 = vmul.f32 %v1320_v3, %v111_v54  ;;  %v11023_v3 = vld [vmem:[%s13606_s24 + $0x30] sm:$0xff] }
 0x57d   :  { %v1329_v5 = vsel %vm1327_vm13, %v1325_v2, 1.0  ;;  %v11016_v2 = vld [vmem:[%s13606_s24 + $0x28] sm:$0xff]  ;;  %13626 = vst [vmem:[#allocation21_spill] sm:$0xff] %v11023_v3 }
 0x57e   :  { %vm1326_vm14 = vcmp.gt.f32.partialorder %v1324_v4, 0.0  ;;  %1337 = vperm.xlu1 %10085, %v1329_v5   ;;  %13625 = vst [vmem:[#allocation20_spill] sm:$0xff] %v11016_v2  ;;  %v11044_v5 = vld [vmem:[%s13606_s24 + $0x48] sm:$0xff] }
 0x57f   :  { %v1328_v6 = vsel %vm1326_vm14, %v1324_v4, 1.0  ;;  %v11037_v4 = vld [vmem:[%s13606_s24 + $0x40] sm:$0xff]  ;;  %13629 = vst [vmem:[#allocation24_spill] sm:$0xff] %v11044_v5 }
 0x580   :  { %13628 = vst [vmem:[#allocation23_spill] sm:$0xff] %v11037_v4 }
 0x582   :  { %1332 = vperm.xlu1 %10085, %v1328_v6   ;;  %v11051_v6 = vld [vmem:[%s13606_s24 + $0x50] sm:$0xff] }
 0x583   :  { %13630 = vst [vmem:[#allocation25_spill] sm:$0xff] %v11051_v6 }
 0x586   :  { %1787 = vrot.lane.b32.xlu1 %v10798_v13, %s10247_s27 }
 0x58a   :  { %1785 = vrot.lane.b32.xlu1 %v1775_v15, %s10247_s27 }
 0x5ab   :  { %v836_v18 = vpop.permute.xlu0 %835 }
 0x5ac   :  { %10094 = vrcp.f32 %v836_v18  ;;  %v11086_v18 = vld [vmem:[%s13606_s24 + $0x78] sm:$0xff] }
 0x5ad   :  { %v831_v19 = vpop.permute.xlu1 %830  ;;  %13635 = vst [vmem:[#allocation30_spill] sm:$0xff] %v11086_v18 }
 0x5ae   :  { %10096 = vrcp.f32 %v831_v19 }
 0x5b9   :  { %v10095_v22 = vpop.eup %10094 }
 0x5ba   :  { %v841_v24 = vmul.f32 %v10095_v22, %v10725_v17  ;;  %v10823_v17 = vld [vmem:[%s13262_s5 + $0x18] sm:$0xff] }
 0x5bb   :  { %v10097_v25 = vpop.eup %10096  ;;  %13609 = vst [vmem:[#allocation4_spill] sm:$0xff] %v10823_v17 }
 0x5bc   :  { %8887 = vmatprep.subr.mxu0 %v841_v24  ;;  %v839_v28 = vmul.f32 %v10097_v25, %v10730_v20  ;;  %v10830_v20 = vld [vmem:[%s13262_s5 + $0x20] sm:$0xff] }
 0x5bd   :  { %8888 = vmatpush3.msra.mxu0 %v841_v24  ;;  %13610 = vst [vmem:[#allocation5_spill] sm:$0xff] %v10830_v20 }
 0x5be   :  { %8889 = vmatprep.subr.mxu0 %v839_v28 }
 0x5bf   :  { %8890 = vmatpush3.msra.mxu0 %v839_v28 }
 0x5c0   :  { %8892 = vmatmul.mubr.msk.f32.vlgmr.msra.gmra.mxu0 %vm117_vm0, %v10809_v29 }
 0x5c1   :  { %8894 = vmatprep.mubr.msk.f32.mxu0 %vm117_vm0, %v10816_v30 }
 0x5c4   :  { %8895 = vmatmul.mubr.msk.f32.gmra.mxu0 %vm117_vm0, %v10823_v17 }
 0x5c5   :  { %8897 = vmatprep.mubr.msk.f32.mxu0 %vm117_vm0, %v10830_v20 }
 0x5c8   :  { %8898 = vmatmul.mubr.msk.f32.gmra.mxu0 %vm117_vm0, %v10837_v34 }
 0x5c9   :  { %8900 = vmatprep.mubr.msk.f32.mxu0 %vm117_vm0, %v10844_v35 }
 0x5cc   :  { %8901 = vmatmul.mubr.msk.f32.gmra.mxu0 %vm117_vm0, %v10851_v38 }
 0x5cd   :  { %8903 = vmatprep.mubr.msk.f32.mxu0 %vm117_vm0, %v10858_v39 }
 0x5d0   :  { %8904 = vmatmul.mubr.msk.f32.gmra.mxu0 %vm117_vm0, %v10865_v40 }
 0x5d1   :  { %8906 = vmatprep.mubr.msk.f32.mxu0 %vm117_vm0, %v10872_v42 }
 0x5d4   :  { %8907 = vmatmul.mubr.msk.f32.gmra.mxu0 %vm117_vm0, %v10879_v43 }
 0x5d5   :  { %8909 = vmatprep.mubr.msk.f32.mxu0 %vm117_vm0, %v10886_v44 }
 0x5d8   :  { %8910 = vmatmul.mubr.msk.f32.gmra.mxu0 %vm117_vm0, %v10893_v45 }
 0x5d9   :  { %8912 = vmatprep.mubr.msk.f32.mxu0 %vm117_vm0, %v10900_v48 }
 0x5dc   :  { %8913 = vmatmul.mubr.msk.f32.gmra.mxu0 %vm117_vm0, %v10907_v49 }
 0x5dd   :  { %8954 = vmatprep.mubr.msk.f32.mxu0 %vm117_vm0, %v10768_v37 }
 0x5f9   :  { %v1338_v53 = vpop.permute.xlu1 %1337 }
 0x5fa   :  { %10098 = vrcp.f32 %v1338_v53 }
 0x5fd   :  { %v1333_v57 = vpop.permute.xlu1 %1332 }
 0x5fe   :  { %10100 = vrcp.f32 %v1333_v57 }
 0x601   :  { %v1788_v37 = vpop.permute.xlu1 %1787 }
 0x602   :  { %8990 = vmatprep.subr.mxu1 %v1788_v37 }
 0x603   :  { %8991 = vmatpush3.msra.mxu1 %v1788_v37 }
 0x607   :  { %v10099_v59 = vpop.eup %10098 }
 0x608   :  { %v1343_v54 = vmul.f32 %v10099_v59, %v10773_v47  ;;  %v1786_v47 = vpop.permute.xlu1 %1785 }
 0x609   :  { %8992 = vmatprep.subr.mxu1 %v1786_v47 }
 0x60a   :  { %8950 = vmatprep.subr.mxu0 %v1343_v54  ;;  %8993 = vmatpush3.msra.mxu1 %v1786_v47 }
 0x60b   :  { %v10101_v60 = vpop.eup %10100  ;;  %8951 = vmatpush3.msra.mxu0 %v1343_v54  ;;  %8995 = vmatmul.mubr.msk.f32.vlgmr.msra.gmra.mxu1 %vm117_vm0, %v10809_v29 }
 0x60c   :  { %v1341_v33 = vmul.f32 %v10101_v60, %v10778_v51  ;;  %8997 = vmatprep.mubr.msk.f32.mxu1 %vm117_vm0, %v10816_v30  ;;  %v10970_v51 = vld [vmem:[%s13606_s24] sm:$0xff] }
 0x60e   :  { %8952 = vmatprep.subr.mxu0 %v1341_v33 }
 0x60f   :  { %8953 = vmatpush3.msra.mxu0 %v1341_v33  ;;  %8998 = vmatmul.mubr.msk.f32.gmra.mxu1 %vm117_vm0, %v10823_v17 }
 0x610   :  { %8955 = vmatmul.mubr.msk.f32.vlgmr.msra.gmra.mxu0 %vm117_vm0, %v10809_v29  ;;  %9018 = vmatprep.subr.mxu0 %v10798_v13 }
 0x611   :  { %8957 = vmatprep.mubr.msk.f32.mxu0 %vm117_vm0, %v10816_v30  ;;  %9019 = vmatpush3.msra.mxu0 %v10798_v13  ;;  %v11065_v13 = vld [vmem:[%s13606_s24 + $0x60] sm:$0xff] }
 0x612   :  { %9020 = vmatprep.subr.mxu0 %v1775_v15  ;;  %9000 = vmatprep.mubr.msk.f32.mxu1 %vm117_vm0, %v10830_v20  ;;  %13632 = vst [vmem:[#allocation27_spill] sm:$0xff] %v11065_v13 }
 0x613   :  { %9021 = vmatpush3.msra.mxu0 %v1775_v15  ;;  %9001 = vmatmul.mubr.msk.f32.gmra.mxu1 %vm117_vm0, %v10837_v34  ;;  %v11079_v15 = vld [vmem:[%s13606_s24 + $0x70] sm:$0xff] }
 0x614   :  { %8958 = vmatmul.mubr.msk.f32.gmra.mxu0 %vm117_vm0, %v10823_v17  ;;  %9003 = vmatprep.mubr.msk.f32.mxu1 %vm117_vm0, %v10844_v35  ;;  %13634 = vst [vmem:[#allocation29_spill] sm:$0xff] %v11079_v15 }
 0x615   :  { %8960 = vmatprep.mubr.msk.f32.mxu0 %vm117_vm0, %v10830_v20 }
 0x617   :  { %9004 = vmatmul.mubr.msk.f32.gmra.mxu1 %vm117_vm0, %v10851_v38 }
 0x618   :  { %8961 = vmatmul.mubr.msk.f32.gmra.mxu0 %vm117_vm0, %v10837_v34  ;;  %9006 = vmatprep.mubr.msk.f32.mxu1 %vm117_vm0, %v10858_v39 }
 0x619   :  { %8963 = vmatprep.mubr.msk.f32.mxu0 %vm117_vm0, %v10844_v35 }
 0x61b   :  { %9007 = vmatmul.mubr.msk.f32.gmra.mxu1 %vm117_vm0, %v10865_v40 }
 0x61c   :  { %8964 = vmatmul.mubr.msk.f32.gmra.mxu0 %vm117_vm0, %v10851_v38  ;;  %9009 = vmatprep.mubr.msk.f32.mxu1 %vm117_vm0, %v10872_v42 }
 0x61d   :  { %8966 = vmatprep.mubr.msk.f32.mxu0 %vm117_vm0, %v10858_v39 }
 0x61f   :  { %9010 = vmatmul.mubr.msk.f32.gmra.mxu1 %vm117_vm0, %v10879_v43 }
 0x620   :  { %8967 = vmatmul.mubr.msk.f32.gmra.mxu0 %vm117_vm0, %v10865_v40  ;;  %9012 = vmatprep.mubr.msk.f32.mxu1 %vm117_vm0, %v10886_v44 }
 0x621   :  { %8969 = vmatprep.mubr.msk.f32.mxu0 %vm117_vm0, %v10872_v42 }
 0x623   :  { %9013 = vmatmul.mubr.msk.f32.gmra.mxu1 %vm117_vm0, %v10893_v45 }
 0x624   :  { %8970 = vmatmul.mubr.msk.f32.gmra.mxu0 %vm117_vm0, %v10879_v43  ;;  %9015 = vmatprep.mubr.msk.f32.mxu1 %vm117_vm0, %v10900_v48 }
 0x625   :  { %8972 = vmatprep.mubr.msk.f32.mxu0 %vm117_vm0, %v10886_v44 }
 0x627   :  { %9016 = vmatmul.mubr.msk.f32.gmra.mxu1 %vm117_vm0, %v10907_v49 }
 0x628   :  { %8973 = vmatmul.mubr.msk.f32.gmra.mxu0 %vm117_vm0, %v10893_v45  ;;  %9078 = vmatprep.mubr.f32.mxu1 %v10574_v55  ;;  %v11030_v55 = vld [vmem:[%s13606_s24 + $0x38] sm:$0xff] }
 0x629   :  { %8975 = vmatprep.mubr.msk.f32.mxu0 %vm117_vm0, %v10900_v48  ;;  %13627 = vst [vmem:[#allocation22_spill] sm:$0xff] %v11030_v55 }
 0x62c   :  { %8976 = vmatmul.mubr.msk.f32.gmra.mxu0 %vm117_vm0, %v10907_v49 }
 0x62d   :  { %9022 = vmatprep.mubr.msk.f32.mxu0 %vm117_vm0, %v10970_v51 }
 0x630   :  { %9023 = vmatmul.mubr.msk.f32.vlgmr.msra.gmra.mxu0 %vm117_vm0, %v10981_v61 }
 0x631   :  { %9025 = vmatprep.mubr.msk.f32.mxu0 %vm117_vm0, %v10988_v56 }
 0x634   :  { %9026 = vmatmul.mubr.msk.f32.gmra.mxu0 %vm117_vm0, %v10999_v52 }
 0x635   :  { %9028 = vmatprep.mubr.msk.f32.mxu0 %vm117_vm0, %v11006_v63 }
 0x638   :  { %9029 = vmatmul.mubr.msk.f32.gmra.mxu0 %vm117_vm0, %v11016_v2 }
 0x639   :  { %9031 = vmatprep.mubr.msk.f32.mxu0 %vm117_vm0, %v11023_v3 }
 0x63c   :  { %9032 = vmatmul.mubr.msk.f32.gmra.mxu0 %vm117_vm0, %v11030_v55 }
 0x63d   :  { %9034 = vmatprep.mubr.msk.f32.mxu0 %vm117_vm0, %v11037_v4 }
 0x640   :  { %9035 = vmatmul.mubr.msk.f32.gmra.mxu0 %vm117_vm0, %v11044_v5 }
 0x641   :  { %9037 = vmatprep.mubr.msk.f32.mxu0 %vm117_vm0, %v11051_v6 }
 0x644   :  { %9038 = vmatmul.mubr.msk.f32.gmra.mxu0 %vm117_vm0, %v11058_v12 }
 0x645   :  { %9040 = vmatprep.mubr.msk.f32.mxu0 %vm117_vm0, %v11065_v13 }
 0x648   :  { %9041 = vmatmul.mubr.msk.f32.gmra.mxu0 %vm117_vm0, %v11072_v14 }
 0x649   :  { %9043 = vmatprep.mubr.msk.f32.mxu0 %vm117_vm0, %v11079_v15 }
 0x64c   :  { %9044 = vmatmul.mubr.msk.f32.gmra.mxu0 %vm117_vm0, %v11086_v18 }
 0x680   :  { %v11090_v19 = vpop.f32.mrf.mxu0 }
 0x682   :  { %v11092_v22 = vpop.f32.mrf.mxu0 }
 0x684   :  { %v11094_v24 = vpop.f32.mrf.mxu0 }
 0x686   :  { %v11096_v25 = vpop.f32.mrf.mxu0 }
 0x688   :  { %v11098_v28 = vpop.f32.mrf.mxu0 }
 0x68a   :  { %v11100_v53 = vpop.f32.mrf.mxu0 }
 0x68c   :  { %v11102_v57 = vpop.f32.mrf.mxu0 }
 0x68e   :  { %v11104_v59 = vpop.f32.mrf.mxu0 }
 0x690   :  { %v8905_v54 = vpop.f32.mrf.mxu0 }
 0x691   :  { %v996_v60 = vmul.f32 %v8905_v54, %v10626_v46 }
 0x692   :  { %v948_v33 = vpop.f32.mrf.mxu0 }
 0x693   :  { %v995_v37 = vmul.f32 %v948_v33, %v10632_v50  ;;  %v1030_v47 = vsel %vm801_vm7, %v996_v60, 0.0 }
 0x694   :  { %v8908_v49 = vpop.f32.mrf.mxu0  ;;  %1031 = vadd.xlane.f32.xlu0 %v1030_v47 }
 0x695   :  { %v998_v48 = vmul.f32 %v8908_v49, %v10614_v36  ;;  %v1027_v45 = vsel %vm801_vm7, %v995_v37, 0.0 }
 0x696   :  { %v958_v44 = vpop.f32.mrf.mxu0 }
 0x697   :  { %v997_v42 = vmul.f32 %v958_v44, %v10620_v41  ;;  %v1036_v40 = vsel %vm801_vm7, %v998_v48, 0.0 }
 0x698   :  { %v8911_v43 = vpop.f32.mrf.mxu0  ;;  %1028 = vadd.xlane.f32.xlu0 %v1027_v45 }
 0x699   :  { %v1000_v33 = vmul.f32 %v8911_v43, %v10602_v26  ;;  %v1033_v47 = vsel %vm801_vm7, %v997_v42, 0.0 }
 0x69a   :  { %v968_v39 = vpop.f32.mrf.mxu0 }
 0x69b   :  { %v999_v44 = vmul.f32 %v968_v39, %v10608_v32  ;;  %v1042_v48 = vsel %vm801_vm7, %v1000_v33, 0.0 }
 0x69c   :  { %v8914_v54 = vpop.f32.mrf.mxu0  ;;  %1037 = vadd.xlane.f32.xlu0 %v1036_v40 }
 0x69d   :  { %v1002_v60 = vmul.f32 %v8914_v54, %v10580_v1  ;;  %v1039_v40 = vsel %vm801_vm7, %v999_v44, 0.0 }
 0x69e   :  { %v978_v38 = vpop.f32.mrf.mxu0 }
 0x69f   :  { %v1001_v49 = vmul.f32 %v978_v38, %v10597_v23  ;;  %v1048_v37 = vsel %vm801_vm7, %v1002_v60, 0.0 }
 0x6a0   :  { %1049 = vadd.xlane.f32.xlu1 %v1048_v37  ;;  %1034 = vadd.xlane.f32.xlu0 %v1033_v47 }
 0x6a1   :  { %v1045_v45 = vsel %vm801_vm7, %v1001_v49, 0.0 }
 0x6a4   :  { %1046 = vadd.xlane.f32.xlu1 %v1045_v45  ;;  %1043 = vadd.xlane.f32.xlu0 %v1042_v48 }
 0x6a8   :  { %1040 = vadd.xlane.f32.xlu0 %v1039_v40 }
 0x6d0   :  { %v11122_v1 = vpop.f32.mrf.mxu0 }
 0x6d2   :  { %v11124_v42 = vpop.f32.mrf.mxu0 }
 0x6d4   :  { %v11126_v23 = vpop.f32.mrf.mxu0 }
 0x6d6   :  { %v11128_v38 = vpop.f32.mrf.mxu0 }
 0x6d8   :  { %v8962_v43 = vpop.f32.mrf.mxu0 }
 0x6da   :  { %v11130_v54 = vpop.f32.mrf.mxu0 }
 0x6dc   :  { %v8965_v39 = vpop.f32.mrf.mxu0 }
 0x6de   :  { %v1440_v60 = vpop.f32.mrf.mxu0 }
 0x6e0   :  { %v8968_v47 = vpop.f32.mrf.mxu0 }
 0x6e1   :  { %v1498_v33 = vmul.f32 %v8968_v47, %v10626_v46  ;;  %v10134_v47 = vld [vmem:[%s13264_s8 + $0x78] sm:$0xff] }
 0x6e2   :  { %v1450_v49 = vpop.f32.mrf.mxu0 }
 0x6e3   :  { %v1497_v37 = vmul.f32 %v1450_v49, %v10632_v50  ;;  %v1532_v44 = vsel %vm801_vm7, %v1498_v33, 0.0  ;;  %v994_v49 = vmul.f32 %v11102_v57, %v10638_v58  ;;  %v1496_v57 = vmul.f32 %v8965_v39, %v10638_v58 }
 0x6e4   :  { %v8971_v45 = vpop.f32.mrf.mxu0  ;;  %1533 = vadd.xlane.f32.xlu1 %v1532_v44  ;;  %v990_v58 = vmul.f32 %v11094_v24, %v10662_v11  ;;  %v1495_v39 = vmul.f32 %v1440_v60, %v10644_v62  ;;  %v1493_v24 = vmul.f32 %v11130_v54, %v10656_v7 }
 0x6e5   :  { %v1500_v48 = vmul.f32 %v8971_v45, %v10614_v36  ;;  %v1529_v35 = vsel %vm801_vm7, %v1497_v37, 0.0 }
 0x6e6   :  { %v1460_v40 = vpop.f32.mrf.mxu0 }
 0x6e7   :  { %v1538_v20 = vsel %vm801_vm7, %v1500_v48, 0.0  ;;  %v1499_v30 = vmul.f32 %v1460_v40, %v10620_v41  ;;  %v8996_v41 = vpop.f32.mrf.mxu1  ;;  %v1024_v48 = vsel %vm801_vm7, %v994_v49, 0.0  ;;  %v1012_v49 = vsel %vm801_vm7, %v990_v58, 0.0 }
 0x6e8   :  { %v8974_v34 = vpop.f32.mrf.mxu0  ;;  %1530 = vadd.xlane.f32.xlu1 %v1529_v35 }
 0x6e9   :  { %v1502_v50 = vmul.f32 %v8974_v34, %v10602_v26  ;;  %v1535_v37 = vsel %vm801_vm7, %v1499_v30, 0.0  ;;  %v993_v34 = vmul.f32 %v11104_v59, %v10644_v62  ;;  %v992_v30 = vmul.f32 %v11098_v28, %v10650_v0 }
 0x6ea   :  { %v1470_v17 = vpop.f32.mrf.mxu0  ;;  %v991_v59 = vmul.f32 %v11100_v53, %v10656_v7  ;;  %v1526_v28 = vsel %vm801_vm7, %v1496_v57, 0.0  ;;  %v988_v62 = vmul.f32 %v11090_v19, %v10674_v21  ;;  %v1491_v7 = vmul.f32 %v11128_v38, %v10668_v16  ;;  %v11199_v38 = vpop.f32.mrf.mxu1 }
 0x6eb   :  { %v1501_v45 = vmul.f32 %v1470_v17, %v10608_v32  ;;  %v1021_v40 = vsel %vm801_vm7, %v993_v34, 0.0  ;;  %v1018_v32 = vsel %vm801_vm7, %v992_v30, 0.0  ;;  %v10135_v17 = vld [vmem:[%s13264_s8 + $0x70] sm:$0xff] }
 0x6ec   :  { %v8977_v46 = vpop.f32.mrf.mxu0  ;;  %1539 = vadd.xlane.f32.xlu1 %v1538_v20  ;;  %v1544_v20 = vsel %vm801_vm7, %v1502_v50, 0.0  ;;  %v11203_v34 = vpop.f32.mrf.mxu1 }
 0x6ed   :  { %v1504_v33 = vmul.f32 %v10134_v47, %v8977_v46  ;;  %v1541_v46 = vsel %vm801_vm7, %v1501_v45, 0.0  ;;  %v1015_v47 = vsel %vm801_vm7, %v991_v59, 0.0 }
 0x6ee   :  { %v1480_v36 = vpop.f32.mrf.mxu0 }
 0x6ef   :  { %v1550_v35 = vsel %vm801_vm7, %v1504_v33, 0.0  ;;  %v1503_v50 = vmul.f32 %v10135_v17, %v1480_v36  ;;  %v989_v33 = vmul.f32 %v11096_v25, %v10668_v16  ;;  %v1494_v36 = vmul.f32 %v8962_v43, %v10650_v0 }
 0x6f0   :  { %1551 = vadd.xlane.f32.xlu0 %v1550_v35  ;;  %1536 = vadd.xlane.f32.xlu1 %v1535_v37  ;;  %v9024_v44 = vpop.f32.mrf.mxu0  ;;  %v1523_v35 = vsel %vm801_vm7, %v1495_v39, 0.0  ;;  %v987_v0 = vmul.f32 %v11092_v22, %v10680_v27  ;;  %v1492_v25 = vmul.f32 %v11126_v23, %v10662_v11  ;;  %v1006_v43 = vsel %vm801_vm7, %v988_v62, 0.0 }
 0x6f1   :  { %v11148_v26 = vadd.f32 %v9024_v44, %v8996_v41  ;;  %v1547_v53 = vsel %vm801_vm7, %v1503_v50, 0.0  ;;  %v1009_v60 = vsel %vm801_vm7, %v989_v33, 0.0  ;;  %v1520_v37 = vsel %vm801_vm7, %v1494_v36, 0.0 }
 0x6f2   :  { %v1517_v41 = vsel %vm801_vm7, %v1493_v24, 0.0  ;;  %v1003_v19 = vsel %vm801_vm7, %v987_v0, 0.0  ;;  %v1514_v54 = vsel %vm801_vm7, %v1492_v25, 0.0  ;;  %v1490_v22 = vmul.f32 %v11122_v1, %v10674_v21  ;;  %v11207_v21 = vpop.f32.mrf.mxu1 }
 0x6f3   :  { %v1511_v11 = vsel %vm801_vm7, %v1491_v7, 0.0  ;;  %v1489_v23 = vmul.f32 %v11124_v42, %v10680_v27 }
 0x6f4   :  { %1025 = vadd.xlane.f32.xlu0 %v1024_v48  ;;  %1545 = vadd.xlane.f32.xlu1 %v1544_v20  ;;  %v1508_v44 = vsel %vm801_vm7, %v1490_v22, 0.0  ;;  %v11201_v20 = vpop.f32.mrf.mxu0  ;;  %v11211_v48 = vpop.f32.mrf.mxu1 }
 0x6f5   :  { %v1505_v16 = vsel %vm801_vm7, %v1489_v23, 0.0 }
 0x6f6   :  { %v11205_v45 = vpop.f32.mrf.mxu0  ;;  %v11215_v42 = vpop.f32.mrf.mxu1 }
 0x6f8   :  { %1022 = vadd.xlane.f32.xlu0 %v1021_v40  ;;  %1542 = vadd.xlane.f32.xlu1 %v1541_v46  ;;  %v11209_v1 = vpop.f32.mrf.mxu0  ;;  %v11219_v57 = vpop.f32.mrf.mxu1 }
 0x6fa   :  { %v11213_v27 = vpop.f32.mrf.mxu0  ;;  %v11223_v46 = vpop.f32.mrf.mxu1 }
 0x6fc   :  { %1019 = vadd.xlane.f32.xlu0 %v1018_v32  ;;  %1527 = vadd.xlane.f32.xlu1 %v1526_v28  ;;  %v11217_v30 = vpop.f32.mrf.mxu0  ;;  %v9008_v17 = vpop.f32.mrf.mxu1 }
 0x6fe   :  { %v11221_v40 = vpop.f32.mrf.mxu0  ;;  %v1897_v28 = vpop.f32.mrf.mxu1 }
 0x700   :  { %1016 = vadd.xlane.f32.xlu0 %v1015_v47  ;;  %1548 = vadd.xlane.f32.xlu1 %v1547_v53  ;;  %v11225_v59 = vpop.f32.mrf.mxu0  ;;  %v9011_v47 = vpop.f32.mrf.mxu1 }
 0x702   :  { %v9036_v50 = vpop.f32.mrf.mxu0 }
 0x704   :  { %1013 = vadd.xlane.f32.xlu0 %v1012_v49  ;;  %1524 = vadd.xlane.f32.xlu1 %v1523_v35  ;;  %v2042_v58 = vpop.f32.mrf.mxu0  ;;  %v1907_v49 = vpop.f32.mrf.mxu1 }
 0x706   :  { %v9039_v53 = vpop.f32.mrf.mxu0  ;;  %v9014_v62 = vpop.f32.mrf.mxu1 }
 0x707   :  { %v2058_v2 = vadd.f32 %v9039_v53, %v9011_v47  ;;  %v2043_v53 = vadd.f32 %v2042_v58, %v1897_v28  ;;  %v2033_v58 = vadd.f32 %v11225_v59, %v11223_v46  ;;  %v2023_v46 = vadd.f32 %v11217_v30, %v11215_v42 }
 0x708   :  { %1010 = vadd.xlane.f32.xlu0 %v1009_v60  ;;  %1521 = vadd.xlane.f32.xlu1 %v1520_v37  ;;  %v2052_v35 = vpop.f32.mrf.mxu0  ;;  %v1917_v0 = vpop.f32.mrf.mxu1  ;;  %v2013_v42 = vadd.f32 %v11209_v1, %v11207_v21  ;;  %v2003_v21 = vadd.f32 %v11201_v20, %v11199_v38 }
 0x709   :  { %v2087_v59 = vmax.f32 %v2033_v58, 0.0  ;;  %v2085_v30 = vmax.f32 %v2023_v46, 0.0 }
 0x70a   :  { %v9042_v24 = vpop.f32.mrf.mxu0  ;;  %v9017_v7 = vpop.f32.mrf.mxu1  ;;  %v2083_v1 = vmax.f32 %v2013_v42, 0.0 }
 0x70b   :  { %v2068_v55 = vadd.f32 %v9042_v24, %v9014_v62 }
 0x70c   :  { %1007 = vadd.xlane.f32.xlu0 %v1006_v43  ;;  %1518 = vadd.xlane.f32.xlu1 %v1517_v41  ;;  %v2062_v25 = vpop.f32.mrf.mxu0  ;;  %v1927_v5 = vpop.f32.mrf.mxu1 }
 0x70d   :  { %v2063_v3 = vadd.f32 %v2062_v25, %v1917_v0  ;;  %v2094_v63 = vmax.f32 %v2068_v55, 0.0 }
 0x710   :  { %1004 = vadd.xlane.f32.xlu0 %v1003_v19  ;;  %1515 = vadd.xlane.f32.xlu1 %v1514_v54  ;;  %v9045_v19 = vpop.f32.mrf.mxu0 }
 0x711   :  { %v2078_v22 = vadd.f32 %v9045_v19, %v9017_v7 }
 0x712   :  { %v2072_v4 = vpop.f32.mrf.mxu0 }
 0x713   :  { %v2073_v19 = vadd.f32 %v2072_v4, %v1927_v5  ;;  %v2048_v4 = vadd.f32 %v9036_v50, %v9008_v17  ;;  %v2092_v5 = vmax.f32 %v2058_v2, 0.0  ;;  %v2089_v50 = vmax.f32 %v2043_v53, 0.0  ;;  %v11320_v53 = vld [vmem:[%s13272_s12 + $0x30] sm:$0xff] }
 0x714   :  { %1512 = vadd.xlane.f32.xlu1 %v1511_v11  ;;  %13638 = vst [vmem:[#allocation33_spill] sm:$0xff] %v11320_v53 }
 0x715   :  { %v2095_v52 = vmax.f32 %v2073_v19, 0.0 }
 0x718   :  { %1509 = vadd.xlane.f32.xlu1 %v1508_v44  ;;  %v2096_v44 = vmax.f32 %v2078_v22, 0.0 }
 0x71c   :  { %1506 = vadd.xlane.f32.xlu1 %v1505_v16 }
 0x71d   :  { %v11227_v32 = vpop.xlane.xlu0 %1031 }
 0x721   :  { %v11229_v39 = vpop.xlane.xlu0 %1028 }
 0x725   :  { %v1038_v33 = vpop.xlane.xlu0 %1037 }
 0x729   :  { %v1050_v36 = vpop.xlane.xlu1 %1049  ;;  %v1035_v60 = vpop.xlane.xlu0 %1034 }
 0x72d   :  { %v1047_v37 = vpop.xlane.xlu1 %1046  ;;  %v1044_v41 = vpop.xlane.xlu0 %1043 }
 0x731   :  { %v1041_v11 = vpop.xlane.xlu0 %1040 }
 0x76d   :  { %v1534_v43 = vpop.xlane.xlu1 %1533 }
 0x771   :  { %v1531_v54 = vpop.xlane.xlu1 %1530 }
 0x775   :  { %v1540_v23 = vpop.xlane.xlu1 %1539 }
 0x779   :  { %v1552_v16 = vpop.xlane.xlu0 %1551  ;;  %v1537_v29 = vpop.xlane.xlu1 %1536 }
 0x77a   :  { %v11232_v18 = vsel %vm609_vm1, %v1050_v36, %v1552_v16 }
 0x77b   :  { %13636 = vst [vmem:[#allocation31_spill] sm:$0xff] %v11232_v18  ;;  %v2112_v15 = vmul.f32 %v2096_v44, %v11232_v18  ;;  %v2093_v18 = vmax.f32 %v2063_v3, 0.0 }
 0x77d   :  { %v1026_v14 = vpop.xlane.xlu0 %1025  ;;  %v1546_v13 = vpop.xlane.xlu1 %1545  ;;  %9046 = vmatprep.subr.mxu1 %v2112_v15 }
 0x77e   :  { %9047 = vmatpush3.msra.mxu1 %v2112_v15  ;;  %v11236_v16 = vsel %vm609_vm1, %v1044_v41, %v1546_v13  ;;  %v2053_v15 = vadd.f32 %v2052_v35, %v1907_v49  ;;  %v11247_v13 = vsel %vm609_vm1, %v1038_v33, %v1540_v23 }
 0x77f   :  { %v2110_v55 = vmul.f32 %v2094_v63, %v11236_v16  ;;  %v2108_v17 = vmul.f32 %v2092_v5, %v11247_v13  ;;  %v11256_v63 = vsel %vm609_vm1, %v11227_v32, %v1534_v43  ;;  %v2081_v5 = vmax.f32 %v2003_v21, 0.0 }
 0x781   :  { %v1023_v12 = vpop.xlane.xlu0 %1022  ;;  %v1543_v6 = vpop.xlane.xlu1 %1542 }
 0x782   :  { %v11243_v62 = vsel %vm609_vm1, %v1041_v11, %v1543_v6  ;;  %v2090_v6 = vmax.f32 %v2048_v4, 0.0 }
 0x783   :  { %v2109_v3 = vmul.f32 %v2093_v18, %v11243_v62  ;;  %v11263_v18 = vsel %vm609_vm1, %v11229_v39, %v1531_v54 }
 0x784   :  { %v2106_v32 = vmul.f32 %v2090_v6, %v11256_v63  ;;  %v2105_v39 = vmul.f32 %v2089_v50, %v11263_v18  ;;  %v11340_v6 = vld [vmem:[%s13272_s12 + $0x20] sm:$0xff] }
 0x785   :  { %v1528_v7 = vpop.xlane.xlu1 %1527  ;;  %v1020_v22 = vpop.xlane.xlu0 %1019  ;;  %13640 = vst [vmem:[#allocation35_spill] sm:$0xff] %v11340_v6  ;;  %v11370_v50 = vld [vmem:[%s13272_s12] sm:$0xff] }
 0x786   :  { %v11269_v49 = vsel %vm609_vm1, %v1026_v14, %v1528_v7  ;;  %13644 = vst [vmem:[#allocation39_spill] sm:$0xff] %v11370_v50 }
 0x789   :  { %v1549_v36 = vpop.xlane.xlu1 %1548  ;;  %v1017_v24 = vpop.xlane.xlu0 %1016 }
 0x78a   :  { %v11239_v44 = vsel %vm609_vm1, %v1047_v37, %v1549_v36  ;;  %v2091_v37 = vmax.f32 %v2053_v15, 0.0  ;;  %v2082_v15 = vmax.f32 %v11148_v26, 0.0  ;;  %v11315_v26 = vld [vmem:[%s13272_s12 + $0x38] sm:$0xff] }
 0x78b   :  { %v2111_v56 = vmul.f32 %v2095_v52, %v11239_v44  ;;  %v11251_v52 = vsel %vm609_vm1, %v1035_v60, %v1537_v29  ;;  %13637 = vst [vmem:[#allocation32_spill] sm:$0xff] %v11315_v26 }
 0x78c   :  { %v2107_v29 = vmul.f32 %v2091_v37, %v11251_v52  ;;  %v11325_v37 = vld [vmem:[%s13263_s7 + $0x8] sm:$0xff] }
 0x78d   :  { %v1525_v47 = vpop.xlane.xlu1 %1524  ;;  %9048 = vmatprep.subr.mxu1 %v2111_v56  ;;  %v1014_v28 = vpop.xlane.xlu0 %1013 }
 0x78e   :  { %9049 = vmatpush3.msra.mxu1 %v2111_v56  ;;  %v2038_v56 = vadd.f32 %v11221_v40, %v11219_v57  ;;  %v2028_v57 = vadd.f32 %v11213_v27, %v11211_v48  ;;  %v11275_v35 = vsel %vm609_vm1, %v1023_v12, %v1525_v47  ;;  %v2018_v48 = vadd.f32 %v11205_v45, %v11203_v34 }
 0x78f   :  { %9050 = vmatprep.subr.mxu1 %v2110_v55  ;;  %v2103_v12 = vmul.f32 %v2087_v59, %v11275_v35 }
 0x790   :  { %9051 = vmatpush3.msra.mxu1 %v2110_v55  ;;  %v2088_v40 = vmax.f32 %v2038_v56, 0.0  ;;  %v2086_v27 = vmax.f32 %v2028_v57, 0.0  ;;  %v2084_v34 = vmax.f32 %v2018_v48, 0.0  ;;  %v11363_v56 = vld [vmem:[%s13272_s12 + $0x8] sm:$0xff]  ;;  %v11400_v57 = vld [vmem:[%s13273_s13] sm:$0xff] }
 0x791   :  { %v1522_v2 = vpop.xlane.xlu1 %1521  ;;  %9052 = vmatprep.subr.mxu1 %v2109_v3  ;;  %v1011_v60 = vpop.xlane.xlu0 %1010  ;;  %13643 = vst [vmem:[#allocation38_spill] sm:$0xff] %v11363_v56  ;;  %13647 = vst [vmem:[#allocation42_spill] sm:$0xff] %v11400_v57  ;;  %v11450_v48 = vld [vmem:[%s13274_s16] sm:$0xff] }
 0x792   :  { %9053 = vmatpush3.msra.mxu1 %v2109_v3  ;;  %v2104_v14 = vmul.f32 %v2088_v40, %v11269_v49  ;;  %v11281_v25 = vsel %vm609_vm1, %v1020_v22, %v1522_v2  ;;  %v11333_v3 = vld [vmem:[%s13272_s12 + $0x28] sm:$0xff]  ;;  %v11347_v2 = vld [vmem:[%s13272_s12 + $0x18] sm:$0xff]  ;;  %13653 = vst [vmem:[#allocation48_spill] sm:$0xff] %v11450_v48 }
 0x793   :  { %9054 = vmatprep.subr.mxu1 %v2108_v17  ;;  %v2102_v54 = vmul.f32 %v2086_v27, %v11281_v25  ;;  %13639 = vst [vmem:[#allocation34_spill] sm:$0xff] %v11333_v3  ;;  %13641 = vst [vmem:[#allocation36_spill] sm:$0xff] %v11347_v2  ;;  %v7694_v27 = vld [vmem:[%s13275_s15] ss:$0 sm:$0xff] }
 0x794   :  { %9055 = vmatpush3.msra.mxu1 %v2108_v17  ;;  %v11354_v17 = vld [vmem:[%s13272_s12 + $0x10] sm:$0xff] }
 0x795   :  { %v1519_v33 = vpop.xlane.xlu1 %1518  ;;  %9056 = vmatprep.subr.mxu1 %v2107_v29  ;;  %v1008_v45 = vpop.xlane.xlu0 %1007  ;;  %13642 = vst [vmem:[#allocation37_spill] sm:$0xff] %v11354_v17 }
 0x796   :  { %9057 = vmatpush3.msra.mxu1 %v2107_v29  ;;  %v11287_v43 = vsel %vm609_vm1, %v1017_v24, %v1519_v33  ;;  %v11386_v33 = vld [vmem:[%s13273_s13 + $0x10] sm:$0xff] }
 0x797   :  { %9058 = vmatprep.subr.mxu1 %v2106_v32  ;;  %v2101_v23 = vmul.f32 %v2085_v30, %v11287_v43  ;;  %13645 = vst [vmem:[#allocation40_spill] sm:$0xff] %v11386_v33  ;;  %v11461_v30 = vadd.f32 %v7694_v27, %v10790_v9  ;;  %v13657_v9 = vld [vmem:[#allocation17_spill] sm:$0xff] }
 0x798   :  { %9059 = vmatpush3.msra.mxu1 %v2106_v32  ;;  %v11393_v32 = vld [vmem:[%s13273_s13 + $0x8] sm:$0xff] }
 0x799   :  { %v1516_v0 = vpop.xlane.xlu1 %1515  ;;  %9060 = vmatprep.subr.mxu1 %v2105_v39  ;;  %v1005_v24 = vpop.xlane.xlu0 %1004  ;;  %13646 = vst [vmem:[#allocation41_spill] sm:$0xff] %v11393_v32  ;;  %13655 = vst [vmem:[#allocation50_spill] sm:$0xff] %v11461_v30 }
 0x79a   :  { %9061 = vmatpush3.msra.mxu1 %v2105_v39  ;;  %v11293_v11 = vsel %vm609_vm1, %v1014_v28, %v1516_v0  ;;  %v11377_v28 = vld [vmem:[%s13273_s13 + $0x18] sm:$0xff] }
 0x79b   :  { %9062 = vmatprep.subr.mxu1 %v2104_v14  ;;  %v2100_v22 = vmul.f32 %v2084_v34, %v11293_v11  ;;  %9100 = vmatprep.subr.mxu0 %v11377_v28  ;;  %v11420_v0 = vld [vmem:[%s13269_s0 + $0x18] sm:$0xff] }
 0x79c   :  { %9063 = vmatpush3.msra.mxu1 %v2104_v14  ;;  %9101 = vmatpush3.msra.mxu0 %v11377_v28  ;;  %13649 = vst [vmem:[#allocation44_spill] sm:$0xff] %v11420_v0  ;;  %v11429_v14 = vld [vmem:[%s13274_s16 + $0x18] sm:$0xff] }
 0x79d   :  { %v1513_v41 = vpop.xlane.xlu1 %1512  ;;  %9064 = vmatprep.subr.mxu1 %v2103_v12  ;;  %9102 = vmatprep.subr.mxu0 %v11386_v33  ;;  %13650 = vst [vmem:[#allocation45_spill] sm:$0xff] %v11429_v14 }
 0x79e   :  { %9065 = vmatpush3.msra.mxu1 %v2103_v12  ;;  %v11297_v7 = vsel %vm609_vm1, %v1011_v60, %v1513_v41  ;;  %9103 = vmatpush3.msra.mxu0 %v11386_v33  ;;  %v11409_v60 = vld [vmem:[%s13269_s0 + $0x10] sm:$0xff]  ;;  %v11458_v12 = vadd.f32 %v10788_v8, %v7694_v27  ;;  %v11474_v8 = vld [vmem:[%s13262_s5] sm:$0xff] }
 0x79f   :  { %9066 = vmatprep.subr.mxu1 %v2102_v54  ;;  %v2099_v4 = vmul.f32 %v2083_v1, %v11297_v7  ;;  %9104 = vmatprep.subr.mxu0 %v11393_v32  ;;  %13648 = vst [vmem:[#allocation43_spill] sm:$0xff] %v11409_v60  ;;  %13656 = vst [vmem:[#allocation51_spill] sm:$0xff] %v11474_v8  ;;  %v13671_v27 = vld [vmem:[#allocation2_spill] sm:$0xff] }
 0x7a0   :  { %9067 = vmatpush3.msra.mxu1 %v2102_v54  ;;  %9105 = vmatpush3.msra.mxu0 %v11393_v32  ;;  %13654 = vst [vmem:[#allocation49_spill] sm:$0xff] %v11458_v12 }
 0x7a1   :  { %v1510_v19 = vpop.xlane.xlu1 %1509  ;;  %9068 = vmatprep.subr.mxu1 %v2101_v23  ;;  %9106 = vmatprep.subr.mxu0 %v11400_v57 }
 0x7a2   :  { %v11303_v36 = vsel %vm609_vm1, %v1008_v45, %v1510_v19  ;;  %9069 = vmatpush3.msra.mxu1 %v2101_v23  ;;  %9107 = vmatpush3.msra.mxu0 %v11400_v57 }
 0x7a3   :  { %9070 = vmatprep.subr.mxu1 %v2100_v22  ;;  %v2098_v38 = vmul.f32 %v2082_v15, %v11303_v36  ;;  %9122 = vmatprep.subr.msk.mxu0 %vm1704_vm9, %v10750_v31  ;;  %v13659_v15 = vld [vmem:[#allocation19_spill] sm:$0xff] }
 0x7a4   :  { %9071 = vmatpush3.msra.mxu1 %v2100_v22 }
 0x7a5   :  { %v1507_v47 = vpop.xlane.xlu1 %1506  ;;  %9072 = vmatprep.subr.mxu1 %v2099_v4 }
 0x7a6   :  { %v11309_v20 = vsel %vm609_vm1, %v1005_v24, %v1507_v47  ;;  %9073 = vmatpush3.msra.mxu1 %v2099_v4  ;;  %v13661_v4 = vld [vmem:[#allocation21_spill] sm:$0xff]  ;;  %v13663_v24 = vld [vmem:[#allocation23_spill] sm:$0xff]  ;;  %v13664_v47 = vld [vmem:[#allocation24_spill] sm:$0xff] }
 0x7a7   :  { %9074 = vmatprep.subr.mxu1 %v2098_v38  ;;  %v2097_v55 = vmul.f32 %v2081_v5, %v11309_v20  ;;  %v13662_v5 = vld [vmem:[#allocation22_spill] sm:$0xff] }
 0x7a8   :  { %9075 = vmatpush3.msra.mxu1 %v2098_v38  ;;  %v13665_v38 = vld [vmem:[#allocation25_spill] sm:$0xff] }
 0x7a9   :  { %9076 = vmatprep.subr.mxu1 %v2097_v55 }
 0x7aa   :  { %9077 = vmatpush3.msra.mxu1 %v2097_v55  ;;  %v13666_v55 = vld [vmem:[#allocation26_spill] sm:$0xff] }
 0x7ab   :  { %9079 = vmatmul.mubr.f32.vlgmr.msra.gmra.mxu1 %v11325_v37  ;;  %9081 = vmatprep.subr.mxu1 %v11315_v26 }
 0x7ac   :  { %9082 = vmatpush3.msra.mxu1 %v11315_v26 }
 0x7ad   :  { %9083 = vmatprep.subr.mxu1 %v11320_v53 }
 0x7ae   :  { %9084 = vmatpush3.msra.mxu1 %v11320_v53 }
 0x7af   :  { %9085 = vmatprep.subr.mxu1 %v11333_v3 }
 0x7b0   :  { %9086 = vmatpush3.msra.mxu1 %v11333_v3 }
 0x7b1   :  { %9087 = vmatprep.subr.mxu1 %v11340_v6 }
 0x7b2   :  { %9088 = vmatpush3.msra.mxu1 %v11340_v6 }
 0x7b3   :  { %9089 = vmatprep.subr.mxu1 %v11347_v2 }
 0x7b4   :  { %9090 = vmatpush3.msra.mxu1 %v11347_v2 }
 0x7b5   :  { %9091 = vmatprep.subr.mxu1 %v11354_v17 }
 0x7b6   :  { %9092 = vmatpush3.msra.mxu1 %v11354_v17 }
 0x7b7   :  { %9093 = vmatprep.subr.mxu1 %v11363_v56 }
 0x7b8   :  { %9094 = vmatpush3.msra.mxu1 %v11363_v56 }
 0x7b9   :  { %9095 = vmatprep.subr.mxu1 %v11370_v50 }
 0x7ba   :  { %9096 = vmatpush3.msra.mxu1 %v11370_v50 }
 0x7bb   :  { %9111 = vmatprep.subr.mxu1 %v11429_v14 }
 0x86b   :  { %v9080_v29 = vpop.f32.mrf.mxu1 }
 0x86d   :  { %v2179_v58 = vpop.f32.mrf.mxu1 }
 0x86e   :  { %9097 = vmatprep.mubr.msk.f32.mxu1 %vm2188_vm15, %v2179_v58  ;;  %v13668_v58 = vld [vmem:[#allocation28_spill] sm:$0xff] }
 0x86f   :  { %9098 = vmatmul.mubr.msk.f32.vlgmr.msra.gmra.mxu1 %vm2188_vm15, %v9080_v29  ;;  %v13667_v29 = vld [vmem:[#allocation27_spill] sm:$0xff] }
 0x870   :  { %9112 = vmatpush3.msra.mxu1 %v11429_v14 }
 0x92f   :  { %v9099_v40 = vpop.f32.mrf.mxu1 }
 0x930   :  { %v2271_v59 = vmax.f32 %v9099_v40, 0.0  ;;  %v13669_v40 = vld [vmem:[#allocation29_spill] sm:$0xff] }
 0x931   :  { %v2261_v39 = vpop.f32.mrf.mxu1 }
 0x932   :  { %v2270_v46 = vmax.f32 %v2261_v39, 0.0  ;;  %v13670_v39 = vld [vmem:[#allocation30_spill] sm:$0xff] }
 0x934   :  { %9108 = vmatprep.mubr.msk.f32.mxu0 %vm609_vm1, %v2270_v46 }
 0x935   :  { %9109 = vmatmul.mubr.msk.f32.vlgmr.msra.gmra.mxu0 %vm609_vm1, %v2271_v59 }
 0x936   :  { %9123 = vmatpush3.msk.msra.mxu0 %vm1704_vm9, %v10750_v31  ;;  %9124 = vmatprep.mubr.msk.f32.mxu0 %vm1697_vm10, %v11409_v60  ;;  %v11436_v31 = vld [vmem:[%s13274_s16 + $0x10] sm:$0xff] }
 0x937   :  { %13651 = vst [vmem:[#allocation46_spill] sm:$0xff] %v11436_v31  ;;  %9113 = vmatprep.subr.mxu1 %v11436_v31 }
 0x938   :  { %9114 = vmatpush3.msra.mxu1 %v11436_v31 }
 0x939   :  { %9125 = vmatmul.mubr.msk.f32.vlgmr.msra.gmra.mxu0 %vm1697_vm10, %v11420_v0 }
 0x93a   :  { %9159 = vmatprep.mubr.msk.f32.mxu0 %vm117_vm0, %v10970_v51  ;;  %v11443_v51 = vld [vmem:[%s13274_s16 + $0x8] sm:$0xff] }
 0x93b   :  { %13652 = vst [vmem:[#allocation47_spill] sm:$0xff] %v11443_v51  ;;  %9115 = vmatprep.subr.mxu1 %v11443_v51 }
 0x93c   :  { %9116 = vmatpush3.msra.mxu1 %v11443_v51 }
 0x93d   :  { %9117 = vmatprep.subr.mxu1 %v11450_v48 }
 0x93e   :  { %9118 = vmatpush3.msra.mxu1 %v11450_v48 }
 0x9f5   :  { %v9110_v42 = vpop.f32.mrf.mxu0 }
 0x9f6   :  { %v2350_v41 = vadd.f32 %v9110_v42, %v11458_v12  ;;  %v13672_v42 = vld [vmem:[#allocation3_spill] sm:$0xff] }
 0x9f7   :  { %v2344_v54 = vpop.f32.mrf.mxu0 }
 0x9f8   :  { %v2345_v34 = vadd.f32 %v2344_v54, %v11461_v30  ;;  %v2354_v1 = vmax.f32 %v2350_v41, 0.0  ;;  %v13673_v41 = vld [vmem:[#allocation4_spill] sm:$0xff]  ;;  %v13674_v54 = vld [vmem:[#allocation5_spill] sm:$0xff] }
 0x9f9   :  { %v9126_v45 = vpop.f32.mrf.mxu0 }
 0x9fa   :  { %v2353_v23 = vmax.f32 %v2345_v34, 0.0  ;;  %v2520_v21 = vadd.f32 %v9126_v45, %v10795_v10  ;;  %v13675_v34 = vld [vmem:[#allocation6_spill] sm:$0xff]  ;;  %v13676_v45 = vld [vmem:[#allocation7_spill] sm:$0xff] }
 0x9fb   :  { %v2514_v19 = vpop.f32.mrf.mxu0 }
 0x9fc   :  { %v2515_v22 = vadd.f32 %v10795_v10, %v2514_v19  ;;  %2527 = vrot.lane.b32.xlu0 %v2520_v21, %s10247_s27  ;;  %9119 = vmatprep.mubr.msk.f32.mxu1 %vm609_vm1, %v2353_v23  ;;  %v13658_v10 = vld [vmem:[#allocation18_spill] sm:$0xff]  ;;  %v13677_v23 = vld [vmem:[#allocation8_spill] sm:$0xff]  ;;  %v13680_v19 = vld [vmem:[#allocation11_spill] sm:$0xff] }
 0x9fd   :  { %9120 = vmatmul.mubr.msk.f32.vlgmr.msra.gmra.mxu1 %vm609_vm1, %v2354_v1  ;;  %9155 = vmatprep.subr.mxu0 %v2520_v21  ;;  %v13679_v1 = vld [vmem:[#allocation10_spill] sm:$0xff] }
 0x9fe   :  { %2525 = vrot.lane.b32.xlu1 %v2515_v22, %s10247_s27  ;;  %9156 = vmatpush3.msra.mxu0 %v2520_v21  ;;  %v13678_v21 = vld [vmem:[#allocation9_spill] sm:$0xff] }
 0x9ff   :  { %9157 = vmatprep.subr.mxu0 %v2515_v22  ;;  %9131 = vmatprep.mubr.msk.f32.mxu1 %vm117_vm0, %v11474_v8 }
 0xa00   :  { %9158 = vmatpush3.msra.mxu0 %v2515_v22  ;;  %v13681_v22 = vld [vmem:[#allocation12_spill] sm:$0xff] }
 0xa01   :  { %9160 = vmatmul.mubr.msk.f32.vlgmr.msra.gmra.mxu0 %vm117_vm0, %v10981_v61  ;;  %9218 = vmatprep.subr.mxu0 %v11315_v26  ;;  %v13660_v61 = vld [vmem:[#allocation20_spill] sm:$0xff] }
 0xa02   :  { %9162 = vmatprep.mubr.msk.f32.mxu0 %vm117_vm0, %v13657_v9  ;;  %9219 = vmatpush3.msra.mxu0 %v11315_v26  ;;  %v13682_v9 = vld [vmem:[#allocation13_spill] sm:$0xff] }
 0xa03   :  { %9220 = vmatprep.subr.mxu0 %v11320_v53 }
 0xa04   :  { %9221 = vmatpush3.msra.mxu0 %v11320_v53 }
 0xa05   :  { %9163 = vmatmul.mubr.msk.f32.gmra.mxu0 %vm117_vm0, %v13658_v10  ;;  %9222 = vmatprep.subr.mxu0 %v11333_v3  ;;  %v13683_v10 = vld [vmem:[#allocation14_spill] sm:$0xff] }
 0xa06   :  { %9165 = vmatprep.mubr.msk.f32.mxu0 %vm117_vm0, %v13659_v15  ;;  %9223 = vmatpush3.msra.mxu0 %v11333_v3  ;;  %v13684_v15 = vld [vmem:[#allocation15_spill] sm:$0xff] }
 0xa07   :  { %9224 = vmatprep.subr.mxu0 %v11340_v6 }
 0xa08   :  { %9225 = vmatpush3.msra.mxu0 %v11340_v6 }
 0xa09   :  { %9166 = vmatmul.mubr.msk.f32.gmra.mxu0 %vm117_vm0, %v13660_v61  ;;  %9226 = vmatprep.subr.mxu0 %v11347_v2  ;;  %v13685_v61 = vld [vmem:[#allocation16_spill] sm:$0xff] }
 0xa0a   :  { %9168 = vmatprep.mubr.msk.f32.mxu0 %vm117_vm0, %v13661_v4  ;;  %9227 = vmatpush3.msra.mxu0 %v11347_v2  ;;  %v11558_v4 = vld [vmem:[%s13263_s7] sm:$0xff] }
 0xa0b   :  { %9228 = vmatprep.subr.mxu0 %v11354_v17  ;;  %13686 = vst [vmem:[#allocation17_spill] sm:$0xff] %v11558_v4 }
 0xa0c   :  { %9229 = vmatpush3.msra.mxu0 %v11354_v17 }
 0xa0d   :  { %9169 = vmatmul.mubr.msk.f32.gmra.mxu0 %vm117_vm0, %v13662_v5  ;;  %9230 = vmatprep.subr.mxu0 %v11363_v56  ;;  %v11564_v5 = vld [vmem:[%s13276_s17] ss:$0 sm:$0xff] }
 0xa0e   :  { %9171 = vmatprep.mubr.msk.f32.mxu0 %vm117_vm0, %v13663_v24  ;;  %9231 = vmatpush3.msra.mxu0 %v11363_v56  ;;  %13687 = vst [vmem:[#allocation18_spill] sm:$0xff] %v11564_v5 }
 0xa0f   :  { %9232 = vmatprep.subr.mxu0 %v11370_v50 }
 0xa10   :  { %9233 = vmatpush3.msra.mxu0 %v11370_v50 }
 0xa11   :  { %9172 = vmatmul.mubr.msk.f32.gmra.mxu0 %vm117_vm0, %v13664_v47  ;;  %9248 = vmatprep.subr.mxu0 %v11429_v14  ;;  %v10139_v47 = vld [vmem:[%s13269_s0 + $0x8] sm:$0xff] }
 0xa12   :  { %9174 = vmatprep.mubr.msk.f32.mxu0 %vm117_vm0, %v13665_v38 }
 0xa15   :  { %9175 = vmatmul.mubr.msk.f32.gmra.mxu0 %vm117_vm0, %v13666_v55 }
 0xa16   :  { %9177 = vmatprep.mubr.msk.f32.mxu0 %vm117_vm0, %v13667_v29 }
 0xa19   :  { %9178 = vmatmul.mubr.msk.f32.gmra.mxu0 %vm117_vm0, %v13668_v58  ;;  %v10140_v58 = vld [vmem:[%s13269_s0] sm:$0xff] }
 0xa1a   :  { %9180 = vmatprep.mubr.msk.f32.mxu0 %vm117_vm0, %v13669_v40 }
 0xa1d   :  { %9181 = vmatmul.mubr.msk.f32.gmra.mxu0 %vm117_vm0, %v13670_v39 }
 0xa6e   :  { %v2528_v46 = vpop.permute.xlu0 %2527 }
 0xa6f   :  { %9127 = vmatprep.subr.mxu1 %v2528_v46 }
 0xa70   :  { %v2526_v59 = vpop.permute.xlu1 %2525  ;;  %9128 = vmatpush3.msra.mxu1 %v2528_v46 }
 0xa71   :  { %9129 = vmatprep.subr.mxu1 %v2526_v59 }
 0xa72   :  { %9130 = vmatpush3.msra.mxu1 %v2526_v59 }
 0xa73   :  { %9132 = vmatmul.mubr.msk.f32.vlgmr.msra.gmra.mxu1 %vm117_vm0, %v13671_v27 }
 0xa74   :  { %9134 = vmatprep.mubr.msk.f32.mxu1 %vm117_vm0, %v13672_v42 }
 0xa77   :  { %9135 = vmatmul.mubr.msk.f32.gmra.mxu1 %vm117_vm0, %v13673_v41 }
 0xa78   :  { %9137 = vmatprep.mubr.msk.f32.mxu1 %vm117_vm0, %v13674_v54 }
 0xa7b   :  { %9138 = vmatmul.mubr.msk.f32.gmra.mxu1 %vm117_vm0, %v13675_v34 }
 0xa7c   :  { %9140 = vmatprep.mubr.msk.f32.mxu1 %vm117_vm0, %v13676_v45 }
 0xa7f   :  { %9141 = vmatmul.mubr.msk.f32.gmra.mxu1 %vm117_vm0, %v13677_v23 }
 0xa80   :  { %9143 = vmatprep.mubr.msk.f32.mxu1 %vm117_vm0, %v13678_v21 }
 0xa83   :  { %9144 = vmatmul.mubr.msk.f32.gmra.mxu1 %vm117_vm0, %v13679_v1 }
 0xa84   :  { %9146 = vmatprep.mubr.msk.f32.mxu1 %vm117_vm0, %v13680_v19 }
 0xa87   :  { %9147 = vmatmul.mubr.msk.f32.gmra.mxu1 %vm117_vm0, %v13681_v22 }
 0xa88   :  { %9149 = vmatprep.mubr.msk.f32.mxu1 %vm117_vm0, %v13682_v9 }
 0xa8b   :  { %9150 = vmatmul.mubr.msk.f32.gmra.mxu1 %vm117_vm0, %v13683_v10 }
 0xa8c   :  { %9152 = vmatprep.mubr.msk.f32.mxu1 %vm117_vm0, %v13684_v15 }
 0xa8f   :  { %9153 = vmatmul.mubr.msk.f32.gmra.mxu1 %vm117_vm0, %v13685_v61 }
 0xa90   :  { %9215 = vmatprep.mubr.f32.mxu1 %v11558_v4 }
 0xabd   :  { %v9121_v24 = vpop.f32.mrf.mxu1 }
 0xabe   :  { %v2437_v38 = vadd.f32 %v10139_v47, %v9121_v24 }
 0xabf   :  { %v2427_v55 = vpop.f32.mrf.mxu1 }
 0xac0   :  { %v11570_v29 = vadd.f32 %v11564_v5, %v2437_v38  ;;  %v2436_v40 = vadd.f32 %v10140_v58, %v2427_v55 }
 0xac1   :  { %v11588_v46 = vpop.f32.mrf.mxu0 }
 0xac2   :  { %13688 = vst [vmem:[#allocation19_spill] sm:$0xff] %v11570_v29  ;;  %2441 = vst.msk [vmem:[%s13277_s18 + $0x8] sm:$0xff] %vm1697_vm10, %v11570_v29  ;;  %v11581_v39 = vadd.f32 %v11564_v5, %v2436_v40 }
 0xac3   :  { %v11590_v59 = vpop.f32.mrf.mxu0 }
 0xac4   :  { %13689 = vst [vmem:[#allocation20_spill] sm:$0xff] %v11581_v39  ;;  %2440 = vst.msk [vmem:[%s13277_s18] sm:$0xff] %vm1697_vm10, %v11581_v39  ;;  %v13690_v39 = vld [vmem:[#allocation31_spill] sm:$0xff] }
 0xac5   :  { %v11592_v27 = vpop.f32.mrf.mxu0 }
 0xac7   :  { %v11594_v42 = vpop.f32.mrf.mxu0 }
 0xac9   :  { %v9167_v41 = vpop.f32.mrf.mxu0 }
 0xacb   :  { %v11596_v54 = vpop.f32.mrf.mxu0 }
 0xacd   :  { %v9170_v34 = vpop.f32.mrf.mxu0 }
 0xacf   :  { %v2772_v45 = vpop.f32.mrf.mxu0 }
 0xad1   :  { %v9173_v1 = vpop.f32.mrf.mxu0 }
 0xad3   :  { %v2782_v9 = vpop.f32.mrf.mxu0 }
 0xad5   :  { %v9176_v61 = vpop.f32.mrf.mxu0 }
 0xad7   :  { %v2792_v38 = vpop.f32.mrf.mxu0 }
 0xad9   :  { %v9179_v40 = vpop.f32.mrf.mxu0 }
 0xadb   :  { %v2802_v0 = vpop.f32.mrf.mxu0 }
 0xadd   :  { %v9182_v56 = vpop.f32.mrf.mxu0 }
 0xadf   :  { %v2812_v53 = vpop.f32.mrf.mxu0 }
 0xb33   :  { %v11598_v23 = vpop.f32.mrf.mxu1 }
 0xb35   :  { %v11600_v21 = vpop.f32.mrf.mxu1 }
 0xb37   :  { %v11602_v19 = vpop.f32.mrf.mxu1 }
 0xb39   :  { %v11604_v22 = vpop.f32.mrf.mxu1 }
 0xb3b   :  { %v9139_v10 = vpop.f32.mrf.mxu1 }
 0xb3d   :  { %v2617_v15 = vpop.f32.mrf.mxu1 }
 0xb3f   :  { %v9142_v24 = vpop.f32.mrf.mxu1 }
 0xb41   :  { %v2627_v47 = vpop.f32.mrf.mxu1 }
 0xb43   :  { %v9145_v55 = vpop.f32.mrf.mxu1 }
 0xb44   :  { %v2788_v32 = vadd.f32 %v9173_v1, %v9145_v55  ;;  %v13698_v55 = vld [vmem:[#allocation48_spill] sm:$0xff] }
 0xb45   :  { %v2637_v58 = vpop.f32.mrf.mxu1 }
 0xb47   :  { %v9148_v60 = vpop.f32.mrf.mxu1 }
 0xb48   :  { %v2798_v12 = vadd.f32 %v9176_v61, %v9148_v60 }
 0xb49   :  { %v2647_v5 = vpop.f32.mrf.mxu1 }
 0xb4a   :  { %v2793_v31 = vadd.f32 %v2792_v38, %v2647_v5  ;;  %v2832_v33 = vmax.f32 %v2798_v12, 0.0  ;;  %v13697_v38 = vld [vmem:[#allocation47_spill] sm:$0xff] }
 0xb4b   :  { %v9151_v4 = vpop.f32.mrf.mxu1 }
 0xb4c   :  { %v2808_v2 = vadd.f32 %v9179_v40, %v9151_v4 }
 0xb4d   :  { %v2657_v50 = vpop.f32.mrf.mxu1 }
 0xb4e   :  { %v2803_v26 = vadd.f32 %v2802_v0, %v2657_v50  ;;  %v2834_v29 = vmax.f32 %v2808_v2, 0.0  ;;  %v2830_v2 = vmax.f32 %v2788_v32, 0.0  ;;  %v2773_v50 = vadd.f32 %v2772_v45, %v2627_v47  ;;  %v13696_v47 = vld [vmem:[#allocation46_spill] sm:$0xff] }
 0xb4f   :  { %v9154_v17 = vpop.f32.mrf.mxu1  ;;  %v2758_v32 = vadd.f32 %v11592_v27, %v11602_v19  ;;  %v2743_v27 = vadd.f32 %v11590_v59, %v11600_v21  ;;  %v13691_v21 = vld [vmem:[#allocation40_spill] sm:$0xff] }
 0xb50   :  { %v2818_v6 = vadd.f32 %v9182_v56, %v9154_v17  ;;  %v2833_v14 = vmax.f32 %v2803_v26, 0.0  ;;  %v2850_v17 = vmul.f32 %v2834_v29, %v11236_v16  ;;  %v2783_v56 = vadd.f32 %v2782_v9, %v2637_v58  ;;  %v13693_v9 = vld [vmem:[#allocation42_spill] sm:$0xff] }
 0xb51   :  { %v2667_v3 = vpop.f32.mrf.mxu1  ;;  %v2848_v26 = vmul.f32 %v2832_v33, %v11247_v13  ;;  %v2748_v29 = vadd.f32 %v11588_v46, %v11598_v23  ;;  %v2821_v19 = vmax.f32 %v2743_v27, 0.0  ;;  %v11715_v27 = vld [vmem:[%s13606_s24 + $0x20] sm:$0xff] }
 0xb52   :  { %v2836_v8 = vmax.f32 %v2818_v6, 0.0  ;;  %v2813_v30 = vadd.f32 %v2812_v53, %v2667_v3  ;;  %v2831_v6 = vmax.f32 %v2793_v31, 0.0  ;;  %v2849_v53 = vmul.f32 %v2833_v14, %v11243_v62  ;;  %13712 = vst [vmem:[#allocation27_spill] sm:$0xff] %v11715_v27 }
 0xb53   :  { %v2778_v3 = vadd.f32 %v9170_v34, %v9142_v24  ;;  %v2829_v60 = vmax.f32 %v2783_v56, 0.0  ;;  %v2846_v31 = vmul.f32 %v2830_v2, %v11256_v63  ;;  %v2763_v14 = vadd.f32 %v11596_v54, %v2617_v15  ;;  %v13695_v24 = vld [vmem:[#allocation45_spill] sm:$0xff] }
 0xb54   :  { %v2852_v48 = vmul.f32 %v2836_v8, %v13690_v39  ;;  %v2835_v51 = vmax.f32 %v2813_v30, 0.0  ;;  %v2847_v0 = vmul.f32 %v2831_v6, %v11251_v52  ;;  %v2753_v8 = vadd.f32 %v11594_v42, %v11604_v22  ;;  %v13692_v22 = vld [vmem:[#allocation41_spill] sm:$0xff]  ;;  %v13699_v6 = vld [vmem:[#allocation20_spill] sm:$0xff] }
 0xb55   :  { %v2845_v33 = vmul.f32 %v2829_v60, %v11263_v18  ;;  %v2825_v4 = vmax.f32 %v2763_v14, 0.0  ;;  %v2822_v45 = vmax.f32 %v2748_v29, 0.0  ;;  %v2837_v59 = vmul.f32 %v2821_v19, %v11309_v20  ;;  %v11676_v14 = vld [vmem:[%s13271_s11] ss:$0 sm:$0xff]  ;;  %v13709_v29 = vld [vmem:[#allocation33_spill] sm:$0xff] }
 0xb56   :  { %9183 = vmatprep.subr.mxu1 %v2852_v48  ;;  %v2851_v57 = vmul.f32 %v2835_v51, %v11239_v44  ;;  %v2768_v51 = vadd.f32 %v9167_v41, %v9139_v10  ;;  %v2824_v41 = vmax.f32 %v2758_v32, 0.0  ;;  %v2823_v34 = vmax.f32 %v2753_v8, 0.0  ;;  %v11643_v10 = vld [vmem:[%s13268_s10] sm:$0xf]  ;;  %13704 = vst [vmem:[#allocation23_spill] sm:$0xff] %v11676_v14  ;;  %v11689_v8 = vld [vmem:[%s13606_s24 + $0x8] sm:$0xff] }
 0xb57   :  { %9184 = vmatpush3.msra.mxu1 %v2852_v48  ;;  %v2827_v48 = vmax.f32 %v2773_v50, 0.0  ;;  %v2841_v42 = vmul.f32 %v2825_v4, %v11287_v43  ;;  %v2838_v23 = vmul.f32 %v2822_v45, %v11303_v36  ;;  %13694 = vst [vmem:[#allocation21_spill] sm:$0xff] %v11643_v10  ;;  %13706 = vst [vmem:[#allocation24_spill] sm:$0xff] %v11689_v8  ;;  %v13707_v4 = vld [vmem:[#allocation32_spill] sm:$0xff]  ;;  %v13717_v19 = vld [vmem:[#allocation37_spill] sm:$0xff] }
 0xb58   :  { %9185 = vmatprep.subr.mxu1 %v2851_v57  ;;  %v2826_v12 = vmax.f32 %v2768_v51, 0.0  ;;  %v2840_v1 = vmul.f32 %v2824_v41, %v11293_v11  ;;  %v2839_v46 = vmul.f32 %v2823_v34, %v11297_v7  ;;  %v11707_v41 = vld [vmem:[%s13606_s24 + $0x18] sm:$0xff]  ;;  %v13713_v34 = vld [vmem:[#allocation35_spill] sm:$0xff]  ;;  %v13715_v45 = vld [vmem:[#allocation36_spill] sm:$0xff] }
 0xb59   :  { %9186 = vmatpush3.msra.mxu1 %v2851_v57  ;;  %v2828_v57 = vmax.f32 %v2778_v3, 0.0  ;;  %v2843_v5 = vmul.f32 %v2827_v48, %v11275_v35  ;;  %v11667_v3 = vld [vmem:[%s13606_s24] sm:$0xff]  ;;  %13710 = vst [vmem:[#allocation26_spill] sm:$0xff] %v11707_v41 }
 0xb5a   :  { %9187 = vmatprep.subr.mxu1 %v2850_v17  ;;  %v2842_v54 = vmul.f32 %v2826_v12, %v11281_v25  ;;  %13701 = vst [vmem:[#allocation22_spill] sm:$0xff] %v11667_v3 }
 0xb5b   :  { %9188 = vmatpush3.msra.mxu1 %v2850_v17  ;;  %v2844_v30 = vmul.f32 %v2828_v57, %v11269_v49 }
 0xb5c   :  { %9189 = vmatprep.subr.mxu1 %v2849_v53 }
 0xb5d   :  { %9190 = vmatpush3.msra.mxu1 %v2849_v53  ;;  %v13700_v53 = vld [vmem:[#allocation19_spill] sm:$0xff] }
 0xb5e   :  { %9191 = vmatprep.subr.mxu1 %v2848_v26 }
 0xb5f   :  { %9192 = vmatpush3.msra.mxu1 %v2848_v26  ;;  %v13702_v26 = vld [vmem:[#allocation49_spill] sm:$0xff] }
 0xb60   :  { %9193 = vmatprep.subr.mxu1 %v2847_v0 }
 0xb61   :  { %9194 = vmatpush3.msra.mxu1 %v2847_v0  ;;  %v13703_v0 = vld [vmem:[#allocation50_spill] sm:$0xff] }
 0xb62   :  { %9195 = vmatprep.subr.mxu1 %v2846_v31 }
 0xb63   :  { %9196 = vmatpush3.msra.mxu1 %v2846_v31 }
 0xb64   :  { %9197 = vmatprep.subr.mxu1 %v2845_v33 }
 0xb65   :  { %9198 = vmatpush3.msra.mxu1 %v2845_v33 }
 0xb66   :  { %9199 = vmatprep.subr.mxu1 %v2844_v30 }
 0xb67   :  { %9200 = vmatpush3.msra.mxu1 %v2844_v30  ;;  %v13705_v30 = vld [vmem:[#allocation51_spill] sm:$0xff] }
 0xb68   :  { %9201 = vmatprep.subr.mxu1 %v2843_v5 }
 0xb69   :  { %9202 = vmatpush3.msra.mxu1 %v2843_v5  ;;  %v11697_v5 = vld [vmem:[%s13606_s24 + $0x10] sm:$0xff] }
 0xb6a   :  { %9203 = vmatprep.subr.mxu1 %v2842_v54  ;;  %13708 = vst [vmem:[#allocation25_spill] sm:$0xff] %v11697_v5 }
 0xb6b   :  { %9204 = vmatpush3.msra.mxu1 %v2842_v54  ;;  %v13711_v54 = vld [vmem:[#allocation34_spill] sm:$0xff] }
 0xb6c   :  { %9205 = vmatprep.subr.mxu1 %v2841_v42 }
 0xb6d   :  { %9206 = vmatpush3.msra.mxu1 %v2841_v42  ;;  %v11725_v42 = vld [vmem:[%s13606_s24 + $0x28] sm:$0xff] }
 0xb6e   :  { %9207 = vmatprep.subr.mxu1 %v2840_v1  ;;  %13714 = vst [vmem:[#allocation28_spill] sm:$0xff] %v11725_v42 }
 0xb6f   :  { %9208 = vmatpush3.msra.mxu1 %v2840_v1  ;;  %v11733_v1 = vld [vmem:[%s13606_s24 + $0x30] sm:$0xff] }
 0xb70   :  { %9209 = vmatprep.subr.mxu1 %v2839_v46  ;;  %13716 = vst [vmem:[#allocation29_spill] sm:$0xff] %v11733_v1 }
 0xb71   :  { %9210 = vmatpush3.msra.mxu1 %v2839_v46  ;;  %v11743_v46 = vld [vmem:[%s13606_s24 + $0x38] sm:$0xff] }
 0xb72   :  { %9211 = vmatprep.subr.mxu1 %v2838_v23  ;;  %13718 = vst [vmem:[#allocation30_spill] sm:$0xff] %v11743_v46 }
 0xb73   :  { %9212 = vmatpush3.msra.mxu1 %v2838_v23  ;;  %v13719_v23 = vld [vmem:[#allocation38_spill] sm:$0xff] }
 0xb74   :  { %9213 = vmatprep.subr.mxu1 %v2837_v59 }
 0xb75   :  { %9214 = vmatpush3.msra.mxu1 %v2837_v59  ;;  %v11751_v59 = vld [vmem:[%s13606_s24 + $0x40] sm:$0xff] }
 0xb76   :  { %9216 = vmatmul.mubr.f32.vlgmr.msra.gmra.mxu1 %v11325_v37  ;;  %9237 = vmatprep.subr.mxu1 %v11377_v28  ;;  %13720 = vst [vmem:[#allocation2_spill] sm:$0xff] %v11751_v59 }
 0xb77   :  { %9238 = vmatpush3.msra.mxu1 %v11377_v28 }
 0xb78   :  { %9239 = vmatprep.subr.mxu1 %v13691_v21 }
 0xb79   :  { %9240 = vmatpush3.msra.mxu1 %v13691_v21 }
 0xb7a   :  { %9241 = vmatprep.subr.mxu1 %v13692_v22 }
 0xb7b   :  { %9242 = vmatpush3.msra.mxu1 %v13692_v22 }
 0xb7c   :  { %9243 = vmatprep.subr.mxu1 %v13693_v9 }
 0xb7d   :  { %9244 = vmatpush3.msra.mxu1 %v13693_v9 }
 0xb7e   :  { %9259 = vmatprep.subr.msk.mxu1 %vm1704_vm9, %v11643_v10 }
 0xc36   :  { %v9217_v15 = vpop.f32.mrf.mxu1 }
 0xc38   :  { %v2919_v61 = vpop.f32.mrf.mxu1 }
 0xc39   :  { %9234 = vmatprep.mubr.msk.f32.mxu0 %vm2188_vm15, %v2919_v61  ;;  %v11761_v61 = vld [vmem:[%s13606_s24 + $0x48] sm:$0xff] }
 0xc3a   :  { %9235 = vmatmul.mubr.msk.f32.vlgmr.msra.gmra.mxu0 %vm2188_vm15, %v9217_v15  ;;  %v13721_v15 = vld [vmem:[#allocation39_spill] sm:$0xff]  ;;  %13722 = vst [vmem:[#allocation3_spill] sm:$0xff] %v11761_v61 }
 0xc3b   :  { %9249 = vmatpush3.msra.mxu0 %v13695_v24 }
 0xc3c   :  { %9250 = vmatprep.subr.mxu0 %v13696_v47 }
 0xc3d   :  { %9251 = vmatpush3.msra.mxu0 %v13696_v47 }
 0xc3e   :  { %9252 = vmatprep.subr.mxu0 %v13697_v38 }
 0xc3f   :  { %9253 = vmatpush3.msra.mxu0 %v13697_v38 }
 0xc40   :  { %9254 = vmatprep.subr.mxu0 %v13698_v55 }
 0xc41   :  { %9255 = vmatpush3.msra.mxu0 %v13698_v55 }
 0xcfa   :  { %v9236_v58 = vpop.f32.mrf.mxu0 }
 0xcfb   :  { %v3010_v56 = vmax.f32 %v9236_v58, 0.0  ;;  %v11769_v58 = vld [vmem:[%s13606_s24 + $0x50] sm:$0xff] }
 0xcfc   :  { %v3000_v40 = vpop.f32.mrf.mxu0  ;;  %13723 = vst [vmem:[#allocation4_spill] sm:$0xff] %v11769_v58 }
 0xcfd   :  { %v3009_v17 = vmax.f32 %v3000_v40, 0.0  ;;  %v11776_v40 = vld [vmem:[%s13606_s24 + $0x58] sm:$0xff] }
 0xcfe   :  { %13724 = vst [vmem:[#allocation5_spill] sm:$0xff] %v11776_v40 }
 0xcff   :  { %9245 = vmatprep.mubr.msk.f32.mxu1 %vm609_vm1, %v3009_v17  ;;  %v11783_v17 = vld [vmem:[%s13606_s24 + $0x60] sm:$0xff] }
 0xd00   :  { %9246 = vmatmul.mubr.msk.f32.vlgmr.msra.gmra.mxu1 %vm609_vm1, %v3010_v56  ;;  %13725 = vst [vmem:[#allocation6_spill] sm:$0xff] %v11783_v17  ;;  %v11790_v56 = vld [vmem:[%s13606_s24 + $0x68] sm:$0xff] }
 0xd01   :  { %9261 = vmatprep.mubr.msk.f32.mxu1 %vm1697_vm10, %v13699_v6  ;;  %9260 = vmatpush3.msk.msra.mxu1 %vm1704_vm9, %v11643_v10  ;;  %13726 = vst [vmem:[#allocation7_spill] sm:$0xff] %v11790_v56 }
 0xd04   :  { %9262 = vmatmul.mubr.msk.f32.vlgmr.msra.gmra.mxu1 %vm1697_vm10, %v13700_v53  ;;  %v13745_v53 = vld [vmem:[#allocation44_spill] sm:$0xff] }
 0xd05   :  { %9296 = vmatprep.mubr.msk.f32.mxu1 %vm117_vm0, %v11667_v3 }
 0xdc0   :  { %v9247_v2 = vpop.f32.mrf.mxu1 }
 0xdc1   :  { %v3089_v50 = vadd.f32 %v9247_v2, %v13702_v26  ;;  %v11797_v2 = vld [vmem:[%s13606_s24 + $0x70] sm:$0xff] }
 0xdc2   :  { %v3083_v60 = vpop.f32.mrf.mxu1  ;;  %13727 = vst [vmem:[#allocation8_spill] sm:$0xff] %v11797_v2 }
 0xdc3   :  { %v3084_v51 = vadd.f32 %v3083_v60, %v13703_v0  ;;  %v3093_v33 = vmax.f32 %v3089_v50, 0.0  ;;  %v11804_v50 = vld [vmem:[%s13606_s24 + $0x78] sm:$0xff] }
 0xdc4   :  { %v9263_v57 = vpop.f32.mrf.mxu1  ;;  %13728 = vst [vmem:[#allocation9_spill] sm:$0xff] %v11804_v50 }
 0xdc5   :  { %v3092_v31 = vmax.f32 %v3084_v51, 0.0  ;;  %v3260_v48 = vadd.f32 %v11676_v14, %v9263_v57  ;;  %v11811_v57 = vld [vmem:[%s13262_s5 + $0x8] sm:$0xff] }
 0xdc6   :  { %v3254_v32 = vpop.f32.mrf.mxu1  ;;  %13729 = vst [vmem:[#allocation10_spill] sm:$0xff] %v11811_v57 }
 0xdc7   :  { %v3255_v12 = vadd.f32 %v11676_v14, %v3254_v32  ;;  %9256 = vmatprep.mubr.msk.f32.mxu0 %vm609_vm1, %v3092_v31  ;;  %3267 = vrot.lane.b32.xlu1 %v3260_v48, %s10247_s27  ;;  %v11818_v31 = vld [vmem:[%s13262_s5 + $0x10] sm:$0xff]  ;;  %v11839_v32 = vld [vmem:[%s13262_s5 + $0x28] sm:$0xff] }
 0xdc8   :  { %9292 = vmatprep.subr.mxu1 %v3260_v48  ;;  %9257 = vmatmul.mubr.msk.f32.vlgmr.msra.gmra.mxu0 %vm609_vm1, %v3093_v33  ;;  %13730 = vst [vmem:[#allocation11_spill] sm:$0xff] %v11818_v31  ;;  %v11832_v33 = vld [vmem:[%s13262_s5 + $0x20] sm:$0xff]  ;;  %13733 = vst [vmem:[#allocation14_spill] sm:$0xff] %v11839_v32 }
 0xdc9   :  { %9293 = vmatpush3.msra.mxu1 %v3260_v48  ;;  %3265 = vrot.lane.b32.xlu0 %v3255_v12, %s10247_s27  ;;  %v11825_v48 = vld [vmem:[%s13262_s5 + $0x18] sm:$0xff]  ;;  %13732 = vst [vmem:[#allocation13_spill] sm:$0xff] %v11832_v33 }
 0xdca   :  { %9294 = vmatprep.subr.mxu1 %v3255_v12  ;;  %9268 = vmatprep.mubr.msk.f32.mxu0 %vm117_vm0, %v13705_v30  ;;  %13731 = vst [vmem:[#allocation12_spill] sm:$0xff] %v11825_v48 }
 0xdcb   :  { %9295 = vmatpush3.msra.mxu1 %v3255_v12  ;;  %v11846_v12 = vld [vmem:[%s13262_s5 + $0x30] sm:$0xff] }
 0xdcc   :  { %9297 = vmatmul.mubr.msk.f32.vlgmr.msra.gmra.mxu1 %vm117_vm0, %v11689_v8  ;;  %9355 = vmatprep.subr.mxu1 %v13707_v4  ;;  %13734 = vst [vmem:[#allocation15_spill] sm:$0xff] %v11846_v12 }
 0xdcd   :  { %9299 = vmatprep.mubr.msk.f32.mxu1 %vm117_vm0, %v11697_v5  ;;  %9356 = vmatpush3.msra.mxu1 %v13707_v4  ;;  %v11853_v4 = vld [vmem:[%s13262_s5 + $0x38] sm:$0xff] }
 0xdce   :  { %9357 = vmatprep.subr.mxu1 %v13709_v29  ;;  %13735 = vst [vmem:[#allocation16_spill] sm:$0xff] %v11853_v4 }
 0xdcf   :  { %9358 = vmatpush3.msra.mxu1 %v13709_v29  ;;  %v11860_v29 = vld [vmem:[%s13262_s5 + $0x40] sm:$0xff] }
 0xdd0   :  { %9300 = vmatmul.mubr.msk.f32.gmra.mxu1 %vm117_vm0, %v11707_v41  ;;  %9359 = vmatprep.subr.mxu1 %v13711_v54  ;;  %13736 = vst [vmem:[#allocation31_spill] sm:$0xff] %v11860_v29 }
 0xdd1   :  { %9302 = vmatprep.mubr.msk.f32.mxu1 %vm117_vm0, %v11715_v27  ;;  %9360 = vmatpush3.msra.mxu1 %v13711_v54  ;;  %v11867_v54 = vld [vmem:[%s13262_s5 + $0x48] sm:$0xff] }
 0xdd2   :  { %9361 = vmatprep.subr.mxu1 %v13713_v34  ;;  %13737 = vst [vmem:[#allocation32_spill] sm:$0xff] %v11867_v54 }
 0xdd3   :  { %9362 = vmatpush3.msra.mxu1 %v13713_v34  ;;  %v11874_v34 = vld [vmem:[%s13262_s5 + $0x50] sm:$0xff] }
 0xdd4   :  { %9303 = vmatmul.mubr.msk.f32.gmra.mxu1 %vm117_vm0, %v11725_v42  ;;  %9363 = vmatprep.subr.mxu1 %v13715_v45  ;;  %13738 = vst [vmem:[#allocation33_spill] sm:$0xff] %v11874_v34 }
 0xdd5   :  { %9305 = vmatprep.mubr.msk.f32.mxu1 %vm117_vm0, %v11733_v1  ;;  %9364 = vmatpush3.msra.mxu1 %v13715_v45  ;;  %v11881_v45 = vld [vmem:[%s13262_s5 + $0x58] sm:$0xff] }
 0xdd6   :  { %9365 = vmatprep.subr.mxu1 %v13717_v19  ;;  %13739 = vst [vmem:[#allocation34_spill] sm:$0xff] %v11881_v45 }
 0xdd7   :  { %9366 = vmatpush3.msra.mxu1 %v13717_v19  ;;  %v11888_v19 = vld [vmem:[%s13262_s5 + $0x60] sm:$0xff] }
 0xdd8   :  { %9306 = vmatmul.mubr.msk.f32.gmra.mxu1 %vm117_vm0, %v11743_v46  ;;  %9367 = vmatprep.subr.mxu1 %v13719_v23  ;;  %13740 = vst [vmem:[#allocation35_spill] sm:$0xff] %v11888_v19 }
 0xdd9   :  { %9308 = vmatprep.mubr.msk.f32.mxu1 %vm117_vm0, %v11751_v59  ;;  %9368 = vmatpush3.msra.mxu1 %v13719_v23  ;;  %v11895_v23 = vld [vmem:[%s13262_s5 + $0x68] sm:$0xff] }
 0xdda   :  { %9369 = vmatprep.subr.mxu1 %v13721_v15  ;;  %13741 = vst [vmem:[#allocation36_spill] sm:$0xff] %v11895_v23 }
 0xddb   :  { %9370 = vmatpush3.msra.mxu1 %v13721_v15  ;;  %v11902_v15 = vld [vmem:[%s13262_s5 + $0x70] sm:$0xff] }
 0xddc   :  { %9309 = vmatmul.mubr.msk.f32.gmra.mxu1 %vm117_vm0, %v11761_v61  ;;  %9385 = vmatprep.subr.mxu1 %v13695_v24  ;;  %13742 = vst [vmem:[#allocation37_spill] sm:$0xff] %v11902_v15 }
 0xddd   :  { %9311 = vmatprep.mubr.msk.f32.mxu1 %vm117_vm0, %v11769_v58 }
 0xde0   :  { %9312 = vmatmul.mubr.msk.f32.gmra.mxu1 %vm117_vm0, %v11776_v40 }
 0xde1   :  { %9314 = vmatprep.mubr.msk.f32.mxu1 %vm117_vm0, %v11783_v17 }
 0xde4   :  { %9315 = vmatmul.mubr.msk.f32.gmra.mxu1 %vm117_vm0, %v11790_v56 }
 0xde5   :  { %9317 = vmatprep.mubr.msk.f32.mxu1 %vm117_vm0, %v11797_v2 }
 0xde8   :  { %9318 = vmatmul.mubr.msk.f32.gmra.mxu1 %vm117_vm0, %v11804_v50 }
 0xe39   :  { %v3268_v60 = vpop.permute.xlu1 %3267 }
 0xe3a   :  { %9264 = vmatprep.subr.mxu0 %v3268_v60 }
 0xe3b   :  { %9265 = vmatpush3.msra.mxu0 %v3268_v60  ;;  %v3266_v51 = vpop.permute.xlu0 %3265  ;;  %v11909_v60 = vld [vmem:[%s13262_s5 + $0x78] sm:$0xff] }
 0xe3c   :  { %9266 = vmatprep.subr.mxu0 %v3266_v51  ;;  %13743 = vst [vmem:[#allocation38_spill] sm:$0xff] %v11909_v60 }
 0xe3d   :  { %9267 = vmatpush3.msra.mxu0 %v3266_v51  ;;  %v13744_v51 = vld [vmem:[#allocation17_spill] sm:$0xff] }
 0xe3e   :  { %9269 = vmatmul.mubr.msk.f32.vlgmr.msra.gmra.mxu0 %vm117_vm0, %v11811_v57 }
 0xe3f   :  { %9271 = vmatprep.mubr.msk.f32.mxu0 %vm117_vm0, %v11818_v31 }
 0xe42   :  { %9272 = vmatmul.mubr.msk.f32.gmra.mxu0 %vm117_vm0, %v11825_v48 }
 0xe43   :  { %9274 = vmatprep.mubr.msk.f32.mxu0 %vm117_vm0, %v11832_v33 }
 0xe46   :  { %9275 = vmatmul.mubr.msk.f32.gmra.mxu0 %vm117_vm0, %v11839_v32 }
 0xe47   :  { %9277 = vmatprep.mubr.msk.f32.mxu0 %vm117_vm0, %v11846_v12 }
 0xe4a   :  { %9278 = vmatmul.mubr.msk.f32.gmra.mxu0 %vm117_vm0, %v11853_v4 }
 0xe4b   :  { %9280 = vmatprep.mubr.msk.f32.mxu0 %vm117_vm0, %v11860_v29 }
 0xe4e   :  { %9281 = vmatmul.mubr.msk.f32.gmra.mxu0 %vm117_vm0, %v11867_v54  ;;  %v13748_v54 = vld [vmem:[#allocation43_spill] sm:$0xff] }
 0xe4f   :  { %9283 = vmatprep.mubr.msk.f32.mxu0 %vm117_vm0, %v11874_v34 }
 0xe52   :  { %9284 = vmatmul.mubr.msk.f32.gmra.mxu0 %vm117_vm0, %v11881_v45  ;;  %v13746_v45 = vld [vmem:[#allocation18_spill] sm:$0xff] }
 0xe53   :  { %9286 = vmatprep.mubr.msk.f32.mxu0 %vm117_vm0, %v11888_v19 }
 0xe56   :  { %9287 = vmatmul.mubr.msk.f32.gmra.mxu0 %vm117_vm0, %v11895_v23 }
 0xe57   :  { %9289 = vmatprep.mubr.msk.f32.mxu0 %vm117_vm0, %v11902_v15 }
 0xe5a   :  { %9290 = vmatmul.mubr.msk.f32.gmra.mxu0 %vm117_vm0, %v11909_v60 }
 0xe5b   :  { %9352 = vmatprep.mubr.f32.mxu0 %v13744_v51 }
 0xe88   :  { %v9258_v6 = vpop.f32.mrf.mxu0 }
 0xe89   :  { %v3176_v23 = vadd.f32 %v9258_v6, %v13745_v53 }
 0xe8a   :  { %v3166_v19 = vpop.f32.mrf.mxu0 }
 0xe8b   :  { %v11916_v34 = vadd.f32 %v13746_v45, %v3176_v23  ;;  %v3175_v29 = vadd.f32 %v13748_v54, %v3166_v19 }
 0xe8c   :  { %v11932_v6 = vpop.f32.mrf.mxu1 }
 0xe8d   :  { %13747 = vst [vmem:[#allocation39_spill] sm:$0xff] %v11916_v34  ;;  %7782 = vst.msk [vmem:[%s13277_s18 + $0x48] sm:$0xff] %vm1697_vm10, %v11916_v34  ;;  %v11925_v15 = vadd.f32 %v13746_v45, %v3175_v29 }
 0xe8e   :  { %v11934_v53 = vpop.f32.mrf.mxu1 }
 0xe8f   :  { %13749 = vst [vmem:[#allocation44_spill] sm:$0xff] %v11925_v15  ;;  %7781 = vst.msk [vmem:[%s13277_s18 + $0x40] sm:$0xff] %vm1697_vm10, %v11925_v15 }
 0xe90   :  { %v11936_v54 = vpop.f32.mrf.mxu1 }
 0xe92   :  { %v11938_v19 = vpop.f32.mrf.mxu1 }
 0xe94   :  { %v9304_v23 = vpop.f32.mrf.mxu1 }
 0xe96   :  { %v11940_v51 = vpop.f32.mrf.mxu1 }
 0xe98   :  { %v9307_v60 = vpop.f32.mrf.mxu1 }
 0xe9a   :  { %v3512_v29 = vpop.f32.mrf.mxu1 }
 0xe9c   :  { %v9310_v12 = vpop.f32.mrf.mxu1 }
 0xe9e   :  { %v3522_v48 = vpop.f32.mrf.mxu1 }
 0xea0   :  { %v9313_v50 = vpop.f32.mrf.mxu1 }
 0xea2   :  { %v3532_v17 = vpop.f32.mrf.mxu1 }
 0xea4   :  { %v9316_v61 = vpop.f32.mrf.mxu1 }
 0xea6   :  { %v3542_v1 = vpop.f32.mrf.mxu1 }
 0xea8   :  { %v9319_v41 = vpop.f32.mrf.mxu1 }
 0xeaa   :  { %v3552_v0 = vpop.f32.mrf.mxu1 }
 0xefe   :  { %v11942_v45 = vpop.f32.mrf.mxu0 }
 0xf00   :  { %v11944_v4 = vpop.f32.mrf.mxu0 }
 0xf02   :  { %v11946_v32 = vpop.f32.mrf.mxu0 }
 0xf04   :  { %v11948_v33 = vpop.f32.mrf.mxu0 }
 0xf06   :  { %v9276_v31 = vpop.f32.mrf.mxu0 }
 0xf08   :  { %v3357_v57 = vpop.f32.mrf.mxu0 }
 0xf0a   :  { %v9279_v2 = vpop.f32.mrf.mxu0 }
 0xf0c   :  { %v3367_v56 = vpop.f32.mrf.mxu0 }
 0xf0e   :  { %v9282_v40 = vpop.f32.mrf.mxu0 }
 0xf0f   :  { %v3528_v22 = vadd.f32 %v9310_v12, %v9282_v40 }
 0xf10   :  { %v3377_v58 = vpop.f32.mrf.mxu0 }
 0xf12   :  { %v9285_v59 = vpop.f32.mrf.mxu0 }
 0xf13   :  { %v3538_v15 = vadd.f32 %v9313_v50, %v9285_v59 }
 0xf14   :  { %v3387_v46 = vpop.f32.mrf.mxu0 }
 0xf15   :  { %v3533_v24 = vadd.f32 %v3532_v17, %v3387_v46  ;;  %v3572_v21 = vmax.f32 %v3538_v15, 0.0  ;;  %v3493_v46 = vadd.f32 %v11938_v19, %v11948_v33  ;;  %v13753_v15 = vld [vmem:[#allocation21_spill] sm:$0xff] }
 0xf16   :  { %v9288_v42 = vpop.f32.mrf.mxu0 }
 0xf17   :  { %v3548_v8 = vadd.f32 %v9316_v61, %v9288_v42 }
 0xf18   :  { %v3397_v27 = vpop.f32.mrf.mxu0 }
 0xf19   :  { %v3543_v26 = vadd.f32 %v3542_v1, %v3397_v27  ;;  %v3574_v55 = vmax.f32 %v3548_v8, 0.0 }
 0xf1a   :  { %v9291_v5 = vpop.f32.mrf.mxu0 }
 0xf1b   :  { %v3558_v30 = vadd.f32 %v9319_v41, %v9291_v5  ;;  %v3573_v10 = vmax.f32 %v3543_v26, 0.0  ;;  %v3590_v5 = vmul.f32 %v3574_v55, %v11236_v16  ;;  %v3523_v41 = vadd.f32 %v3522_v48, %v3377_v58 }
 0xf1c   :  { %v3407_v14 = vpop.f32.mrf.mxu0  ;;  %v3588_v26 = vmul.f32 %v3572_v21, %v11247_v13  ;;  %v3508_v55 = vadd.f32 %v9304_v23, %v9276_v31  ;;  %v3488_v58 = vadd.f32 %v11932_v6, %v11942_v45  ;;  %v13752_v45 = vld [vmem:[#allocation42_spill] sm:$0xff]  ;;  %v13756_v6 = vld [vmem:[#allocation47_spill] sm:$0xff] }
 0xf1d   :  { %v3576_v3 = vmax.f32 %v3558_v30, 0.0  ;;  %v3553_v34 = vadd.f32 %v3552_v0, %v3407_v14  ;;  %v3571_v30 = vmax.f32 %v3533_v24, 0.0  ;;  %v3589_v0 = vmul.f32 %v3573_v10, %v11243_v62 }
 0xf1e   :  { %v3570_v14 = vmax.f32 %v3528_v22, 0.0  ;;  %v3503_v10 = vadd.f32 %v11940_v51, %v3357_v57  ;;  %v3498_v22 = vadd.f32 %v11936_v54, %v11946_v32  ;;  %v3566_v42 = vmax.f32 %v3508_v55, 0.0  ;;  %v13755_v51 = vld [vmem:[#allocation46_spill] sm:$0xff] }
 0xf1f   :  { %v3592_v38 = vmul.f32 %v3576_v3, %v13690_v39  ;;  %v3575_v47 = vmax.f32 %v3553_v34, 0.0  ;;  %v3518_v3 = vadd.f32 %v9307_v60, %v9279_v2  ;;  %v3587_v8 = vmul.f32 %v3571_v30, %v11251_v52  ;;  %v13751_v34 = vld [vmem:[#allocation41_spill] sm:$0xff]  ;;  %v13760_v30 = vld [vmem:[#allocation22_spill] sm:$0xff] }
 0xf20   :  { %v3586_v24 = vmul.f32 %v3570_v14, %v11256_v63  ;;  %v3565_v59 = vmax.f32 %v3503_v10, 0.0  ;;  %v3564_v40 = vmax.f32 %v3498_v22, 0.0  ;;  %v3582_v17 = vmul.f32 %v3566_v42, %v11281_v25  ;;  %v13764_v22 = vld [vmem:[#allocation51_spill] sm:$0xff]  ;;  %v13765_v42 = vld [vmem:[#allocation24_spill] sm:$0xff] }
 0xf21   :  { %v3591_v9 = vmul.f32 %v3575_v47, %v11239_v44  ;;  %9320 = vmatprep.subr.mxu0 %v3592_v38  ;;  %v3513_v47 = vadd.f32 %v3512_v29, %v3367_v56  ;;  %v3483_v56 = vadd.f32 %v11934_v53, %v11944_v4  ;;  %v3563_v2 = vmax.f32 %v3493_v46, 0.0  ;;  %v13750_v4 = vld [vmem:[#allocation40_spill] sm:$0xff]  ;;  %v13767_v46 = vld [vmem:[#allocation25_spill] sm:$0xff] }
 0xf22   :  { %9321 = vmatpush3.msra.mxu0 %v3592_v38  ;;  %v3569_v38 = vmax.f32 %v3523_v41, 0.0  ;;  %v3581_v50 = vmul.f32 %v3565_v59, %v11287_v43  ;;  %v3562_v57 = vmax.f32 %v3488_v58, 0.0  ;;  %v3580_v31 = vmul.f32 %v3564_v40, %v11293_v11  ;;  %v13757_v53 = vld [vmem:[#allocation48_spill] sm:$0xff]  ;;  %v13759_v41 = vld [vmem:[#allocation39_spill] sm:$0xff] }
 0xf23   :  { %9322 = vmatprep.subr.mxu0 %v3591_v9  ;;  %v3567_v27 = vmax.f32 %v3513_v47, 0.0  ;;  %v3561_v48 = vmax.f32 %v3483_v56, 0.0  ;;  %v3579_v33 = vmul.f32 %v3563_v2, %v11297_v7  ;;  %v13762_v47 = vld [vmem:[#allocation50_spill] sm:$0xff]  ;;  %v12029_v59 = vld [vmem:[%s13272_s12 + $0x30] sm:$0xff]  ;;  %v12038_v58 = vld [vmem:[%s13272_s12 + $0x28] sm:$0xff] }
 0xf24   :  { %9323 = vmatpush3.msra.mxu0 %v3591_v9  ;;  %v3568_v9 = vmax.f32 %v3518_v3, 0.0  ;;  %v3585_v21 = vmul.f32 %v3569_v38, %v11263_v18  ;;  %v3578_v32 = vmul.f32 %v3562_v57, %v11303_v36  ;;  %v13761_v3 = vld [vmem:[#allocation49_spill] sm:$0xff]  ;;  %13768 = vst [vmem:[#allocation40_spill] sm:$0xff] %v12029_v59  ;;  %13770 = vst [vmem:[#allocation41_spill] sm:$0xff] %v12038_v58  ;;  %v13771_v40 = vld [vmem:[#allocation27_spill] sm:$0xff] }
 0xf25   :  { %9324 = vmatprep.subr.mxu0 %v3590_v5  ;;  %v3583_v61 = vmul.f32 %v3567_v27, %v11275_v35  ;;  %v3577_v12 = vmul.f32 %v3561_v48, %v11309_v20  ;;  %v13773_v56 = vld [vmem:[#allocation28_spill] sm:$0xff]  ;;  %v12056_v2 = vld [vmem:[%s13272_s12 + $0x18] sm:$0xff]  ;;  %v12074_v48 = vld [vmem:[%s13272_s12 + $0x8] sm:$0xff] }
 0xf26   :  { %9325 = vmatpush3.msra.mxu0 %v3590_v5  ;;  %v3584_v1 = vmul.f32 %v3568_v9, %v11269_v49  ;;  %v13758_v5 = vld [vmem:[#allocation44_spill] sm:$0xff]  ;;  %v13763_v9 = vld [vmem:[#allocation23_spill] sm:$0xff]  ;;  %13774 = vst [vmem:[#allocation21_spill] sm:$0xff] %v12056_v2  ;;  %13778 = vst [vmem:[#allocation46_spill] sm:$0xff] %v12074_v48 }
 0xf27   :  { %9326 = vmatprep.subr.mxu0 %v3589_v0  ;;  %v12065_v57 = vld [vmem:[%s13272_s12 + $0x10] sm:$0xff] }
 0xf28   :  { %9327 = vmatpush3.msra.mxu0 %v3589_v0 }
 0xf29   :  { %9328 = vmatprep.subr.mxu0 %v3588_v26 }
 0xf2a   :  { %9329 = vmatpush3.msra.mxu0 %v3588_v26 }
 0xf2b   :  { %9330 = vmatprep.subr.mxu0 %v3587_v8 }
 0xf2c   :  { %9331 = vmatpush3.msra.mxu0 %v3587_v8 }
 0xf2d   :  { %9332 = vmatprep.subr.mxu0 %v3586_v24 }
 0xf2e   :  { %9333 = vmatpush3.msra.mxu0 %v3586_v24 }
 0xf2f   :  { %9334 = vmatprep.subr.mxu0 %v3585_v21 }
 0xf30   :  { %9335 = vmatpush3.msra.mxu0 %v3585_v21 }
 0xf31   :  { %9336 = vmatprep.subr.mxu0 %v3584_v1 }
 0xf32   :  { %9337 = vmatpush3.msra.mxu0 %v3584_v1  ;;  %v12020_v1 = vld [vmem:[%s13272_s12 + $0x38] sm:$0xff] }
 0xf33   :  { %9338 = vmatprep.subr.mxu0 %v3583_v61  ;;  %13766 = vst [vmem:[#allocation43_spill] sm:$0xff] %v12020_v1 }
 0xf34   :  { %9339 = vmatpush3.msra.mxu0 %v3583_v61  ;;  %v13769_v61 = vld [vmem:[#allocation26_spill] sm:$0xff] }
 0xf35   :  { %9340 = vmatprep.subr.mxu0 %v3582_v17 }
 0xf36   :  { %9341 = vmatpush3.msra.mxu0 %v3582_v17  ;;  %v12047_v17 = vld [vmem:[%s13272_s12 + $0x20] sm:$0xff] }
 0xf37   :  { %9342 = vmatprep.subr.mxu0 %v3581_v50  ;;  %13772 = vst [vmem:[#allocation42_spill] sm:$0xff] %v12047_v17 }
 0xf38   :  { %9343 = vmatpush3.msra.mxu0 %v3581_v50  ;;  %v13775_v50 = vld [vmem:[#allocation29_spill] sm:$0xff] }
 0xf39   :  { %9344 = vmatprep.subr.mxu0 %v3580_v31 }
 0xf3a   :  { %9345 = vmatpush3.msra.mxu0 %v3580_v31  ;;  %v13777_v31 = vld [vmem:[#allocation30_spill] sm:$0xff] }
 0xf3b   :  { %9346 = vmatprep.subr.mxu0 %v3579_v33 }
 0xf3c   :  { %9347 = vmatpush3.msra.mxu0 %v3579_v33  ;;  %v13779_v33 = vld [vmem:[#allocation2_spill] sm:$0xff] }
 0xf3d   :  { %9348 = vmatprep.subr.mxu0 %v3578_v32 }
 0xf3e   :  { %9349 = vmatpush3.msra.mxu0 %v3578_v32  ;;  %v12083_v32 = vld [vmem:[%s13272_s12] sm:$0xff] }
 0xf3f   :  { %9350 = vmatprep.subr.mxu0 %v3577_v12  ;;  %13780 = vst [vmem:[#allocation47_spill] sm:$0xff] %v12083_v32 }
 0xf40   :  { %9351 = vmatpush3.msra.mxu0 %v3577_v12  ;;  %v13781_v12 = vld [vmem:[#allocation3_spill] sm:$0xff] }
 0xf41   :  { %9353 = vmatmul.mubr.f32.vlgmr.msra.gmra.mxu0 %v11325_v37  ;;  %9374 = vmatprep.subr.mxu0 %v11377_v28 }
 0xf42   :  { %9375 = vmatpush3.msra.mxu0 %v11377_v28  ;;  %v13754_v28 = vld [vmem:[#allocation45_spill] sm:$0xff] }
 0xf43   :  { %9376 = vmatprep.subr.mxu0 %v13750_v4  ;;  %13776 = vst [vmem:[#allocation45_spill] sm:$0xff] %v12065_v57 }
 0xf44   :  { %9377 = vmatpush3.msra.mxu0 %v13750_v4  ;;  %v13782_v4 = vld [vmem:[#allocation4_spill] sm:$0xff] }
 0xf45   :  { %9378 = vmatprep.subr.mxu0 %v13751_v34 }
 0xf46   :  { %9379 = vmatpush3.msra.mxu0 %v13751_v34  ;;  %v13783_v34 = vld [vmem:[#allocation5_spill] sm:$0xff] }
 0xf47   :  { %9380 = vmatprep.subr.mxu0 %v13752_v45 }
 0xf48   :  { %9381 = vmatpush3.msra.mxu0 %v13752_v45  ;;  %v13784_v45 = vld [vmem:[#allocation6_spill] sm:$0xff] }
 0xf49   :  { %9396 = vmatprep.subr.msk.mxu0 %vm1704_vm9, %v13753_v15 }
0x1001   :  { %v9354_v37 = vpop.f32.mrf.mxu0 }
0x1003   :  { %v3659_v60 = vpop.f32.mrf.mxu0 }
0x1004   :  { %9371 = vmatprep.mubr.msk.f32.mxu1 %vm2188_vm15, %v3659_v60  ;;  %v13786_v60 = vld [vmem:[#allocation8_spill] sm:$0xff] }
0x1005   :  { %9372 = vmatmul.mubr.msk.f32.vlgmr.msra.gmra.mxu1 %vm2188_vm15, %v9354_v37  ;;  %v13785_v37 = vld [vmem:[#allocation7_spill] sm:$0xff] }
0x1006   :  { %9386 = vmatpush3.msra.mxu1 %v13754_v28 }
0x1007   :  { %9387 = vmatprep.subr.mxu1 %v13755_v51 }
0x1008   :  { %9388 = vmatpush3.msra.mxu1 %v13755_v51  ;;  %v13787_v51 = vld [vmem:[#allocation9_spill] sm:$0xff] }
0x1009   :  { %9389 = vmatprep.subr.mxu1 %v13756_v6 }
0x100a   :  { %9390 = vmatpush3.msra.mxu1 %v13756_v6 }
0x100b   :  { %9391 = vmatprep.subr.mxu1 %v13757_v53 }
0x100c   :  { %9392 = vmatpush3.msra.mxu1 %v13757_v53  ;;  %v13788_v53 = vld [vmem:[#allocation10_spill] sm:$0xff] }
0x10c5   :  { %v9373_v54 = vpop.f32.mrf.mxu1 }
0x10c6   :  { %v3750_v29 = vmax.f32 %v9373_v54, 0.0  ;;  %v13789_v54 = vld [vmem:[#allocation11_spill] sm:$0xff] }
0x10c7   :  { %v3740_v19 = vpop.f32.mrf.mxu1 }
0x10c8   :  { %v3749_v23 = vmax.f32 %v3740_v19, 0.0  ;;  %v13790_v19 = vld [vmem:[#allocation12_spill] sm:$0xff] }
0x10ca   :  { %9382 = vmatprep.mubr.msk.f32.mxu0 %vm609_vm1, %v3749_v23  ;;  %v13791_v23 = vld [vmem:[#allocation13_spill] sm:$0xff] }
0x10cb   :  { %9383 = vmatmul.mubr.msk.f32.vlgmr.msra.gmra.mxu0 %vm609_vm1, %v3750_v29  ;;  %v13792_v29 = vld [vmem:[#allocation14_spill] sm:$0xff] }
0x10cc   :  { %9398 = vmatprep.mubr.msk.f32.mxu0 %vm1697_vm10, %v13758_v5  ;;  %9397 = vmatpush3.msk.msra.mxu0 %vm1704_vm9, %v13753_v15 }
0x10cf   :  { %9399 = vmatmul.mubr.msk.f32.vlgmr.msra.gmra.mxu0 %vm1697_vm10, %v13759_v41 }
0x10d0   :  { %9433 = vmatprep.mubr.msk.f32.mxu0 %vm117_vm0, %v13760_v30 }
0x118b   :  { %v9384_v0 = vpop.f32.mrf.mxu0 }
0x118c   :  { %v3829_v14 = vadd.f32 %v9384_v0, %v13761_v3  ;;  %v13793_v0 = vld [vmem:[#allocation15_spill] sm:$0xff] }
0x118d   :  { %v3823_v26 = vpop.f32.mrf.mxu0 }
0x118e   :  { %v3824_v38 = vadd.f32 %v3823_v26, %v13762_v47  ;;  %v3833_v10 = vmax.f32 %v3829_v14, 0.0  ;;  %v13794_v14 = vld [vmem:[#allocation16_spill] sm:$0xff]  ;;  %v13795_v26 = vld [vmem:[#allocation31_spill] sm:$0xff] }
0x118f   :  { %v9400_v8 = vpop.f32.mrf.mxu0 }
0x1190   :  { %v3832_v55 = vmax.f32 %v3824_v38, 0.0  ;;  %v4000_v24 = vadd.f32 %v13763_v9, %v9400_v8  ;;  %v13796_v38 = vld [vmem:[#allocation32_spill] sm:$0xff]  ;;  %v13797_v8 = vld [vmem:[#allocation33_spill] sm:$0xff] }
0x1191   :  { %v3994_v27 = vpop.f32.mrf.mxu0 }
0x1192   :  { %v3995_v21 = vadd.f32 %v13763_v9, %v3994_v27  ;;  %4007 = vrot.lane.b32.xlu1 %v4000_v24, %s10247_s27  ;;  %9393 = vmatprep.mubr.msk.f32.mxu1 %vm609_vm1, %v3832_v55  ;;  %v13798_v55 = vld [vmem:[#allocation34_spill] sm:$0xff]  ;;  %v13801_v27 = vld [vmem:[#allocation37_spill] sm:$0xff] }
0x1193   :  { %9429 = vmatprep.subr.mxu0 %v4000_v24  ;;  %9394 = vmatmul.mubr.msk.f32.vlgmr.msra.gmra.mxu1 %vm609_vm1, %v3833_v10  ;;  %v13800_v10 = vld [vmem:[#allocation36_spill] sm:$0xff] }
0x1194   :  { %9430 = vmatpush3.msra.mxu0 %v4000_v24  ;;  %4005 = vrot.lane.b32.xlu0 %v3995_v21, %s10247_s27  ;;  %v13799_v24 = vld [vmem:[#allocation35_spill] sm:$0xff] }
0x1195   :  { %9431 = vmatprep.subr.mxu0 %v3995_v21  ;;  %9405 = vmatprep.mubr.msk.f32.mxu1 %vm117_vm0, %v13764_v22  ;;  %v13803_v22 = vld [vmem:[#allocation17_spill] sm:$0xff] }
0x1196   :  { %9432 = vmatpush3.msra.mxu0 %v3995_v21  ;;  %v13802_v21 = vld [vmem:[#allocation38_spill] sm:$0xff] }
0x1197   :  { %9434 = vmatmul.mubr.msk.f32.vlgmr.msra.gmra.mxu0 %vm117_vm0, %v13765_v42  ;;  %9492 = vmatprep.subr.mxu0 %v12020_v1 }
0x1198   :  { %9436 = vmatprep.mubr.msk.f32.mxu0 %vm117_vm0, %v13767_v46  ;;  %9493 = vmatpush3.msra.mxu0 %v12020_v1 }
0x1199   :  { %9494 = vmatprep.subr.mxu0 %v12029_v59 }
0x119a   :  { %9495 = vmatpush3.msra.mxu0 %v12029_v59 }
0x119b   :  { %9437 = vmatmul.mubr.msk.f32.gmra.mxu0 %vm117_vm0, %v13769_v61  ;;  %9496 = vmatprep.subr.mxu0 %v12038_v58 }
0x119c   :  { %9439 = vmatprep.mubr.msk.f32.mxu0 %vm117_vm0, %v13771_v40  ;;  %9497 = vmatpush3.msra.mxu0 %v12038_v58 }
0x119d   :  { %9498 = vmatprep.subr.mxu0 %v12047_v17 }
0x119e   :  { %9499 = vmatpush3.msra.mxu0 %v12047_v17 }
0x119f   :  { %9440 = vmatmul.mubr.msk.f32.gmra.mxu0 %vm117_vm0, %v13773_v56  ;;  %9500 = vmatprep.subr.mxu0 %v12056_v2 }
0x11a0   :  { %9442 = vmatprep.mubr.msk.f32.mxu0 %vm117_vm0, %v13775_v50  ;;  %9501 = vmatpush3.msra.mxu0 %v12056_v2 }
0x11a1   :  { %9502 = vmatprep.subr.mxu0 %v12065_v57 }
0x11a2   :  { %9503 = vmatpush3.msra.mxu0 %v12065_v57 }
0x11a3   :  { %9443 = vmatmul.mubr.msk.f32.gmra.mxu0 %vm117_vm0, %v13777_v31  ;;  %9504 = vmatprep.subr.mxu0 %v12074_v48 }
0x11a4   :  { %9445 = vmatprep.mubr.msk.f32.mxu0 %vm117_vm0, %v13779_v33  ;;  %9505 = vmatpush3.msra.mxu0 %v12074_v48 }
0x11a5   :  { %9506 = vmatprep.subr.mxu0 %v12083_v32 }
0x11a6   :  { %9507 = vmatpush3.msra.mxu0 %v12083_v32 }
0x11a7   :  { %9446 = vmatmul.mubr.msk.f32.gmra.mxu0 %vm117_vm0, %v13781_v12  ;;  %9522 = vmatprep.subr.mxu0 %v13754_v28 }
0x11a8   :  { %9448 = vmatprep.mubr.msk.f32.mxu0 %vm117_vm0, %v13782_v4 }
0x11ab   :  { %9449 = vmatmul.mubr.msk.f32.gmra.mxu0 %vm117_vm0, %v13783_v34 }
0x11ac   :  { %9451 = vmatprep.mubr.msk.f32.mxu0 %vm117_vm0, %v13784_v45 }
0x11af   :  { %9452 = vmatmul.mubr.msk.f32.gmra.mxu0 %vm117_vm0, %v13785_v37 }
0x11b0   :  { %9454 = vmatprep.mubr.msk.f32.mxu0 %vm117_vm0, %v13786_v60 }
0x11b3   :  { %9455 = vmatmul.mubr.msk.f32.gmra.mxu0 %vm117_vm0, %v13787_v51 }
0x1204   :  { %v4008_v6 = vpop.permute.xlu1 %4007 }
0x1205   :  { %9401 = vmatprep.subr.mxu1 %v4008_v6 }
0x1206   :  { %v4006_v28 = vpop.permute.xlu0 %4005  ;;  %9402 = vmatpush3.msra.mxu1 %v4008_v6 }
0x1207   :  { %9403 = vmatprep.subr.mxu1 %v4006_v28 }
0x1208   :  { %9404 = vmatpush3.msra.mxu1 %v4006_v28  ;;  %v13804_v28 = vld [vmem:[#allocation19_spill] sm:$0xff] }
0x1209   :  { %9406 = vmatmul.mubr.msk.f32.vlgmr.msra.gmra.mxu1 %vm117_vm0, %v13788_v53 }
0x120a   :  { %9408 = vmatprep.mubr.msk.f32.mxu1 %vm117_vm0, %v13789_v54 }
0x120d   :  { %9409 = vmatmul.mubr.msk.f32.gmra.mxu1 %vm117_vm0, %v13790_v19 }
0x120e   :  { %9411 = vmatprep.mubr.msk.f32.mxu1 %vm117_vm0, %v13791_v23 }
0x1211   :  { %9412 = vmatmul.mubr.msk.f32.gmra.mxu1 %vm117_vm0, %v13792_v29 }
0x1212   :  { %9414 = vmatprep.mubr.msk.f32.mxu1 %vm117_vm0, %v13793_v0 }
0x1215   :  { %9415 = vmatmul.mubr.msk.f32.gmra.mxu1 %vm117_vm0, %v13794_v14 }
0x1216   :  { %9417 = vmatprep.mubr.msk.f32.mxu1 %vm117_vm0, %v13795_v26 }
0x1219   :  { %9418 = vmatmul.mubr.msk.f32.gmra.mxu1 %vm117_vm0, %v13796_v38  ;;  %v13807_v38 = vld [vmem:[#allocation20_spill] sm:$0xff] }
0x121a   :  { %9420 = vmatprep.mubr.msk.f32.mxu1 %vm117_vm0, %v13797_v8  ;;  %v13805_v8 = vld [vmem:[#allocation18_spill] sm:$0xff] }
0x121d   :  { %9421 = vmatmul.mubr.msk.f32.gmra.mxu1 %vm117_vm0, %v13798_v55 }
0x121e   :  { %9423 = vmatprep.mubr.msk.f32.mxu1 %vm117_vm0, %v13799_v24 }
0x1221   :  { %9424 = vmatmul.mubr.msk.f32.gmra.mxu1 %vm117_vm0, %v13800_v10 }
0x1222   :  { %9426 = vmatprep.mubr.msk.f32.mxu1 %vm117_vm0, %v13801_v27 }
0x1225   :  { %9427 = vmatmul.mubr.msk.f32.gmra.mxu1 %vm117_vm0, %v13802_v21 }
0x1226   :  { %9489 = vmatprep.mubr.f32.mxu1 %v13803_v22 }
0x1253   :  { %v9395_v6 = vpop.f32.mrf.mxu1 }
0x1254   :  { %v3916_v5 = vadd.f32 %v9395_v6, %v13804_v28 }
0x1255   :  { %v3906_v41 = vpop.f32.mrf.mxu1 }
0x1256   :  { %v12135_v55 = vadd.f32 %v13805_v8, %v3916_v5  ;;  %v3915_v24 = vadd.f32 %v3906_v41, %v13807_v38 }
0x1257   :  { %v12151_v22 = vpop.f32.mrf.mxu0 }
0x1258   :  { %13806 = vst [vmem:[#allocation48_spill] sm:$0xff] %v12135_v55  ;;  %7825 = vst.msk [vmem:[%s13277_s18 + $0x18] sm:$0xff] %vm1697_vm10, %v12135_v55  ;;  %v12144_v27 = vadd.f32 %v13805_v8, %v3915_v24 }
0x1259   :  { %v12153_v5 = vpop.f32.mrf.mxu0 }
0x125a   :  { %13808 = vst [vmem:[#allocation51_spill] sm:$0xff] %v12144_v27  ;;  %7824 = vst.msk [vmem:[%s13277_s18 + $0x10] sm:$0xff] %vm1697_vm10, %v12144_v27 }
0x125b   :  { %v12155_v41 = vpop.f32.mrf.mxu0 }
0x125d   :  { %v12157_v38 = vpop.f32.mrf.mxu0 }
0x125f   :  { %v9441_v6 = vpop.f32.mrf.mxu0 }
0x1261   :  { %v12159_v28 = vpop.f32.mrf.mxu0 }
0x1263   :  { %v9444_v21 = vpop.f32.mrf.mxu0 }
0x1265   :  { %v4252_v8 = vpop.f32.mrf.mxu0 }
0x1267   :  { %v9447_v26 = vpop.f32.mrf.mxu0 }
0x1269   :  { %v4262_v29 = vpop.f32.mrf.mxu0 }
0x126b   :  { %v9450_v54 = vpop.f32.mrf.mxu0 }
0x126d   :  { %v4272_v60 = vpop.f32.mrf.mxu0 }
0x126f   :  { %v9453_v34 = vpop.f32.mrf.mxu0 }
0x1271   :  { %v4282_v32 = vpop.f32.mrf.mxu0 }
0x1273   :  { %v9456_v31 = vpop.f32.mrf.mxu0 }
0x1275   :  { %v4292_v17 = vpop.f32.mrf.mxu0 }
0x12c9   :  { %v12161_v24 = vpop.f32.mrf.mxu1 }
0x12cb   :  { %v12163_v10 = vpop.f32.mrf.mxu1 }
0x12cd   :  { %v12165_v14 = vpop.f32.mrf.mxu1 }
0x12cf   :  { %v12167_v0 = vpop.f32.mrf.mxu1 }
0x12d1   :  { %v9413_v23 = vpop.f32.mrf.mxu1 }
0x12d3   :  { %v4097_v19 = vpop.f32.mrf.mxu1 }
0x12d5   :  { %v9416_v53 = vpop.f32.mrf.mxu1 }
0x12d7   :  { %v4107_v51 = vpop.f32.mrf.mxu1 }
0x12d9   :  { %v9419_v37 = vpop.f32.mrf.mxu1 }
0x12da   :  { %v4268_v30 = vadd.f32 %v9447_v26, %v9419_v37  ;;  %v12197_v26 = vld [vmem:[%s13263_s7 + $0x8] sm:$0xff] }
0x12db   :  { %v4117_v45 = vpop.f32.mrf.mxu1 }
0x12dd   :  { %v9422_v4 = vpop.f32.mrf.mxu1 }
0x12de   :  { %v4278_v59 = vadd.f32 %v9450_v54, %v9422_v4 }
0x12df   :  { %v4127_v12 = vpop.f32.mrf.mxu1 }
0x12e0   :  { %v4273_v9 = vadd.f32 %v4272_v60, %v4127_v12  ;;  %v4312_v55 = vmax.f32 %v4278_v59, 0.0  ;;  %v4223_v60 = vadd.f32 %v12153_v5, %v12163_v10  ;;  %v12210_v10 = vld [vmem:[%s13273_s13 + $0x10] sm:$0xff] }
0x12e1   :  { %v9425_v33 = vpop.f32.mrf.mxu1  ;;  %13809 = vst [vmem:[#allocation17_spill] sm:$0xff] %v12210_v10 }
0x12e2   :  { %v4288_v50 = vadd.f32 %v9453_v34, %v9425_v33  ;;  %v4228_v34 = vadd.f32 %v12151_v22, %v12161_v24  ;;  %v12224_v22 = vld [vmem:[%s13273_s13] sm:$0xff] }
0x12e3   :  { %v4137_v48 = vpop.f32.mrf.mxu1  ;;  %13811 = vst [vmem:[#allocation18_spill] sm:$0xff] %v12224_v22 }
0x12e4   :  { %v4283_v40 = vadd.f32 %v4282_v32, %v4137_v48  ;;  %v4314_v46 = vmax.f32 %v4288_v50, 0.0  ;;  %v4238_v50 = vadd.f32 %v12155_v41, %v12165_v14  ;;  %v4233_v32 = vadd.f32 %v12157_v38, %v12167_v0  ;;  %v12235_v38 = vld [vmem:[%s13274_s16 + $0x18] sm:$0xff] }
0x12e5   :  { %v9428_v57 = vpop.f32.mrf.mxu1  ;;  %v4302_v54 = vmax.f32 %v4228_v34, 0.0  ;;  %13812 = vst [vmem:[#allocation20_spill] sm:$0xff] %v12235_v38  ;;  %v13826_v34 = vld [vmem:[#allocation26_spill] sm:$0xff] }
0x12e6   :  { %v4298_v2 = vadd.f32 %v9456_v31, %v9428_v57  ;;  %v4313_v47 = vmax.f32 %v4283_v40, 0.0  ;;  %v4330_v57 = vmul.f32 %v4314_v46, %v11236_v16  ;;  %v4263_v31 = vadd.f32 %v4262_v29, %v4117_v45 }
0x12e7   :  { %v4147_v56 = vpop.f32.mrf.mxu1  ;;  %v4328_v40 = vmul.f32 %v4312_v55, %v11247_v13  ;;  %v4248_v46 = vadd.f32 %v9441_v6, %v9413_v23  ;;  %v4304_v45 = vmax.f32 %v4238_v50, 0.0  ;;  %v4301_v23 = vmax.f32 %v4223_v60, 0.0  ;;  %v12203_v55 = vld [vmem:[%s13273_s13 + $0x18] sm:$0xff]  ;;  %v12241_v6 = vld [vmem:[%s13274_s16 + $0x10] sm:$0xff]  ;;  %v13829_v60 = vld [vmem:[#allocation42_spill] sm:$0xff] }
0x12e8   :  { %v4316_v58 = vmax.f32 %v4298_v2, 0.0  ;;  %v4293_v61 = vadd.f32 %v4292_v17, %v4147_v56  ;;  %v4311_v2 = vmax.f32 %v4273_v9, 0.0  ;;  %v4329_v17 = vmul.f32 %v4313_v47, %v11243_v62  ;;  %13813 = vst [vmem:[#allocation52_spill] sm:$0xff] %v12241_v6 }
0x12e9   :  { %v4243_v47 = vadd.f32 %v12159_v28, %v4097_v19  ;;  %v4306_v48 = vmax.f32 %v4248_v46, 0.0  ;;  %v4320_v19 = vmul.f32 %v4304_v45, %v11293_v11  ;;  %v4318_v0 = vmul.f32 %v4302_v54, %v11303_v36  ;;  %v12248_v28 = vld [vmem:[%s13274_s16 + $0x8] sm:$0xff]  ;;  %v13827_v45 = vld [vmem:[#allocation41_spill] sm:$0xff] }
0x12ea   :  { %v4332_v1 = vmul.f32 %v4316_v58, %v13690_v39  ;;  %v4315_v42 = vmax.f32 %v4293_v61, 0.0  ;;  %v4258_v58 = vadd.f32 %v9444_v21, %v9416_v53  ;;  %v4310_v61 = vmax.f32 %v4268_v30, 0.0  ;;  %v12217_v21 = vld [vmem:[%s13273_s13 + $0x8] sm:$0xff]  ;;  %13814 = vst [vmem:[#allocation53_spill] sm:$0xff] %v12248_v28  ;;  %v13832_v54 = vld [vmem:[#allocation29_spill] sm:$0xff] }
0x12eb   :  { %v4327_v59 = vmul.f32 %v4311_v2, %v11251_v52  ;;  %v4305_v12 = vmax.f32 %v4243_v47, 0.0  ;;  %v4322_v37 = vmul.f32 %v4306_v48, %v11281_v25  ;;  %v4317_v14 = vmul.f32 %v4301_v23, %v11309_v20  ;;  %13810 = vst [vmem:[#allocation19_spill] sm:$0xff] %v12217_v21  ;;  %v13820_v47 = vld [vmem:[#allocation23_spill] sm:$0xff]  ;;  %v12280_v48 = vld [vmem:[%s13262_s5] sm:$0xff] }
0x12ec   :  { %v4331_v3 = vmul.f32 %v4315_v42, %v11239_v44  ;;  %9457 = vmatprep.subr.mxu1 %v4332_v1  ;;  %v4253_v42 = vadd.f32 %v4252_v8, %v4107_v51  ;;  %v4326_v9 = vmul.f32 %v4310_v61, %v11256_v63  ;;  %v4303_v51 = vmax.f32 %v4233_v32, 0.0  ;;  %v12255_v8 = vld [vmem:[%s13274_s16] sm:$0xff]  ;;  %v13823_v32 = vld [vmem:[#allocation43_spill] sm:$0xff] }
0x12ed   :  { %9458 = vmatpush3.msra.mxu1 %v4332_v1  ;;  %v4309_v1 = vmax.f32 %v4263_v31, 0.0  ;;  %v4321_v53 = vmul.f32 %v4305_v12, %v11287_v43  ;;  %13815 = vst [vmem:[#allocation54_spill] sm:$0xff] %v12255_v8  ;;  %v13824_v12 = vld [vmem:[#allocation25_spill] sm:$0xff]  ;;  %v13834_v23 = vld [vmem:[#allocation30_spill] sm:$0xff] }
0x12ee   :  { %9459 = vmatprep.subr.mxu1 %v4331_v3  ;;  %v4307_v56 = vmax.f32 %v4253_v42, 0.0  ;;  %v4319_v29 = vmul.f32 %v4303_v51, %v11297_v7  ;;  %v13830_v51 = vld [vmem:[#allocation28_spill] sm:$0xff] }
0x12ef   :  { %9460 = vmatpush3.msra.mxu1 %v4331_v3  ;;  %v4308_v3 = vmax.f32 %v4258_v58, 0.0  ;;  %v4325_v30 = vmul.f32 %v4309_v1, %v11263_v18  ;;  %v13817_v58 = vld [vmem:[#allocation22_spill] sm:$0xff] }
0x12f0   :  { %9461 = vmatprep.subr.mxu1 %v4330_v57  ;;  %v4323_v4 = vmul.f32 %v4307_v56, %v11275_v35  ;;  %13821 = vst [vmem:[#allocation22_spill] sm:$0xff] %v12280_v48 }
0x12f1   :  { %9462 = vmatpush3.msra.mxu1 %v4330_v57  ;;  %v4324_v33 = vmul.f32 %v4308_v3, %v11269_v49 }
0x12f2   :  { %9463 = vmatprep.subr.mxu1 %v4329_v17 }
0x12f3   :  { %9464 = vmatpush3.msra.mxu1 %v4329_v17  ;;  %v13816_v17 = vld [vmem:[#allocation48_spill] sm:$0xff] }
0x12f4   :  { %9465 = vmatprep.subr.mxu1 %v4328_v40 }
0x12f5   :  { %9466 = vmatpush3.msra.mxu1 %v4328_v40  ;;  %v13818_v40 = vld [vmem:[#allocation49_spill] sm:$0xff] }
0x12f6   :  { %9467 = vmatprep.subr.mxu1 %v4327_v59 }
0x12f7   :  { %9468 = vmatpush3.msra.mxu1 %v4327_v59  ;;  %v13819_v59 = vld [vmem:[#allocation50_spill] sm:$0xff] }
0x12f8   :  { %9469 = vmatprep.subr.mxu1 %v4326_v9 }
0x12f9   :  { %9470 = vmatpush3.msra.mxu1 %v4326_v9 }
0x12fa   :  { %9471 = vmatprep.subr.mxu1 %v4325_v30 }
0x12fb   :  { %9472 = vmatpush3.msra.mxu1 %v4325_v30 }
0x12fc   :  { %9473 = vmatprep.subr.mxu1 %v4324_v33 }
0x12fd   :  { %9474 = vmatpush3.msra.mxu1 %v4324_v33  ;;  %v13822_v33 = vld [vmem:[#allocation24_spill] sm:$0xff] }
0x12fe   :  { %9475 = vmatprep.subr.mxu1 %v4323_v4 }
0x12ff   :  { %9476 = vmatpush3.msra.mxu1 %v4323_v4  ;;  %v13825_v4 = vld [vmem:[#allocation40_spill] sm:$0xff] }
0x1300   :  { %9477 = vmatprep.subr.mxu1 %v4322_v37 }
0x1301   :  { %9478 = vmatpush3.msra.mxu1 %v4322_v37  ;;  %v13828_v37 = vld [vmem:[#allocation27_spill] sm:$0xff] }
0x1302   :  { %9479 = vmatprep.subr.mxu1 %v4321_v53 }
0x1303   :  { %9480 = vmatpush3.msra.mxu1 %v4321_v53  ;;  %v13831_v53 = vld [vmem:[#allocation21_spill] sm:$0xff] }
0x1304   :  { %9481 = vmatprep.subr.mxu1 %v4320_v19 }
0x1305   :  { %9482 = vmatpush3.msra.mxu1 %v4320_v19  ;;  %v13833_v19 = vld [vmem:[#allocation45_spill] sm:$0xff] }
0x1306   :  { %9483 = vmatprep.subr.mxu1 %v4319_v29 }
0x1307   :  { %9484 = vmatpush3.msra.mxu1 %v4319_v29  ;;  %v13835_v29 = vld [vmem:[#allocation46_spill] sm:$0xff] }
0x1308   :  { %9485 = vmatprep.subr.mxu1 %v4318_v0 }
0x1309   :  { %9486 = vmatpush3.msra.mxu1 %v4318_v0  ;;  %v13836_v0 = vld [vmem:[#allocation2_spill] sm:$0xff] }
0x130a   :  { %9487 = vmatprep.subr.mxu1 %v4317_v14 }
0x130b   :  { %9488 = vmatpush3.msra.mxu1 %v4317_v14  ;;  %v13837_v14 = vld [vmem:[#allocation47_spill] sm:$0xff] }
0x130c   :  { %9490 = vmatmul.mubr.f32.vlgmr.msra.gmra.mxu1 %v12197_v26  ;;  %9511 = vmatprep.subr.mxu1 %v12203_v55 }
0x130d   :  { %9512 = vmatpush3.msra.mxu1 %v12203_v55 }
0x130e   :  { %9513 = vmatprep.subr.mxu1 %v12210_v10 }
0x130f   :  { %9514 = vmatpush3.msra.mxu1 %v12210_v10 }
0x1310   :  { %9515 = vmatprep.subr.mxu1 %v12217_v21 }
0x1311   :  { %9516 = vmatpush3.msra.mxu1 %v12217_v21 }
0x1312   :  { %9517 = vmatprep.subr.mxu1 %v12224_v22 }
0x1313   :  { %9518 = vmatpush3.msra.mxu1 %v12224_v22 }
0x1314   :  { %9533 = vmatprep.subr.msk.mxu1 %vm1704_vm9, %v13753_v15 }
0x13cc   :  { %v9491_v5 = vpop.f32.mrf.mxu1 }
0x13ce   :  { %v4399_v41 = vpop.f32.mrf.mxu1 }
0x13cf   :  { %9508 = vmatprep.mubr.msk.f32.mxu0 %vm2188_vm15, %v4399_v41  ;;  %v13839_v41 = vld [vmem:[#allocation4_spill] sm:$0xff] }
0x13d0   :  { %9509 = vmatmul.mubr.msk.f32.vlgmr.msra.gmra.mxu0 %vm2188_vm15, %v9491_v5  ;;  %v13838_v5 = vld [vmem:[#allocation3_spill] sm:$0xff] }
0x13d1   :  { %9523 = vmatpush3.msra.mxu0 %v12235_v38 }
0x13d2   :  { %9524 = vmatprep.subr.mxu0 %v12241_v6 }
0x13d3   :  { %9525 = vmatpush3.msra.mxu0 %v12241_v6 }
0x13d4   :  { %9526 = vmatprep.subr.mxu0 %v12248_v28 }
0x13d5   :  { %9527 = vmatpush3.msra.mxu0 %v12248_v28 }
0x13d6   :  { %9528 = vmatprep.subr.mxu0 %v12255_v8 }
0x13d7   :  { %9529 = vmatpush3.msra.mxu0 %v12255_v8 }
0x1490   :  { %v9510_v24 = vpop.f32.mrf.mxu0 }
0x1491   :  { %v4490_v2 = vmax.f32 %v9510_v24, 0.0  ;;  %v13840_v24 = vld [vmem:[#allocation5_spill] sm:$0xff] }
0x1492   :  { %v4480_v57 = vpop.f32.mrf.mxu0 }
0x1493   :  { %v4489_v31 = vmax.f32 %v4480_v57, 0.0  ;;  %v13841_v57 = vld [vmem:[#allocation6_spill] sm:$0xff] }
0x1495   :  { %9519 = vmatprep.mubr.msk.f32.mxu1 %vm609_vm1, %v4489_v31  ;;  %v13842_v31 = vld [vmem:[#allocation7_spill] sm:$0xff] }
0x1496   :  { %9520 = vmatmul.mubr.msk.f32.vlgmr.msra.gmra.mxu1 %vm609_vm1, %v4490_v2  ;;  %v13843_v2 = vld [vmem:[#allocation8_spill] sm:$0xff] }
0x1497   :  { %9535 = vmatprep.mubr.msk.f32.mxu1 %vm1697_vm10, %v12144_v27  ;;  %9534 = vmatpush3.msk.msra.mxu1 %vm1704_vm9, %v13753_v15 }
0x149a   :  { %9536 = vmatmul.mubr.msk.f32.vlgmr.msra.gmra.mxu1 %vm1697_vm10, %v13816_v17 }
0x149b   :  { %9570 = vmatprep.mubr.msk.f32.mxu1 %vm117_vm0, %v13817_v58  ;;  %v13844_v58 = vld [vmem:[#allocation9_spill] sm:$0xff] }
0x1556   :  { %v9521_v61 = vpop.f32.mrf.mxu1 }
0x1557   :  { %v4569_v42 = vadd.f32 %v9521_v61, %v13818_v40 }
0x1558   :  { %v4563_v1 = vpop.f32.mrf.mxu1 }
0x1559   :  { %v4564_v46 = vadd.f32 %v4563_v1, %v13819_v59  ;;  %v4573_v30 = vmax.f32 %v4569_v42, 0.0  ;;  %v13845_v1 = vld [vmem:[#allocation10_spill] sm:$0xff] }
0x155a   :  { %v9537_v3 = vpop.f32.mrf.mxu1 }
0x155b   :  { %v4572_v9 = vmax.f32 %v4564_v46, 0.0  ;;  %v4740_v56 = vadd.f32 %v13820_v47, %v9537_v3  ;;  %v13846_v46 = vld [vmem:[#allocation11_spill] sm:$0xff]  ;;  %v13847_v3 = vld [vmem:[#allocation12_spill] sm:$0xff] }
0x155c   :  { %v4734_v50 = vpop.f32.mrf.mxu1 }
0x155d   :  { %v4735_v15 = vadd.f32 %v13820_v47, %v4734_v50  ;;  %9530 = vmatprep.mubr.msk.f32.mxu0 %vm609_vm1, %v4572_v9  ;;  %4747 = vrot.lane.b32.xlu1 %v4740_v56, %s10247_s27  ;;  %v13848_v9 = vld [vmem:[#allocation13_spill] sm:$0xff]  ;;  %v13849_v47 = vld [vmem:[#allocation14_spill] sm:$0xff]  ;;  %v13852_v50 = vld [vmem:[#allocation31_spill] sm:$0xff] }
0x155e   :  { %9566 = vmatprep.subr.mxu1 %v4740_v56  ;;  %9531 = vmatmul.mubr.msk.f32.vlgmr.msra.gmra.mxu0 %vm609_vm1, %v4573_v30  ;;  %v13851_v30 = vld [vmem:[#allocation16_spill] sm:$0xff] }
0x155f   :  { %9567 = vmatpush3.msra.mxu1 %v4740_v56  ;;  %4745 = vrot.lane.b32.xlu0 %v4735_v15, %s10247_s27  ;;  %v13850_v56 = vld [vmem:[#allocation15_spill] sm:$0xff] }
0x1560   :  { %9568 = vmatprep.subr.mxu1 %v4735_v15  ;;  %9542 = vmatprep.mubr.msk.f32.mxu0 %vm117_vm0, %v12280_v48 }
0x1561   :  { %9569 = vmatpush3.msra.mxu1 %v4735_v15  ;;  %v13853_v15 = vld [vmem:[#allocation32_spill] sm:$0xff] }
0x1562   :  { %9571 = vmatmul.mubr.msk.f32.vlgmr.msra.gmra.mxu1 %vm117_vm0, %v13822_v33  ;;  %9629 = vmatprep.subr.mxu1 %v13823_v32  ;;  %v13854_v33 = vld [vmem:[#allocation33_spill] sm:$0xff] }
0x1563   :  { %9573 = vmatprep.mubr.msk.f32.mxu1 %vm117_vm0, %v13824_v12  ;;  %9630 = vmatpush3.msra.mxu1 %v13823_v32  ;;  %v13855_v12 = vld [vmem:[#allocation34_spill] sm:$0xff] }
0x1564   :  { %9631 = vmatprep.subr.mxu1 %v13825_v4 }
0x1565   :  { %9632 = vmatpush3.msra.mxu1 %v13825_v4 }
0x1566   :  { %9574 = vmatmul.mubr.msk.f32.gmra.mxu1 %vm117_vm0, %v13826_v34  ;;  %9633 = vmatprep.subr.mxu1 %v13827_v45  ;;  %v13856_v34 = vld [vmem:[#allocation35_spill] sm:$0xff] }
0x1567   :  { %9576 = vmatprep.mubr.msk.f32.mxu1 %vm117_vm0, %v13828_v37  ;;  %9634 = vmatpush3.msra.mxu1 %v13827_v45  ;;  %v13857_v37 = vld [vmem:[#allocation36_spill] sm:$0xff] }
0x1568   :  { %9635 = vmatprep.subr.mxu1 %v13829_v60 }
0x1569   :  { %9636 = vmatpush3.msra.mxu1 %v13829_v60 }
0x156a   :  { %9577 = vmatmul.mubr.msk.f32.gmra.mxu1 %vm117_vm0, %v13830_v51  ;;  %9637 = vmatprep.subr.mxu1 %v13831_v53  ;;  %v13858_v51 = vld [vmem:[#allocation37_spill] sm:$0xff] }
0x156b   :  { %9579 = vmatprep.mubr.msk.f32.mxu1 %vm117_vm0, %v13832_v54  ;;  %9638 = vmatpush3.msra.mxu1 %v13831_v53  ;;  %v13859_v54 = vld [vmem:[#allocation38_spill] sm:$0xff] }
0x156c   :  { %9639 = vmatprep.subr.mxu1 %v13833_v19 }
0x156d   :  { %9640 = vmatpush3.msra.mxu1 %v13833_v19 }
0x156e   :  { %9580 = vmatmul.mubr.msk.f32.gmra.mxu1 %vm117_vm0, %v13834_v23  ;;  %9641 = vmatprep.subr.mxu1 %v13835_v29  ;;  %v12364_v23 = vld [vmem:[%s13263_s7] sm:$0xff] }
0x156f   :  { %9582 = vmatprep.mubr.msk.f32.mxu1 %vm117_vm0, %v13836_v0  ;;  %9642 = vmatpush3.msra.mxu1 %v13835_v29  ;;  %13860 = vst [vmem:[#allocation23_spill] sm:$0xff] %v12364_v23 }
0x1570   :  { %9643 = vmatprep.subr.mxu1 %v13837_v14 }
0x1571   :  { %9644 = vmatpush3.msra.mxu1 %v13837_v14 }
0x1572   :  { %9583 = vmatmul.mubr.msk.f32.gmra.mxu1 %vm117_vm0, %v13838_v5  ;;  %9659 = vmatprep.subr.mxu1 %v12235_v38  ;;  %v13861_v5 = vld [vmem:[#allocation39_spill] sm:$0xff] }
0x1573   :  { %9585 = vmatprep.mubr.msk.f32.mxu1 %vm117_vm0, %v13839_v41 }
0x1576   :  { %9586 = vmatmul.mubr.msk.f32.gmra.mxu1 %vm117_vm0, %v13840_v24 }
0x1577   :  { %9588 = vmatprep.mubr.msk.f32.mxu1 %vm117_vm0, %v13841_v57  ;;  %v12371_v57 = vld [vmem:[%s13276_s17] ss:$0 sm:$0xff] }
0x1578   :  { %13862 = vst [vmem:[#allocation24_spill] sm:$0xff] %v12371_v57 }
0x157a   :  { %9589 = vmatmul.mubr.msk.f32.gmra.mxu1 %vm117_vm0, %v13842_v31 }
0x157b   :  { %9591 = vmatprep.mubr.msk.f32.mxu1 %vm117_vm0, %v13843_v2  ;;  %v13864_v2 = vld [vmem:[#allocation44_spill] sm:$0xff] }
0x157e   :  { %9592 = vmatmul.mubr.msk.f32.gmra.mxu1 %vm117_vm0, %v13844_v58 }
0x15cf   :  { %v4748_v61 = vpop.permute.xlu1 %4747 }
0x15d0   :  { %9538 = vmatprep.subr.mxu0 %v4748_v61 }
0x15d1   :  { %9539 = vmatpush3.msra.mxu0 %v4748_v61  ;;  %v4746_v42 = vpop.permute.xlu0 %4745 }
0x15d2   :  { %9540 = vmatprep.subr.mxu0 %v4746_v42 }
0x15d3   :  { %9541 = vmatpush3.msra.mxu0 %v4746_v42 }
0x15d4   :  { %9543 = vmatmul.mubr.msk.f32.vlgmr.msra.gmra.mxu0 %vm117_vm0, %v13845_v1 }
0x15d5   :  { %9545 = vmatprep.mubr.msk.f32.mxu0 %vm117_vm0, %v13846_v46 }
0x15d8   :  { %9546 = vmatmul.mubr.msk.f32.gmra.mxu0 %vm117_vm0, %v13847_v3 }
0x15d9   :  { %9548 = vmatprep.mubr.msk.f32.mxu0 %vm117_vm0, %v13848_v9 }
0x15dc   :  { %9549 = vmatmul.mubr.msk.f32.gmra.mxu0 %vm117_vm0, %v13849_v47 }
0x15dd   :  { %9551 = vmatprep.mubr.msk.f32.mxu0 %vm117_vm0, %v13850_v56 }
0x15e0   :  { %9552 = vmatmul.mubr.msk.f32.gmra.mxu0 %vm117_vm0, %v13851_v30 }
0x15e1   :  { %9554 = vmatprep.mubr.msk.f32.mxu0 %vm117_vm0, %v13852_v50 }
0x15e4   :  { %9555 = vmatmul.mubr.msk.f32.gmra.mxu0 %vm117_vm0, %v13853_v15 }
0x15e5   :  { %9557 = vmatprep.mubr.msk.f32.mxu0 %vm117_vm0, %v13854_v33 }
0x15e8   :  { %9558 = vmatmul.mubr.msk.f32.gmra.mxu0 %vm117_vm0, %v13855_v12 }
0x15e9   :  { %9560 = vmatprep.mubr.msk.f32.mxu0 %vm117_vm0, %v13856_v34 }
0x15ec   :  { %9561 = vmatmul.mubr.msk.f32.gmra.mxu0 %vm117_vm0, %v13857_v37 }
0x15ed   :  { %9563 = vmatprep.mubr.msk.f32.mxu0 %vm117_vm0, %v13858_v51 }
0x15f0   :  { %9564 = vmatmul.mubr.msk.f32.gmra.mxu0 %vm117_vm0, %v13859_v54 }
0x15f1   :  { %9626 = vmatprep.mubr.f32.mxu0 %v12364_v23 }
0x161e   :  { %v9532_v0 = vpop.f32.mrf.mxu0 }
0x161f   :  { %v4656_v41 = vadd.f32 %v9532_v0, %v13861_v5 }
0x1620   :  { %v4646_v24 = vpop.f32.mrf.mxu0 }
0x1621   :  { %v12374_v31 = vadd.f32 %v12371_v57, %v4656_v41  ;;  %v4655_v58 = vadd.f32 %v4646_v24, %v13864_v2 }
0x1622   :  { %v12390_v42 = vpop.f32.mrf.mxu1 }
0x1623   :  { %13863 = vst [vmem:[#allocation25_spill] sm:$0xff] %v12374_v31  ;;  %7868 = vst.msk [vmem:[%s13277_s18 + $0x58] sm:$0xff] %vm1697_vm10, %v12374_v31  ;;  %v12383_v61 = vadd.f32 %v12371_v57, %v4655_v58 }
0x1624   :  { %v12392_v1 = vpop.f32.mrf.mxu1 }
0x1625   :  { %13865 = vst [vmem:[#allocation26_spill] sm:$0xff] %v12383_v61  ;;  %7867 = vst.msk [vmem:[%s13277_s18 + $0x50] sm:$0xff] %vm1697_vm10, %v12383_v61 }
0x1626   :  { %v12394_v46 = vpop.f32.mrf.mxu1 }
0x1628   :  { %v12396_v3 = vpop.f32.mrf.mxu1 }
0x162a   :  { %v9578_v9 = vpop.f32.mrf.mxu1 }
0x162c   :  { %v12398_v47 = vpop.f32.mrf.mxu1 }
0x162e   :  { %v9581_v56 = vpop.f32.mrf.mxu1 }
0x1630   :  { %v4992_v30 = vpop.f32.mrf.mxu1 }
0x1632   :  { %v9584_v33 = vpop.f32.mrf.mxu1 }
0x1634   :  { %v5002_v37 = vpop.f32.mrf.mxu1 }
0x1636   :  { %v9587_v0 = vpop.f32.mrf.mxu1 }
0x1638   :  { %v5012_v24 = vpop.f32.mrf.mxu1 }
0x163a   :  { %v9590_v27 = vpop.f32.mrf.mxu1 }
0x163c   :  { %v5022_v23 = vpop.f32.mrf.mxu1 }
0x163e   :  { %v9593_v19 = vpop.f32.mrf.mxu1 }
0x1640   :  { %v5032_v32 = vpop.f32.mrf.mxu1 }
0x1694   :  { %v12400_v50 = vpop.f32.mrf.mxu0 }
0x1696   :  { %v12402_v15 = vpop.f32.mrf.mxu0 }
0x1698   :  { %v12404_v12 = vpop.f32.mrf.mxu0 }
0x169a   :  { %v12406_v34 = vpop.f32.mrf.mxu0 }
0x169c   :  { %v9550_v51 = vpop.f32.mrf.mxu0 }
0x169e   :  { %v4837_v54 = vpop.f32.mrf.mxu0 }
0x16a0   :  { %v9553_v5 = vpop.f32.mrf.mxu0 }
0x16a2   :  { %v4847_v41 = vpop.f32.mrf.mxu0 }
0x16a4   :  { %v9556_v2 = vpop.f32.mrf.mxu0 }
0x16a5   :  { %v5008_v21 = vadd.f32 %v9584_v33, %v9556_v2 }
0x16a6   :  { %v4857_v58 = vpop.f32.mrf.mxu0 }
0x16a8   :  { %v9559_v57 = vpop.f32.mrf.mxu0 }
0x16a9   :  { %v5018_v31 = vadd.f32 %v9587_v0, %v9559_v57  ;;  %v13870_v0 = vld [vmem:[#allocation20_spill] sm:$0xff] }
0x16aa   :  { %v4867_v17 = vpop.f32.mrf.mxu0 }
0x16ab   :  { %v5013_v6 = vadd.f32 %v5012_v24, %v4867_v17  ;;  %v5052_v10 = vmax.f32 %v5018_v31, 0.0  ;;  %v4968_v31 = vadd.f32 %v12390_v42, %v12400_v50  ;;  %v13873_v24 = vld [vmem:[#allocation54_spill] sm:$0xff] }
0x16ac   :  { %v9562_v14 = vpop.f32.mrf.mxu0 }
0x16ad   :  { %v5028_v60 = vadd.f32 %v9590_v27, %v9562_v14  ;;  %v5068_v17 = vmul.f32 %v5052_v10, %v11247_v13  ;;  %v4978_v10 = vadd.f32 %v12394_v46, %v12404_v12  ;;  %v4973_v14 = vadd.f32 %v12396_v3, %v12406_v34  ;;  %v13867_v12 = vld [vmem:[#allocation19_spill] sm:$0xff]  ;;  %v13868_v34 = vld [vmem:[#allocation18_spill] sm:$0xff] }
0x16ae   :  { %v4877_v29 = vpop.f32.mrf.mxu0  ;;  %v4963_v46 = vadd.f32 %v12392_v1, %v12402_v15  ;;  %v5042_v3 = vmax.f32 %v4968_v31, 0.0  ;;  %v13866_v15 = vld [vmem:[#allocation17_spill] sm:$0xff]  ;;  %v13884_v31 = vld [vmem:[#allocation40_spill] sm:$0xff] }
0x16af   :  { %v5023_v48 = vadd.f32 %v5022_v23, %v4877_v29  ;;  %v5054_v61 = vmax.f32 %v5028_v60, 0.0 }
0x16b0   :  { %v9565_v53 = vpop.f32.mrf.mxu0  ;;  %v5041_v33 = vmax.f32 %v4963_v46, 0.0  ;;  %v5058_v50 = vmul.f32 %v5042_v3, %v11303_v36  ;;  %v12517_v46 = vld [vmem:[%s13606_s24 + $0x20] sm:$0xff]  ;;  %v13890_v3 = vld [vmem:[#allocation21_spill] sm:$0xff] }
0x16b1   :  { %v5038_v45 = vadd.f32 %v9593_v19, %v9565_v53  ;;  %v5053_v38 = vmax.f32 %v5023_v48, 0.0  ;;  %v5070_v27 = vmul.f32 %v5054_v61, %v11236_v16  ;;  %v5003_v53 = vadd.f32 %v5002_v37, %v4857_v58  ;;  %v12445_v37 = vld [vmem:[%s13268_s10] sm:$0xf]  ;;  %13887 = vst [vmem:[#allocation4_spill] sm:$0xff] %v12517_v46 }
0x16b2   :  { %v4887_v4 = vpop.f32.mrf.mxu0  ;;  %v5044_v61 = vmax.f32 %v4978_v10, 0.0  ;;  %v5057_v1 = vmul.f32 %v5041_v33, %v11309_v20  ;;  %13869 = vst [vmem:[#allocation27_spill] sm:$0xff] %v12445_v37  ;;  %v13892_v33 = vld [vmem:[#allocation45_spill] sm:$0xff] }
0x16b3   :  { %v5056_v59 = vmax.f32 %v5038_v45, 0.0  ;;  %v5033_v40 = vadd.f32 %v5032_v32, %v4887_v4  ;;  %v5051_v45 = vmax.f32 %v5013_v6, 0.0  ;;  %v5069_v32 = vmul.f32 %v5053_v38, %v11243_v62 }
0x16b4   :  { %v4988_v4 = vadd.f32 %v9578_v9, %v9550_v51  ;;  %v4983_v38 = vadd.f32 %v12398_v47, %v4837_v54  ;;  %v5043_v47 = vmax.f32 %v4973_v14, 0.0  ;;  %v12491_v14 = vld [vmem:[%s13606_s24 + $0x8] sm:$0xff] }
0x16b5   :  { %v5072_v8 = vmul.f32 %v5056_v59, %v13690_v39  ;;  %v5055_v28 = vmax.f32 %v5033_v40, 0.0  ;;  %v4998_v59 = vadd.f32 %v9581_v56, %v9553_v5  ;;  %v5050_v40 = vmax.f32 %v5008_v21, 0.0  ;;  %v13871_v5 = vld [vmem:[#allocation52_spill] sm:$0xff]  ;;  %13881 = vst [vmem:[#allocation30_spill] sm:$0xff] %v12491_v14 }
0x16b6   :  { %v5067_v48 = vmul.f32 %v5051_v45, %v11251_v52  ;;  %v5046_v19 = vmax.f32 %v4988_v4, 0.0  ;;  %v5045_v23 = vmax.f32 %v4983_v38, 0.0  ;;  %v5059_v42 = vmul.f32 %v5043_v47, %v11297_v7  ;;  %v13874_v45 = vld [vmem:[#allocation26_spill] sm:$0xff] }
0x16b7   :  { %v5071_v22 = vmul.f32 %v5055_v28, %v11239_v44  ;;  %9594 = vmatprep.subr.mxu0 %v5072_v8  ;;  %v4993_v28 = vadd.f32 %v4992_v30, %v4847_v41  ;;  %v5066_v6 = vmul.f32 %v5050_v40, %v11256_v63  ;;  %v5060_v30 = vmul.f32 %v5044_v61, %v11293_v11  ;;  %v13872_v41 = vld [vmem:[#allocation53_spill] sm:$0xff]  ;;  %v12478_v38 = vld [vmem:[%s13271_s11] ss:$0 sm:$0xff] }
0x16b8   :  { %9595 = vmatpush3.msra.mxu0 %v5072_v8  ;;  %v5049_v8 = vmax.f32 %v5003_v53, 0.0  ;;  %v5062_v9 = vmul.f32 %v5046_v19, %v11281_v25  ;;  %v5061_v56 = vmul.f32 %v5045_v23, %v11287_v43  ;;  %13879 = vst [vmem:[#allocation29_spill] sm:$0xff] %v12478_v38  ;;  %v13882_v23 = vld [vmem:[#allocation43_spill] sm:$0xff]  ;;  %v12509_v61 = vld [vmem:[%s13606_s24 + $0x18] sm:$0xff]  ;;  %v13888_v47 = vld [vmem:[#allocation42_spill] sm:$0xff] }
0x16b9   :  { %9596 = vmatprep.subr.mxu0 %v5071_v22  ;;  %v5047_v60 = vmax.f32 %v4993_v28, 0.0  ;;  %13885 = vst [vmem:[#allocation3_spill] sm:$0xff] %v12509_v61 }
0x16ba   :  { %9597 = vmatpush3.msra.mxu0 %v5071_v22  ;;  %v5048_v22 = vmax.f32 %v4998_v59, 0.0  ;;  %v5065_v21 = vmul.f32 %v5049_v8, %v11263_v18  ;;  %v12469_v59 = vld [vmem:[%s13606_s24] sm:$0xff] }
0x16bb   :  { %9598 = vmatprep.subr.mxu0 %v5070_v27  ;;  %v5063_v57 = vmul.f32 %v5047_v60, %v11275_v35  ;;  %13876 = vst [vmem:[#allocation28_spill] sm:$0xff] %v12469_v59 }
0x16bc   :  { %9599 = vmatpush3.msra.mxu0 %v5070_v27  ;;  %v5064_v29 = vmul.f32 %v5048_v22, %v11269_v49 }
0x16bd   :  { %9600 = vmatprep.subr.mxu0 %v5069_v32 }
0x16be   :  { %9601 = vmatpush3.msra.mxu0 %v5069_v32  ;;  %v13875_v32 = vld [vmem:[#allocation25_spill] sm:$0xff] }
0x16bf   :  { %9602 = vmatprep.subr.mxu0 %v5068_v17 }
0x16c0   :  { %9603 = vmatpush3.msra.mxu0 %v5068_v17  ;;  %v13877_v17 = vld [vmem:[#allocation49_spill] sm:$0xff] }
0x16c1   :  { %9604 = vmatprep.subr.mxu0 %v5067_v48 }
0x16c2   :  { %9605 = vmatpush3.msra.mxu0 %v5067_v48  ;;  %v13878_v48 = vld [vmem:[#allocation50_spill] sm:$0xff] }
0x16c3   :  { %9606 = vmatprep.subr.mxu0 %v5066_v6 }
0x16c4   :  { %9607 = vmatpush3.msra.mxu0 %v5066_v6 }
0x16c5   :  { %9608 = vmatprep.subr.mxu0 %v5065_v21 }
0x16c6   :  { %9609 = vmatpush3.msra.mxu0 %v5065_v21 }
0x16c7   :  { %9610 = vmatprep.subr.mxu0 %v5064_v29 }
0x16c8   :  { %9611 = vmatpush3.msra.mxu0 %v5064_v29  ;;  %v13880_v29 = vld [vmem:[#allocation22_spill] sm:$0xff] }
0x16c9   :  { %9612 = vmatprep.subr.mxu0 %v5063_v57 }
0x16ca   :  { %9613 = vmatpush3.msra.mxu0 %v5063_v57  ;;  %v12499_v57 = vld [vmem:[%s13606_s24 + $0x10] sm:$0xff] }
0x16cb   :  { %9614 = vmatprep.subr.mxu0 %v5062_v9  ;;  %13883 = vst [vmem:[#allocation2_spill] sm:$0xff] %v12499_v57 }
0x16cc   :  { %9615 = vmatpush3.msra.mxu0 %v5062_v9  ;;  %v13886_v9 = vld [vmem:[#allocation41_spill] sm:$0xff] }
0x16cd   :  { %9616 = vmatprep.subr.mxu0 %v5061_v56 }
0x16ce   :  { %9617 = vmatpush3.msra.mxu0 %v5061_v56  ;;  %v12527_v56 = vld [vmem:[%s13606_s24 + $0x28] sm:$0xff] }
0x16cf   :  { %9618 = vmatprep.subr.mxu0 %v5060_v30  ;;  %13889 = vst [vmem:[#allocation5_spill] sm:$0xff] %v12527_v56 }
0x16d0   :  { %9619 = vmatpush3.msra.mxu0 %v5060_v30  ;;  %v12535_v30 = vld [vmem:[%s13606_s24 + $0x30] sm:$0xff] }
0x16d1   :  { %9620 = vmatprep.subr.mxu0 %v5059_v42  ;;  %13891 = vst [vmem:[#allocation6_spill] sm:$0xff] %v12535_v30 }
0x16d2   :  { %9621 = vmatpush3.msra.mxu0 %v5059_v42  ;;  %v12545_v42 = vld [vmem:[%s13606_s24 + $0x38] sm:$0xff] }
0x16d3   :  { %9622 = vmatprep.subr.mxu0 %v5058_v50  ;;  %13893 = vst [vmem:[#allocation7_spill] sm:$0xff] %v12545_v42 }
0x16d4   :  { %9623 = vmatpush3.msra.mxu0 %v5058_v50  ;;  %v13894_v50 = vld [vmem:[#allocation46_spill] sm:$0xff] }
0x16d5   :  { %9624 = vmatprep.subr.mxu0 %v5057_v1 }
0x16d6   :  { %9625 = vmatpush3.msra.mxu0 %v5057_v1  ;;  %v12553_v1 = vld [vmem:[%s13606_s24 + $0x40] sm:$0xff] }
0x16d7   :  { %9627 = vmatmul.mubr.f32.vlgmr.msra.gmra.mxu0 %v12197_v26  ;;  %9648 = vmatprep.subr.mxu0 %v12203_v55  ;;  %13895 = vst [vmem:[#allocation8_spill] sm:$0xff] %v12553_v1 }
0x16d8   :  { %9649 = vmatpush3.msra.mxu0 %v12203_v55 }
0x16d9   :  { %9650 = vmatprep.subr.mxu0 %v13866_v15 }
0x16da   :  { %9651 = vmatpush3.msra.mxu0 %v13866_v15 }
0x16db   :  { %9652 = vmatprep.subr.mxu0 %v13867_v12 }
0x16dc   :  { %9653 = vmatpush3.msra.mxu0 %v13867_v12 }
0x16dd   :  { %9654 = vmatprep.subr.mxu0 %v13868_v34 }
0x16de   :  { %9655 = vmatpush3.msra.mxu0 %v13868_v34 }
0x16df   :  { %9670 = vmatprep.subr.msk.mxu0 %vm1704_vm9, %v12445_v37 }
0x1797   :  { %v9628_v51 = vpop.f32.mrf.mxu0 }
0x1799   :  { %v5139_v54 = vpop.f32.mrf.mxu0 }
0x179a   :  { %9645 = vmatprep.mubr.msk.f32.mxu1 %vm2188_vm15, %v5139_v54  ;;  %v12563_v54 = vld [vmem:[%s13606_s24 + $0x48] sm:$0xff] }
0x179b   :  { %9646 = vmatmul.mubr.msk.f32.vlgmr.msra.gmra.mxu1 %vm2188_vm15, %v9628_v51  ;;  %v13896_v51 = vld [vmem:[#allocation47_spill] sm:$0xff]  ;;  %13897 = vst [vmem:[#allocation9_spill] sm:$0xff] %v12563_v54 }
0x179c   :  { %9660 = vmatpush3.msra.mxu1 %v13870_v0 }
0x179d   :  { %9661 = vmatprep.subr.mxu1 %v13871_v5 }
0x179e   :  { %9662 = vmatpush3.msra.mxu1 %v13871_v5 }
0x179f   :  { %9663 = vmatprep.subr.mxu1 %v13872_v41 }
0x17a0   :  { %9664 = vmatpush3.msra.mxu1 %v13872_v41 }
0x17a1   :  { %9665 = vmatprep.subr.mxu1 %v13873_v24 }
0x17a2   :  { %9666 = vmatpush3.msra.mxu1 %v13873_v24 }
0x185b   :  { %v9647_v2 = vpop.f32.mrf.mxu1 }
0x185c   :  { %v5230_v53 = vmax.f32 %v9647_v2, 0.0  ;;  %v12571_v2 = vld [vmem:[%s13606_s24 + $0x50] sm:$0xff] }
0x185d   :  { %v5220_v58 = vpop.f32.mrf.mxu1  ;;  %13898 = vst [vmem:[#allocation10_spill] sm:$0xff] %v12571_v2 }
0x185e   :  { %v5229_v27 = vmax.f32 %v5220_v58, 0.0  ;;  %v12578_v58 = vld [vmem:[%s13606_s24 + $0x58] sm:$0xff] }
0x185f   :  { %13899 = vst [vmem:[#allocation11_spill] sm:$0xff] %v12578_v58 }
0x1860   :  { %9656 = vmatprep.mubr.msk.f32.mxu0 %vm609_vm1, %v5229_v27  ;;  %v12585_v27 = vld [vmem:[%s13606_s24 + $0x60] sm:$0xff] }
0x1861   :  { %9657 = vmatmul.mubr.msk.f32.vlgmr.msra.gmra.mxu0 %vm609_vm1, %v5230_v53  ;;  %13900 = vst [vmem:[#allocation12_spill] sm:$0xff] %v12585_v27  ;;  %v12592_v53 = vld [vmem:[%s13606_s24 + $0x68] sm:$0xff] }
0x1862   :  { %9672 = vmatprep.mubr.msk.f32.mxu0 %vm1697_vm10, %v13874_v45  ;;  %9671 = vmatpush3.msk.msra.mxu0 %vm1704_vm9, %v12445_v37  ;;  %13901 = vst [vmem:[#allocation13_spill] sm:$0xff] %v12592_v53 }
0x1865   :  { %9673 = vmatmul.mubr.msk.f32.vlgmr.msra.gmra.mxu0 %vm1697_vm10, %v13875_v32  ;;  %v13920_v32 = vld [vmem:[#allocation48_spill] sm:$0xff] }
0x1866   :  { %9707 = vmatprep.mubr.msk.f32.mxu0 %vm117_vm0, %v12469_v59 }
0x1921   :  { %v9658_v40 = vpop.f32.mrf.mxu0 }
0x1922   :  { %v5309_v28 = vadd.f32 %v9658_v40, %v13877_v17  ;;  %v12599_v40 = vld [vmem:[%s13606_s24 + $0x70] sm:$0xff] }
0x1923   :  { %v5303_v8 = vpop.f32.mrf.mxu0  ;;  %13902 = vst [vmem:[#allocation14_spill] sm:$0xff] %v12599_v40 }
0x1924   :  { %v5304_v4 = vadd.f32 %v5303_v8, %v13878_v48  ;;  %v5313_v21 = vmax.f32 %v5309_v28, 0.0  ;;  %v12606_v28 = vld [vmem:[%s13606_s24 + $0x78] sm:$0xff] }
0x1925   :  { %v9674_v22 = vpop.f32.mrf.mxu0  ;;  %13903 = vst [vmem:[#allocation15_spill] sm:$0xff] %v12606_v28 }
0x1926   :  { %v5312_v6 = vmax.f32 %v5304_v4, 0.0  ;;  %v5480_v60 = vadd.f32 %v12478_v38, %v9674_v22  ;;  %v12613_v22 = vld [vmem:[%s13262_s5 + $0x8] sm:$0xff] }
0x1927   :  { %v5474_v10 = vpop.f32.mrf.mxu0  ;;  %13904 = vst [vmem:[#allocation16_spill] sm:$0xff] %v12613_v22 }
0x1928   :  { %v5475_v19 = vadd.f32 %v12478_v38, %v5474_v10  ;;  %5487 = vrot.lane.b32.xlu1 %v5480_v60, %s10247_s27  ;;  %9667 = vmatprep.mubr.msk.f32.mxu1 %vm609_vm1, %v5312_v6  ;;  %v12620_v6 = vld [vmem:[%s13262_s5 + $0x10] sm:$0xff]  ;;  %v12641_v10 = vld [vmem:[%s13262_s5 + $0x28] sm:$0xff] }
0x1929   :  { %9703 = vmatprep.subr.mxu0 %v5480_v60  ;;  %9668 = vmatmul.mubr.msk.f32.vlgmr.msra.gmra.mxu1 %vm609_vm1, %v5313_v21  ;;  %13905 = vst [vmem:[#allocation31_spill] sm:$0xff] %v12620_v6  ;;  %v12634_v21 = vld [vmem:[%s13262_s5 + $0x20] sm:$0xff]  ;;  %13908 = vst [vmem:[#allocation34_spill] sm:$0xff] %v12641_v10 }
0x192a   :  { %9704 = vmatpush3.msra.mxu0 %v5480_v60  ;;  %5485 = vrot.lane.b32.xlu0 %v5475_v19, %s10247_s27  ;;  %v12627_v60 = vld [vmem:[%s13262_s5 + $0x18] sm:$0xff]  ;;  %13907 = vst [vmem:[#allocation33_spill] sm:$0xff] %v12634_v21 }
0x192b   :  { %9705 = vmatprep.subr.mxu0 %v5475_v19  ;;  %9679 = vmatprep.mubr.msk.f32.mxu1 %vm117_vm0, %v13880_v29  ;;  %13906 = vst [vmem:[#allocation32_spill] sm:$0xff] %v12627_v60 }
0x192c   :  { %9706 = vmatpush3.msra.mxu0 %v5475_v19  ;;  %v12648_v19 = vld [vmem:[%s13262_s5 + $0x30] sm:$0xff] }
0x192d   :  { %9708 = vmatmul.mubr.msk.f32.vlgmr.msra.gmra.mxu0 %vm117_vm0, %v12491_v14  ;;  %9766 = vmatprep.subr.mxu0 %v13882_v23  ;;  %13909 = vst [vmem:[#allocation35_spill] sm:$0xff] %v12648_v19 }
0x192e   :  { %9710 = vmatprep.mubr.msk.f32.mxu0 %vm117_vm0, %v12499_v57  ;;  %9767 = vmatpush3.msra.mxu0 %v13882_v23  ;;  %v12655_v23 = vld [vmem:[%s13262_s5 + $0x38] sm:$0xff] }
0x192f   :  { %9768 = vmatprep.subr.mxu0 %v13884_v31  ;;  %13910 = vst [vmem:[#allocation36_spill] sm:$0xff] %v12655_v23 }
0x1930   :  { %9769 = vmatpush3.msra.mxu0 %v13884_v31  ;;  %v12662_v31 = vld [vmem:[%s13262_s5 + $0x40] sm:$0xff] }
0x1931   :  { %9711 = vmatmul.mubr.msk.f32.gmra.mxu0 %vm117_vm0, %v12509_v61  ;;  %9770 = vmatprep.subr.mxu0 %v13886_v9  ;;  %13911 = vst [vmem:[#allocation37_spill] sm:$0xff] %v12662_v31 }
0x1932   :  { %9713 = vmatprep.mubr.msk.f32.mxu0 %vm117_vm0, %v12517_v46  ;;  %9771 = vmatpush3.msra.mxu0 %v13886_v9  ;;  %v12669_v9 = vld [vmem:[%s13262_s5 + $0x48] sm:$0xff] }
0x1933   :  { %9772 = vmatprep.subr.mxu0 %v13888_v47  ;;  %13912 = vst [vmem:[#allocation38_spill] sm:$0xff] %v12669_v9 }
0x1934   :  { %9773 = vmatpush3.msra.mxu0 %v13888_v47  ;;  %v12676_v47 = vld [vmem:[%s13262_s5 + $0x50] sm:$0xff] }
0x1935   :  { %9714 = vmatmul.mubr.msk.f32.gmra.mxu0 %vm117_vm0, %v12527_v56  ;;  %9774 = vmatprep.subr.mxu0 %v13890_v3  ;;  %13913 = vst [vmem:[#allocation39_spill] sm:$0xff] %v12676_v47 }
0x1936   :  { %9716 = vmatprep.mubr.msk.f32.mxu0 %vm117_vm0, %v12535_v30  ;;  %9775 = vmatpush3.msra.mxu0 %v13890_v3  ;;  %v12683_v3 = vld [vmem:[%s13262_s5 + $0x58] sm:$0xff] }
0x1937   :  { %9776 = vmatprep.subr.mxu0 %v13892_v33  ;;  %13914 = vst [vmem:[#allocation44_spill] sm:$0xff] %v12683_v3 }
0x1938   :  { %9777 = vmatpush3.msra.mxu0 %v13892_v33  ;;  %v12690_v33 = vld [vmem:[%s13262_s5 + $0x60] sm:$0xff] }
0x1939   :  { %9717 = vmatmul.mubr.msk.f32.gmra.mxu0 %vm117_vm0, %v12545_v42  ;;  %9778 = vmatprep.subr.mxu0 %v13894_v50  ;;  %13915 = vst [vmem:[#allocation43_spill] sm:$0xff] %v12690_v33 }
0x193a   :  { %9719 = vmatprep.mubr.msk.f32.mxu0 %vm117_vm0, %v12553_v1  ;;  %9779 = vmatpush3.msra.mxu0 %v13894_v50  ;;  %v12697_v50 = vld [vmem:[%s13262_s5 + $0x68] sm:$0xff] }
0x193b   :  { %9780 = vmatprep.subr.mxu0 %v13896_v51  ;;  %13916 = vst [vmem:[#allocation40_spill] sm:$0xff] %v12697_v50 }
0x193c   :  { %9781 = vmatpush3.msra.mxu0 %v13896_v51  ;;  %v12704_v51 = vld [vmem:[%s13262_s5 + $0x70] sm:$0xff] }
0x193d   :  { %9720 = vmatmul.mubr.msk.f32.gmra.mxu0 %vm117_vm0, %v12563_v54  ;;  %9796 = vmatprep.subr.mxu0 %v13870_v0  ;;  %13917 = vst [vmem:[#allocation41_spill] sm:$0xff] %v12704_v51 }
0x193e   :  { %9722 = vmatprep.mubr.msk.f32.mxu0 %vm117_vm0, %v12571_v2 }
0x1941   :  { %9723 = vmatmul.mubr.msk.f32.gmra.mxu0 %vm117_vm0, %v12578_v58 }
0x1942   :  { %9725 = vmatprep.mubr.msk.f32.mxu0 %vm117_vm0, %v12585_v27 }
0x1945   :  { %9726 = vmatmul.mubr.msk.f32.gmra.mxu0 %vm117_vm0, %v12592_v53 }
0x1946   :  { %9728 = vmatprep.mubr.msk.f32.mxu0 %vm117_vm0, %v12599_v40 }
0x1949   :  { %9729 = vmatmul.mubr.msk.f32.gmra.mxu0 %vm117_vm0, %v12606_v28 }
0x199a   :  { %v5488_v8 = vpop.permute.xlu1 %5487 }
0x199b   :  { %9675 = vmatprep.subr.mxu1 %v5488_v8 }
0x199c   :  { %v5486_v4 = vpop.permute.xlu0 %5485  ;;  %9676 = vmatpush3.msra.mxu1 %v5488_v8  ;;  %v12711_v8 = vld [vmem:[%s13262_s5 + $0x78] sm:$0xff] }
0x199d   :  { %9677 = vmatprep.subr.mxu1 %v5486_v4  ;;  %13918 = vst [vmem:[#allocation42_spill] sm:$0xff] %v12711_v8 }
0x199e   :  { %9678 = vmatpush3.msra.mxu1 %v5486_v4  ;;  %v13919_v4 = vld [vmem:[#allocation23_spill] sm:$0xff] }
0x199f   :  { %9680 = vmatmul.mubr.msk.f32.vlgmr.msra.gmra.mxu1 %vm117_vm0, %v12613_v22 }
0x19a0   :  { %9682 = vmatprep.mubr.msk.f32.mxu1 %vm117_vm0, %v12620_v6 }
0x19a3   :  { %9683 = vmatmul.mubr.msk.f32.gmra.mxu1 %vm117_vm0, %v12627_v60 }
0x19a4   :  { %9685 = vmatprep.mubr.msk.f32.mxu1 %vm117_vm0, %v12634_v21 }
0x19a7   :  { %9686 = vmatmul.mubr.msk.f32.gmra.mxu1 %vm117_vm0, %v12641_v10 }
0x19a8   :  { %9688 = vmatprep.mubr.msk.f32.mxu1 %vm117_vm0, %v12648_v19 }
0x19ab   :  { %9689 = vmatmul.mubr.msk.f32.gmra.mxu1 %vm117_vm0, %v12655_v23 }
0x19ac   :  { %9691 = vmatprep.mubr.msk.f32.mxu1 %vm117_vm0, %v12662_v31 }
0x19af   :  { %9692 = vmatmul.mubr.msk.f32.gmra.mxu1 %vm117_vm0, %v12669_v9  ;;  %v13923_v9 = vld [vmem:[#allocation51_spill] sm:$0xff] }
0x19b0   :  { %9694 = vmatprep.mubr.msk.f32.mxu1 %vm117_vm0, %v12676_v47 }
0x19b3   :  { %9695 = vmatmul.mubr.msk.f32.gmra.mxu1 %vm117_vm0, %v12683_v3  ;;  %v13921_v3 = vld [vmem:[#allocation24_spill] sm:$0xff] }
0x19b4   :  { %9697 = vmatprep.mubr.msk.f32.mxu1 %vm117_vm0, %v12690_v33 }
0x19b7   :  { %9698 = vmatmul.mubr.msk.f32.gmra.mxu1 %vm117_vm0, %v12697_v50 }
0x19b8   :  { %9700 = vmatprep.mubr.msk.f32.mxu1 %vm117_vm0, %v12704_v51 }
0x19bb   :  { %9701 = vmatmul.mubr.msk.f32.gmra.mxu1 %vm117_vm0, %v12711_v8 }
0x19bc   :  { %9763 = vmatprep.mubr.f32.mxu1 %v13919_v4 }
0x19e9   :  { %v9669_v45 = vpop.f32.mrf.mxu1 }
0x19ea   :  { %v5396_v50 = vadd.f32 %v9669_v45, %v13920_v32 }
0x19eb   :  { %v5386_v33 = vpop.f32.mrf.mxu1 }
0x19ec   :  { %v12718_v47 = vadd.f32 %v13921_v3, %v5396_v50  ;;  %v5395_v31 = vadd.f32 %v5386_v33, %v13923_v9 }
0x19ed   :  { %v12734_v45 = vpop.f32.mrf.mxu0 }
0x19ee   :  { %13922 = vst [vmem:[#allocation21_spill] sm:$0xff] %v12718_v47  ;;  %7911 = vst.msk [vmem:[%s13277_s18 + $0x28] sm:$0xff] %vm1697_vm10, %v12718_v47  ;;  %v12727_v51 = vadd.f32 %v13921_v3, %v5395_v31 }
0x19ef   :  { %v12736_v32 = vpop.f32.mrf.mxu0 }
0x19f0   :  { %13924 = vst [vmem:[#allocation45_spill] sm:$0xff] %v12727_v51  ;;  %7910 = vst.msk [vmem:[%s13277_s18 + $0x20] sm:$0xff] %vm1697_vm10, %v12727_v51 }
0x19f1   :  { %v12738_v9 = vpop.f32.mrf.mxu0 }
0x19f3   :  { %v12740_v33 = vpop.f32.mrf.mxu0 }
0x19f5   :  { %v9715_v50 = vpop.f32.mrf.mxu0 }
0x19f7   :  { %v12742_v4 = vpop.f32.mrf.mxu0 }
0x19f9   :  { %v9718_v8 = vpop.f32.mrf.mxu0 }
0x19fb   :  { %v5732_v31 = vpop.f32.mrf.mxu0 }
0x19fd   :  { %v9721_v19 = vpop.f32.mrf.mxu0 }
0x19ff   :  { %v5742_v60 = vpop.f32.mrf.mxu0 }
0x1a01   :  { %v9724_v28 = vpop.f32.mrf.mxu0 }
0x1a03   :  { %v5752_v27 = vpop.f32.mrf.mxu0 }
0x1a05   :  { %v9727_v54 = vpop.f32.mrf.mxu0 }
0x1a07   :  { %v5762_v30 = vpop.f32.mrf.mxu0 }
0x1a09   :  { %v9730_v61 = vpop.f32.mrf.mxu0 }
0x1a0b   :  { %v5772_v48 = vpop.f32.mrf.mxu0 }
0x1a5f   :  { %v12744_v3 = vpop.f32.mrf.mxu1 }
0x1a61   :  { %v12746_v23 = vpop.f32.mrf.mxu1 }
0x1a63   :  { %v12748_v10 = vpop.f32.mrf.mxu1 }
0x1a65   :  { %v12750_v21 = vpop.f32.mrf.mxu1 }
0x1a67   :  { %v9687_v6 = vpop.f32.mrf.mxu1 }
0x1a69   :  { %v5577_v22 = vpop.f32.mrf.mxu1 }
0x1a6b   :  { %v9690_v40 = vpop.f32.mrf.mxu1 }
0x1a6d   :  { %v5587_v53 = vpop.f32.mrf.mxu1 }
0x1a6f   :  { %v9693_v58 = vpop.f32.mrf.mxu1 }
0x1a70   :  { %v5748_v12 = vadd.f32 %v9721_v19, %v9693_v58 }
0x1a71   :  { %v5597_v2 = vpop.f32.mrf.mxu1 }
0x1a73   :  { %v9696_v1 = vpop.f32.mrf.mxu1 }
0x1a74   :  { %v5758_v51 = vadd.f32 %v9724_v28, %v9696_v1 }
0x1a75   :  { %v5607_v42 = vpop.f32.mrf.mxu1 }
0x1a76   :  { %v5753_v0 = vadd.f32 %v5752_v27, %v5607_v42  ;;  %v5792_v15 = vmax.f32 %v5758_v51, 0.0  ;;  %v5713_v42 = vadd.f32 %v12740_v33, %v12750_v21  ;;  %v13928_v51 = vld [vmem:[#allocation27_spill] sm:$0xff] }
0x1a77   :  { %v9699_v56 = vpop.f32.mrf.mxu1 }
0x1a78   :  { %v5768_v14 = vadd.f32 %v9727_v54, %v9699_v56 }
0x1a79   :  { %v5617_v46 = vpop.f32.mrf.mxu1 }
0x1a7a   :  { %v5763_v17 = vadd.f32 %v5762_v30, %v5617_v46  ;;  %v5794_v24 = vmax.f32 %v5768_v14, 0.0 }
0x1a7b   :  { %v9702_v57 = vpop.f32.mrf.mxu1 }
0x1a7c   :  { %v5778_v29 = vadd.f32 %v9730_v61, %v9702_v57  ;;  %v5793_v37 = vmax.f32 %v5763_v17, 0.0  ;;  %v5810_v57 = vmul.f32 %v5794_v24, %v11236_v16  ;;  %v5743_v61 = vadd.f32 %v5742_v60, %v5597_v2 }
0x1a7d   :  { %v5627_v38 = vpop.f32.mrf.mxu1  ;;  %v5808_v17 = vmul.f32 %v5792_v15, %v11247_v13  ;;  %v5728_v24 = vadd.f32 %v9715_v50, %v9687_v6  ;;  %v5718_v15 = vadd.f32 %v12738_v9, %v12748_v10  ;;  %v5708_v2 = vadd.f32 %v12734_v45, %v12744_v3  ;;  %v13927_v3 = vld [vmem:[#allocation18_spill] sm:$0xff]  ;;  %v13931_v45 = vld [vmem:[#allocation53_spill] sm:$0xff] }
0x1a7e   :  { %v5796_v59 = vmax.f32 %v5778_v29, 0.0  ;;  %v5773_v47 = vadd.f32 %v5772_v48, %v5627_v38  ;;  %v5791_v29 = vmax.f32 %v5753_v0, 0.0  ;;  %v5809_v48 = vmul.f32 %v5793_v37, %v11243_v62 }
0x1a7f   :  { %v5790_v38 = vmax.f32 %v5748_v12, 0.0  ;;  %v5723_v37 = vadd.f32 %v12742_v4, %v5577_v22  ;;  %v5786_v56 = vmax.f32 %v5728_v24, 0.0  ;;  %v5784_v58 = vmax.f32 %v5718_v15, 0.0  ;;  %v13930_v4 = vld [vmem:[#allocation52_spill] sm:$0xff]  ;;  %v13939_v15 = vld [vmem:[#allocation22_spill] sm:$0xff] }
0x1a80   :  { %v5812_v41 = vmul.f32 %v5796_v59, %v13690_v39  ;;  %v5795_v5 = vmax.f32 %v5773_v47, 0.0  ;;  %v5738_v59 = vadd.f32 %v9718_v8, %v9690_v40  ;;  %v5807_v14 = vmul.f32 %v5791_v29, %v11251_v52  ;;  %v13926_v47 = vld [vmem:[#allocation19_spill] sm:$0xff]  ;;  %v13935_v29 = vld [vmem:[#allocation28_spill] sm:$0xff] }
0x1a81   :  { %v5806_v0 = vmul.f32 %v5790_v38, %v11256_v63  ;;  %v5785_v1 = vmax.f32 %v5723_v37, 0.0  ;;  %v5802_v27 = vmul.f32 %v5786_v56, %v11281_v25  ;;  %v5783_v40 = vmax.f32 %v5713_v42, 0.0  ;;  %v13940_v56 = vld [vmem:[#allocation30_spill] sm:$0xff] }
0x1a82   :  { %v5811_v34 = vmul.f32 %v5795_v5, %v11239_v44  ;;  %9731 = vmatprep.subr.mxu1 %v5812_v41  ;;  %v5733_v5 = vadd.f32 %v5732_v31, %v5587_v53  ;;  %v5703_v53 = vadd.f32 %v12736_v32, %v12746_v23  ;;  %v5782_v22 = vmax.f32 %v5708_v2, 0.0  ;;  %v13925_v23 = vld [vmem:[#allocation17_spill] sm:$0xff]  ;;  %v13932_v32 = vld [vmem:[#allocation54_spill] sm:$0xff]  ;;  %v12840_v2 = vld [vmem:[%s13272_s12 + $0x28] sm:$0xff] }
0x1a83   :  { %9732 = vmatpush3.msra.mxu1 %v5812_v41  ;;  %v5789_v41 = vmax.f32 %v5743_v61, 0.0  ;;  %v5801_v28 = vmul.f32 %v5785_v1, %v11287_v43  ;;  %v5800_v6 = vmul.f32 %v5784_v58, %v11293_v11  ;;  %v5799_v21 = vmul.f32 %v5783_v40, %v11297_v7  ;;  %v13934_v61 = vld [vmem:[#allocation21_spill] sm:$0xff]  ;;  %v13942_v42 = vld [vmem:[#allocation2_spill] sm:$0xff]  ;;  %v12831_v1 = vld [vmem:[%s13272_s12 + $0x30] sm:$0xff]  ;;  %13945 = vst [vmem:[#allocation48_spill] sm:$0xff] %v12840_v2 }
0x1a84   :  { %9733 = vmatprep.subr.mxu1 %v5811_v34  ;;  %v5787_v46 = vmax.f32 %v5733_v5, 0.0  ;;  %v5781_v60 = vmax.f32 %v5703_v53, 0.0  ;;  %v5798_v10 = vmul.f32 %v5782_v22, %v11303_v36  ;;  %v13937_v5 = vld [vmem:[#allocation50_spill] sm:$0xff]  ;;  %13943 = vst [vmem:[#allocation47_spill] sm:$0xff] %v12831_v1  ;;  %v13946_v58 = vld [vmem:[#allocation4_spill] sm:$0xff]  ;;  %v13948_v53 = vld [vmem:[#allocation5_spill] sm:$0xff] }
0x1a85   :  { %9734 = vmatpush3.msra.mxu1 %v5811_v34  ;;  %v5788_v34 = vmax.f32 %v5738_v59, 0.0  ;;  %v5805_v12 = vmul.f32 %v5789_v41, %v11263_v18  ;;  %v13936_v59 = vld [vmem:[#allocation49_spill] sm:$0xff]  ;;  %v12867_v22 = vld [vmem:[%s13272_s12 + $0x10] sm:$0xff] }
0x1a86   :  { %9735 = vmatprep.subr.mxu1 %v5810_v57  ;;  %v5803_v54 = vmul.f32 %v5787_v46, %v11275_v35  ;;  %v5797_v19 = vmul.f32 %v5781_v60, %v11309_v20  ;;  %v12858_v40 = vld [vmem:[%s13272_s12 + $0x18] sm:$0xff]  ;;  %13951 = vst [vmem:[#allocation19_spill] sm:$0xff] %v12867_v22  ;;  %v12876_v60 = vld [vmem:[%s13272_s12 + $0x8] sm:$0xff] }
0x1a87   :  { %9736 = vmatpush3.msra.mxu1 %v5810_v57  ;;  %v5804_v30 = vmul.f32 %v5788_v34, %v11269_v49  ;;  %v13933_v57 = vld [vmem:[#allocation45_spill] sm:$0xff]  ;;  %13949 = vst [vmem:[#allocation17_spill] sm:$0xff] %v12858_v40  ;;  %13953 = vst [vmem:[#allocation18_spill] sm:$0xff] %v12876_v60 }
0x1a88   :  { %9737 = vmatprep.subr.mxu1 %v5809_v48  ;;  %v13938_v34 = vld [vmem:[#allocation29_spill] sm:$0xff] }
0x1a89   :  { %9738 = vmatpush3.msra.mxu1 %v5809_v48 }
0x1a8a   :  { %9739 = vmatprep.subr.mxu1 %v5808_v17 }
0x1a8b   :  { %9740 = vmatpush3.msra.mxu1 %v5808_v17 }
0x1a8c   :  { %9741 = vmatprep.subr.mxu1 %v5807_v14 }
0x1a8d   :  { %9742 = vmatpush3.msra.mxu1 %v5807_v14 }
0x1a8e   :  { %9743 = vmatprep.subr.mxu1 %v5806_v0 }
0x1a8f   :  { %9744 = vmatpush3.msra.mxu1 %v5806_v0 }
0x1a90   :  { %9745 = vmatprep.subr.mxu1 %v5805_v12 }
0x1a91   :  { %9746 = vmatpush3.msra.mxu1 %v5805_v12 }
0x1a92   :  { %9747 = vmatprep.subr.mxu1 %v5804_v30 }
0x1a93   :  { %9748 = vmatpush3.msra.mxu1 %v5804_v30  ;;  %v12822_v30 = vld [vmem:[%s13272_s12 + $0x38] sm:$0xff] }
0x1a94   :  { %9749 = vmatprep.subr.mxu1 %v5803_v54  ;;  %13941 = vst [vmem:[#allocation46_spill] sm:$0xff] %v12822_v30 }
0x1a95   :  { %9750 = vmatpush3.msra.mxu1 %v5803_v54  ;;  %v13944_v54 = vld [vmem:[#allocation3_spill] sm:$0xff] }
0x1a96   :  { %9751 = vmatprep.subr.mxu1 %v5802_v27 }
0x1a97   :  { %9752 = vmatpush3.msra.mxu1 %v5802_v27  ;;  %v12849_v27 = vld [vmem:[%s13272_s12 + $0x20] sm:$0xff] }
0x1a98   :  { %9753 = vmatprep.subr.mxu1 %v5801_v28  ;;  %13947 = vst [vmem:[#allocation51_spill] sm:$0xff] %v12849_v27 }
0x1a99   :  { %9754 = vmatpush3.msra.mxu1 %v5801_v28  ;;  %v13950_v28 = vld [vmem:[#allocation6_spill] sm:$0xff] }
0x1a9a   :  { %9755 = vmatprep.subr.mxu1 %v5800_v6 }
0x1a9b   :  { %9756 = vmatpush3.msra.mxu1 %v5800_v6  ;;  %v13952_v6 = vld [vmem:[#allocation7_spill] sm:$0xff] }
0x1a9c   :  { %9757 = vmatprep.subr.mxu1 %v5799_v21 }
0x1a9d   :  { %9758 = vmatpush3.msra.mxu1 %v5799_v21  ;;  %v13954_v21 = vld [vmem:[#allocation8_spill] sm:$0xff] }
0x1a9e   :  { %9759 = vmatprep.subr.mxu1 %v5798_v10 }
0x1a9f   :  { %9760 = vmatpush3.msra.mxu1 %v5798_v10  ;;  %v12885_v10 = vld [vmem:[%s13272_s12] sm:$0xff] }
0x1aa0   :  { %9761 = vmatprep.subr.mxu1 %v5797_v19  ;;  %13955 = vst [vmem:[#allocation27_spill] sm:$0xff] %v12885_v10 }
0x1aa1   :  { %9762 = vmatpush3.msra.mxu1 %v5797_v19  ;;  %v13956_v19 = vld [vmem:[#allocation9_spill] sm:$0xff] }
0x1aa2   :  { %9764 = vmatmul.mubr.f32.vlgmr.msra.gmra.mxu1 %v12197_v26  ;;  %9785 = vmatprep.subr.mxu1 %v12203_v55 }
0x1aa3   :  { %9786 = vmatpush3.msra.mxu1 %v12203_v55  ;;  %v13929_v55 = vld [vmem:[#allocation20_spill] sm:$0xff] }
0x1aa4   :  { %9787 = vmatprep.subr.mxu1 %v13925_v23 }
0x1aa5   :  { %9788 = vmatpush3.msra.mxu1 %v13925_v23  ;;  %v13957_v23 = vld [vmem:[#allocation10_spill] sm:$0xff] }
0x1aa6   :  { %9789 = vmatprep.subr.mxu1 %v13926_v47 }
0x1aa7   :  { %9790 = vmatpush3.msra.mxu1 %v13926_v47  ;;  %v13958_v47 = vld [vmem:[#allocation11_spill] sm:$0xff] }
0x1aa8   :  { %9791 = vmatprep.subr.mxu1 %v13927_v3 }
0x1aa9   :  { %9792 = vmatpush3.msra.mxu1 %v13927_v3  ;;  %v13959_v3 = vld [vmem:[#allocation12_spill] sm:$0xff] }
0x1aaa   :  { %9807 = vmatprep.subr.msk.mxu1 %vm1704_vm9, %v13928_v51 }
0x1b62   :  { %v9765_v26 = vpop.f32.mrf.mxu1 }
0x1b64   :  { %v5879_v8 = vpop.f32.mrf.mxu1 }
0x1b65   :  { %9782 = vmatprep.mubr.msk.f32.mxu0 %vm2188_vm15, %v5879_v8  ;;  %v13961_v8 = vld [vmem:[#allocation14_spill] sm:$0xff] }
0x1b66   :  { %9783 = vmatmul.mubr.msk.f32.vlgmr.msra.gmra.mxu0 %vm2188_vm15, %v9765_v26  ;;  %v13960_v26 = vld [vmem:[#allocation13_spill] sm:$0xff] }
0x1b67   :  { %9797 = vmatpush3.msra.mxu0 %v13929_v55 }
0x1b68   :  { %9798 = vmatprep.subr.mxu0 %v13930_v4 }
0x1b69   :  { %9799 = vmatpush3.msra.mxu0 %v13930_v4  ;;  %v13962_v4 = vld [vmem:[#allocation15_spill] sm:$0xff] }
0x1b6a   :  { %9800 = vmatprep.subr.mxu0 %v13931_v45 }
0x1b6b   :  { %9801 = vmatpush3.msra.mxu0 %v13931_v45 }
0x1b6c   :  { %9802 = vmatprep.subr.mxu0 %v13932_v32 }
0x1b6d   :  { %9803 = vmatpush3.msra.mxu0 %v13932_v32  ;;  %v13963_v32 = vld [vmem:[#allocation16_spill] sm:$0xff] }
0x1c26   :  { %v9784_v9 = vpop.f32.mrf.mxu0 }
0x1c27   :  { %v5970_v31 = vmax.f32 %v9784_v9, 0.0  ;;  %v13964_v9 = vld [vmem:[#allocation31_spill] sm:$0xff] }
0x1c28   :  { %v5960_v33 = vpop.f32.mrf.mxu0 }
0x1c29   :  { %v5969_v50 = vmax.f32 %v5960_v33, 0.0  ;;  %v13965_v33 = vld [vmem:[#allocation32_spill] sm:$0xff] }
0x1c2b   :  { %9793 = vmatprep.mubr.msk.f32.mxu1 %vm609_vm1, %v5969_v50  ;;  %v13966_v50 = vld [vmem:[#allocation33_spill] sm:$0xff] }
0x1c2c   :  { %9794 = vmatmul.mubr.msk.f32.vlgmr.msra.gmra.mxu1 %vm609_vm1, %v5970_v31  ;;  %v13967_v31 = vld [vmem:[#allocation34_spill] sm:$0xff] }
0x1c2d   :  { %9809 = vmatprep.mubr.msk.f32.mxu1 %vm1697_vm10, %v13933_v57  ;;  %9808 = vmatpush3.msk.msra.mxu1 %vm1704_vm9, %v13928_v51 }
0x1c30   :  { %9810 = vmatmul.mubr.msk.f32.vlgmr.msra.gmra.mxu1 %vm1697_vm10, %v13934_v61 }
0x1c31   :  { %9844 = vmatprep.mubr.msk.f32.mxu1 %vm117_vm0, %v13935_v29 }
0x1cec   :  { %v9795_v48 = vpop.f32.mrf.mxu1 }
0x1ced   :  { %v6049_v38 = vadd.f32 %v9795_v48, %v13936_v59  ;;  %v13968_v48 = vld [vmem:[#allocation35_spill] sm:$0xff] }
0x1cee   :  { %v6043_v17 = vpop.f32.mrf.mxu1 }
0x1cef   :  { %v6044_v41 = vadd.f32 %v6043_v17, %v13937_v5  ;;  %v6053_v37 = vmax.f32 %v6049_v38, 0.0  ;;  %v13969_v38 = vld [vmem:[#allocation36_spill] sm:$0xff]  ;;  %v13970_v17 = vld [vmem:[#allocation37_spill] sm:$0xff] }
0x1cf0   :  { %v9811_v14 = vpop.f32.mrf.mxu1 }
0x1cf1   :  { %v6052_v24 = vmax.f32 %v6044_v41, 0.0  ;;  %v6220_v0 = vadd.f32 %v13938_v34, %v9811_v14  ;;  %v13971_v41 = vld [vmem:[#allocation38_spill] sm:$0xff]  ;;  %v13972_v14 = vld [vmem:[#allocation39_spill] sm:$0xff] }
0x1cf2   :  { %v6214_v46 = vpop.f32.mrf.mxu1 }
0x1cf3   :  { %v6215_v12 = vadd.f32 %v13938_v34, %v6214_v46  ;;  %9804 = vmatprep.mubr.msk.f32.mxu0 %vm609_vm1, %v6052_v24  ;;  %6227 = vrot.lane.b32.xlu1 %v6220_v0, %s10247_s27  ;;  %v13973_v24 = vld [vmem:[#allocation44_spill] sm:$0xff]  ;;  %v13976_v46 = vld [vmem:[#allocation41_spill] sm:$0xff] }
0x1cf4   :  { %9840 = vmatprep.subr.mxu1 %v6220_v0  ;;  %9805 = vmatmul.mubr.msk.f32.vlgmr.msra.gmra.mxu0 %vm609_vm1, %v6053_v37  ;;  %v13975_v37 = vld [vmem:[#allocation40_spill] sm:$0xff] }
0x1cf5   :  { %9841 = vmatpush3.msra.mxu1 %v6220_v0  ;;  %6225 = vrot.lane.b32.xlu0 %v6215_v12, %s10247_s27  ;;  %v13974_v0 = vld [vmem:[#allocation43_spill] sm:$0xff] }
0x1cf6   :  { %9842 = vmatprep.subr.mxu1 %v6215_v12  ;;  %9816 = vmatprep.mubr.msk.f32.mxu0 %vm117_vm0, %v13939_v15  ;;  %v13978_v15 = vld [vmem:[#allocation23_spill] sm:$0xff] }
0x1cf7   :  { %9843 = vmatpush3.msra.mxu1 %v6215_v12  ;;  %v13977_v12 = vld [vmem:[#allocation42_spill] sm:$0xff] }
0x1cf8   :  { %9845 = vmatmul.mubr.msk.f32.vlgmr.msra.gmra.mxu1 %vm117_vm0, %v13940_v56  ;;  %9903 = vmatprep.subr.mxu1 %v12822_v30 }
0x1cf9   :  { %9847 = vmatprep.mubr.msk.f32.mxu1 %vm117_vm0, %v13942_v42  ;;  %9904 = vmatpush3.msra.mxu1 %v12822_v30 }
0x1cfa   :  { %9905 = vmatprep.subr.mxu1 %v12831_v1 }
0x1cfb   :  { %9906 = vmatpush3.msra.mxu1 %v12831_v1 }
0x1cfc   :  { %9848 = vmatmul.mubr.msk.f32.gmra.mxu1 %vm117_vm0, %v13944_v54  ;;  %9907 = vmatprep.subr.mxu1 %v12840_v2 }
0x1cfd   :  { %9850 = vmatprep.mubr.msk.f32.mxu1 %vm117_vm0, %v13946_v58  ;;  %9908 = vmatpush3.msra.mxu1 %v12840_v2 }
0x1cfe   :  { %9909 = vmatprep.subr.mxu1 %v12849_v27 }
0x1cff   :  { %9910 = vmatpush3.msra.mxu1 %v12849_v27 }
0x1d00   :  { %9851 = vmatmul.mubr.msk.f32.gmra.mxu1 %vm117_vm0, %v13948_v53  ;;  %9911 = vmatprep.subr.mxu1 %v12858_v40 }
0x1d01   :  { %9853 = vmatprep.mubr.msk.f32.mxu1 %vm117_vm0, %v13950_v28  ;;  %9912 = vmatpush3.msra.mxu1 %v12858_v40 }
0x1d02   :  { %9913 = vmatprep.subr.mxu1 %v12867_v22 }
0x1d03   :  { %9914 = vmatpush3.msra.mxu1 %v12867_v22 }
0x1d04   :  { %9854 = vmatmul.mubr.msk.f32.gmra.mxu1 %vm117_vm0, %v13952_v6  ;;  %9915 = vmatprep.subr.mxu1 %v12876_v60 }
0x1d05   :  { %9856 = vmatprep.mubr.msk.f32.mxu1 %vm117_vm0, %v13954_v21  ;;  %9916 = vmatpush3.msra.mxu1 %v12876_v60 }
0x1d06   :  { %9917 = vmatprep.subr.mxu1 %v12885_v10 }
0x1d07   :  { %9918 = vmatpush3.msra.mxu1 %v12885_v10 }
0x1d08   :  { %9857 = vmatmul.mubr.msk.f32.gmra.mxu1 %vm117_vm0, %v13956_v19  ;;  %9933 = vmatprep.subr.mxu1 %v13929_v55 }
0x1d09   :  { %9859 = vmatprep.mubr.msk.f32.mxu1 %vm117_vm0, %v13957_v23 }
0x1d0c   :  { %9860 = vmatmul.mubr.msk.f32.gmra.mxu1 %vm117_vm0, %v13958_v47 }
0x1d0d   :  { %9862 = vmatprep.mubr.msk.f32.mxu1 %vm117_vm0, %v13959_v3 }
0x1d10   :  { %9863 = vmatmul.mubr.msk.f32.gmra.mxu1 %vm117_vm0, %v13960_v26 }
0x1d11   :  { %9865 = vmatprep.mubr.msk.f32.mxu1 %vm117_vm0, %v13961_v8 }
0x1d14   :  { %9866 = vmatmul.mubr.msk.f32.gmra.mxu1 %vm117_vm0, %v13962_v4 }
0x1d65   :  { %v6228_v45 = vpop.permute.xlu1 %6227 }
0x1d66   :  { %9812 = vmatprep.subr.mxu0 %v6228_v45 }
0x1d67   :  { %9813 = vmatpush3.msra.mxu0 %v6228_v45  ;;  %v6226_v55 = vpop.permute.xlu0 %6225 }
0x1d68   :  { %9814 = vmatprep.subr.mxu0 %v6226_v55 }
0x1d69   :  { %9815 = vmatpush3.msra.mxu0 %v6226_v55  ;;  %v13979_v55 = vld [vmem:[#allocation25_spill] sm:$0xff] }
0x1d6a   :  { %9817 = vmatmul.mubr.msk.f32.vlgmr.msra.gmra.mxu0 %vm117_vm0, %v13963_v32 }
0x1d6b   :  { %9819 = vmatprep.mubr.msk.f32.mxu0 %vm117_vm0, %v13964_v9 }
0x1d6e   :  { %9820 = vmatmul.mubr.msk.f32.gmra.mxu0 %vm117_vm0, %v13965_v33 }
0x1d6f   :  { %9822 = vmatprep.mubr.msk.f32.mxu0 %vm117_vm0, %v13966_v50 }
0x1d72   :  { %9823 = vmatmul.mubr.msk.f32.gmra.mxu0 %vm117_vm0, %v13967_v31 }
0x1d73   :  { %9825 = vmatprep.mubr.msk.f32.mxu0 %vm117_vm0, %v13968_v48 }
0x1d76   :  { %9826 = vmatmul.mubr.msk.f32.gmra.mxu0 %vm117_vm0, %v13969_v38 }
0x1d77   :  { %9828 = vmatprep.mubr.msk.f32.mxu0 %vm117_vm0, %v13970_v17 }
0x1d7a   :  { %9829 = vmatmul.mubr.msk.f32.gmra.mxu0 %vm117_vm0, %v13971_v41  ;;  %v13982_v41 = vld [vmem:[#allocation26_spill] sm:$0xff] }
0x1d7b   :  { %9831 = vmatprep.mubr.msk.f32.mxu0 %vm117_vm0, %v13972_v14  ;;  %v13980_v14 = vld [vmem:[#allocation24_spill] sm:$0xff] }
0x1d7e   :  { %9832 = vmatmul.mubr.msk.f32.gmra.mxu0 %vm117_vm0, %v13973_v24 }
0x1d7f   :  { %9834 = vmatprep.mubr.msk.f32.mxu0 %vm117_vm0, %v13974_v0 }
0x1d82   :  { %9835 = vmatmul.mubr.msk.f32.gmra.mxu0 %vm117_vm0, %v13975_v37 }
0x1d83   :  { %9837 = vmatprep.mubr.msk.f32.mxu0 %vm117_vm0, %v13976_v46 }
0x1d86   :  { %9838 = vmatmul.mubr.msk.f32.gmra.mxu0 %vm117_vm0, %v13977_v12 }
0x1d87   :  { %9900 = vmatprep.mubr.f32.mxu0 %v13978_v15 }
0x1db4   :  { %v9806_v45 = vpop.f32.mrf.mxu0 }
0x1db5   :  { %v6136_v57 = vadd.f32 %v9806_v45, %v13979_v55 }
0x1db6   :  { %v6126_v61 = vpop.f32.mrf.mxu0 }
0x1db7   :  { %v12937_v24 = vadd.f32 %v13980_v14, %v6136_v57  ;;  %v6135_v0 = vadd.f32 %v6126_v61, %v13982_v41 }
0x1db8   :  { %v12953_v15 = vpop.f32.mrf.mxu1 }
0x1db9   :  { %13981 = vst [vmem:[#allocation20_spill] sm:$0xff] %v12937_v24  ;;  %7954 = vst.msk [vmem:[%s13277_s18 + $0x68] sm:$0xff] %vm1697_vm10, %v12937_v24  ;;  %v12946_v46 = vadd.f32 %v13980_v14, %v6135_v0 }
0x1dba   :  { %v12955_v57 = vpop.f32.mrf.mxu1 }
0x1dbb   :  { %13983 = vst [vmem:[#allocation52_spill] sm:$0xff] %v12946_v46  ;;  %7953 = vst.msk [vmem:[%s13277_s18 + $0x60] sm:$0xff] %vm1697_vm10, %v12946_v46 }
0x1dbc   :  { %v12957_v61 = vpop.f32.mrf.mxu1 }
0x1dbe   :  { %v12959_v41 = vpop.f32.mrf.mxu1 }
0x1dc0   :  { %v9852_v45 = vpop.f32.mrf.mxu1 }
0x1dc2   :  { %v12961_v55 = vpop.f32.mrf.mxu1 }
0x1dc4   :  { %v9855_v12 = vpop.f32.mrf.mxu1 }
0x1dc6   :  { %v6472_v14 = vpop.f32.mrf.mxu1 }
0x1dc8   :  { %v9858_v17 = vpop.f32.mrf.mxu1 }
0x1dca   :  { %v6482_v31 = vpop.f32.mrf.mxu1 }
0x1dcc   :  { %v9861_v9 = vpop.f32.mrf.mxu1 }
0x1dce   :  { %v6492_v8 = vpop.f32.mrf.mxu1 }
0x1dd0   :  { %v9864_v47 = vpop.f32.mrf.mxu1 }
0x1dd2   :  { %v6502_v10 = vpop.f32.mrf.mxu1 }
0x1dd4   :  { %v9867_v6 = vpop.f32.mrf.mxu1 }
0x1dd6   :  { %v6512_v27 = vpop.f32.mrf.mxu1 }
0x1e2a   :  { %v12963_v0 = vpop.f32.mrf.mxu0 }
0x1e2c   :  { %v12965_v37 = vpop.f32.mrf.mxu0 }
0x1e2e   :  { %v12967_v38 = vpop.f32.mrf.mxu0 }
0x1e30   :  { %v12969_v48 = vpop.f32.mrf.mxu0 }
0x1e32   :  { %v9824_v50 = vpop.f32.mrf.mxu0 }
0x1e34   :  { %v6317_v33 = vpop.f32.mrf.mxu0 }
0x1e36   :  { %v9827_v32 = vpop.f32.mrf.mxu0 }
0x1e38   :  { %v6327_v4 = vpop.f32.mrf.mxu0 }
0x1e3a   :  { %v9830_v26 = vpop.f32.mrf.mxu0 }
0x1e3b   :  { %v6488_v29 = vadd.f32 %v9858_v17, %v9830_v26  ;;  %v12999_v17 = vld [vmem:[%s13263_s7 + $0x8] sm:$0xff] }
0x1e3c   :  { %v6337_v3 = vpop.f32.mrf.mxu0 }
0x1e3e   :  { %v9833_v23 = vpop.f32.mrf.mxu0 }
0x1e3f   :  { %v6498_v1 = vadd.f32 %v9861_v9, %v9833_v23 }
0x1e40   :  { %v6347_v19 = vpop.f32.mrf.mxu0 }
0x1e41   :  { %v6493_v34 = vadd.f32 %v6492_v8, %v6347_v19  ;;  %v6532_v24 = vmax.f32 %v6498_v1, 0.0  ;;  %v6443_v8 = vadd.f32 %v12955_v57, %v12965_v37  ;;  %v13012_v37 = vld [vmem:[%s13273_s13 + $0x10] sm:$0xff] }
0x1e42   :  { %v9836_v21 = vpop.f32.mrf.mxu0  ;;  %13984 = vst [vmem:[#allocation53_spill] sm:$0xff] %v13012_v37 }
0x1e43   :  { %v6508_v28 = vadd.f32 %v9864_v47, %v9836_v21  ;;  %v6448_v47 = vadd.f32 %v12953_v15, %v12963_v0  ;;  %v13026_v15 = vld [vmem:[%s13273_s13] sm:$0xff] }
0x1e44   :  { %v6357_v60 = vpop.f32.mrf.mxu0  ;;  %13986 = vst [vmem:[#allocation22_spill] sm:$0xff] %v13026_v15 }
0x1e45   :  { %v6503_v58 = vadd.f32 %v6502_v10, %v6357_v60  ;;  %v6534_v42 = vmax.f32 %v6508_v28, 0.0  ;;  %v6458_v28 = vadd.f32 %v12957_v61, %v12967_v38  ;;  %v6453_v10 = vadd.f32 %v12959_v41, %v12969_v48  ;;  %v13037_v41 = vld [vmem:[%s13274_s16 + $0x18] sm:$0xff] }
0x1e46   :  { %v9839_v22 = vpop.f32.mrf.mxu0  ;;  %v6522_v9 = vmax.f32 %v6448_v47, 0.0  ;;  %13987 = vst [vmem:[#allocation23_spill] sm:$0xff] %v13037_v41  ;;  %v14000_v47 = vld [vmem:[#allocation3_spill] sm:$0xff] }
0x1e47   :  { %v6518_v40 = vadd.f32 %v9867_v6, %v9839_v22  ;;  %v6533_v5 = vmax.f32 %v6503_v58, 0.0  ;;  %v6550_v22 = vmul.f32 %v6534_v42, %v11236_v16  ;;  %v6483_v6 = vadd.f32 %v6482_v31, %v6337_v3 }
0x1e48   :  { %v6367_v53 = vpop.f32.mrf.mxu0  ;;  %v6548_v58 = vmul.f32 %v6532_v24, %v11247_v13  ;;  %v6468_v42 = vadd.f32 %v9852_v45, %v9824_v50  ;;  %v6524_v3 = vmax.f32 %v6458_v28, 0.0  ;;  %v6521_v50 = vmax.f32 %v6443_v8, 0.0  ;;  %v13005_v24 = vld [vmem:[%s13273_s13 + $0x18] sm:$0xff]  ;;  %v13043_v45 = vld [vmem:[%s13274_s16 + $0x10] sm:$0xff]  ;;  %v14003_v8 = vld [vmem:[#allocation51_spill] sm:$0xff] }
0x1e49   :  { %v6536_v2 = vmax.f32 %v6518_v40, 0.0  ;;  %v6513_v54 = vadd.f32 %v6512_v27, %v6367_v53  ;;  %v6531_v40 = vmax.f32 %v6493_v34, 0.0  ;;  %v6549_v27 = vmul.f32 %v6533_v5, %v11243_v62  ;;  %13988 = vst [vmem:[#allocation25_spill] sm:$0xff] %v13043_v45 }
0x1e4a   :  { %v6463_v5 = vadd.f32 %v12961_v55, %v6317_v33  ;;  %v6526_v60 = vmax.f32 %v6468_v42, 0.0  ;;  %v6540_v33 = vmul.f32 %v6524_v3, %v11293_v11  ;;  %v6538_v48 = vmul.f32 %v6522_v9, %v11303_v36  ;;  %v13050_v55 = vld [vmem:[%s13274_s16 + $0x8] sm:$0xff]  ;;  %v14001_v3 = vld [vmem:[#allocation48_spill] sm:$0xff]  ;;  %v14006_v9 = vld [vmem:[#allocation6_spill] sm:$0xff] }
0x1e4b   :  { %v6552_v30 = vmul.f32 %v6536_v2, %v13690_v39  ;;  %v6535_v56 = vmax.f32 %v6513_v54, 0.0  ;;  %v6478_v2 = vadd.f32 %v9855_v12, %v9827_v32  ;;  %v6530_v54 = vmax.f32 %v6488_v29, 0.0  ;;  %v13019_v12 = vld [vmem:[%s13273_s13 + $0x8] sm:$0xff]  ;;  %13989 = vst [vmem:[#allocation24_spill] sm:$0xff] %v13050_v55 }
0x1e4c   :  { %v6547_v1 = vmul.f32 %v6531_v40, %v11251_v52  ;;  %v6525_v19 = vmax.f32 %v6463_v5, 0.0  ;;  %v6542_v26 = vmul.f32 %v6526_v60, %v11281_v25  ;;  %v6537_v38 = vmul.f32 %v6521_v50, %v11309_v20  ;;  %13985 = vst [vmem:[#allocation54_spill] sm:$0xff] %v13019_v12  ;;  %v13995_v5 = vld [vmem:[#allocation29_spill] sm:$0xff]  ;;  %v10244_v60 = vld [vmem:[%s13262_s5] sm:$0xff]  ;;  %v14008_v50 = vld [vmem:[#allocation7_spill] sm:$0xff] }
0x1e4d   :  { %v6551_v59 = vmul.f32 %v6535_v56, %v11239_v44  ;;  %9868 = vmatprep.subr.mxu0 %v6552_v30  ;;  %v6473_v56 = vadd.f32 %v6472_v14, %v6327_v4  ;;  %v6546_v34 = vmul.f32 %v6530_v54, %v11256_v63  ;;  %v6523_v4 = vmax.f32 %v6453_v10, 0.0  ;;  %v13057_v14 = vld [vmem:[%s13274_s16] sm:$0xff] }
0x1e4e   :  { %9869 = vmatpush3.msra.mxu0 %v6552_v30  ;;  %v6529_v30 = vmax.f32 %v6483_v6, 0.0  ;;  %v6541_v32 = vmul.f32 %v6525_v19, %v11287_v43  ;;  %13990 = vst [vmem:[#allocation26_spill] sm:$0xff] %v13057_v14  ;;  %v13997_v10 = vld [vmem:[#allocation46_spill] sm:$0xff] }
0x1e4f   :  { %9870 = vmatprep.subr.mxu0 %v6551_v59  ;;  %v6527_v53 = vmax.f32 %v6473_v56, 0.0  ;;  %v6539_v31 = vmul.f32 %v6523_v4, %v11297_v7  ;;  %v13998_v19 = vld [vmem:[#allocation2_spill] sm:$0xff]  ;;  %v14004_v4 = vld [vmem:[#allocation5_spill] sm:$0xff] }
0x1e50   :  { %9871 = vmatpush3.msra.mxu0 %v6551_v59  ;;  %v6528_v59 = vmax.f32 %v6478_v2, 0.0  ;;  %v6545_v29 = vmul.f32 %v6529_v30, %v11263_v18  ;;  %v13992_v2 = vld [vmem:[#allocation28_spill] sm:$0xff] }
0x1e51   :  { %9872 = vmatprep.subr.mxu0 %v6550_v22  ;;  %v6543_v23 = vmul.f32 %v6527_v53, %v11275_v35 }
0x1e52   :  { %9873 = vmatpush3.msra.mxu0 %v6550_v22  ;;  %v6544_v21 = vmul.f32 %v6528_v59, %v11269_v49 }
0x1e53   :  { %9874 = vmatprep.subr.mxu0 %v6549_v27 }
0x1e54   :  { %9875 = vmatpush3.msra.mxu0 %v6549_v27  ;;  %v13991_v27 = vld [vmem:[#allocation20_spill] sm:$0xff] }
0x1e55   :  { %9876 = vmatprep.subr.mxu0 %v6548_v58 }
0x1e56   :  { %9877 = vmatpush3.msra.mxu0 %v6548_v58  ;;  %v13993_v58 = vld [vmem:[#allocation49_spill] sm:$0xff] }
0x1e57   :  { %9878 = vmatprep.subr.mxu0 %v6547_v1 }
0x1e58   :  { %9879 = vmatpush3.msra.mxu0 %v6547_v1  ;;  %v13994_v1 = vld [vmem:[#allocation50_spill] sm:$0xff] }
0x1e59   :  { %9880 = vmatprep.subr.mxu0 %v6546_v34 }
0x1e5a   :  { %9881 = vmatpush3.msra.mxu0 %v6546_v34 }
0x1e5b   :  { %9882 = vmatprep.subr.mxu0 %v6545_v29 }
0x1e5c   :  { %9883 = vmatpush3.msra.mxu0 %v6545_v29 }
0x1e5d   :  { %9884 = vmatprep.subr.mxu0 %v6544_v21 }
0x1e5e   :  { %9885 = vmatpush3.msra.mxu0 %v6544_v21  ;;  %v13996_v21 = vld [vmem:[#allocation30_spill] sm:$0xff] }
0x1e5f   :  { %9886 = vmatprep.subr.mxu0 %v6543_v23 }
0x1e60   :  { %9887 = vmatpush3.msra.mxu0 %v6543_v23  ;;  %v13999_v23 = vld [vmem:[#allocation47_spill] sm:$0xff] }
0x1e61   :  { %9888 = vmatprep.subr.mxu0 %v6542_v26 }
0x1e62   :  { %9889 = vmatpush3.msra.mxu0 %v6542_v26  ;;  %v14002_v26 = vld [vmem:[#allocation4_spill] sm:$0xff] }
0x1e63   :  { %9890 = vmatprep.subr.mxu0 %v6541_v32 }
0x1e64   :  { %9891 = vmatpush3.msra.mxu0 %v6541_v32  ;;  %v14005_v32 = vld [vmem:[#allocation17_spill] sm:$0xff] }
0x1e65   :  { %9892 = vmatprep.subr.mxu0 %v6540_v33 }
0x1e66   :  { %9893 = vmatpush3.msra.mxu0 %v6540_v33  ;;  %v14007_v33 = vld [vmem:[#allocation19_spill] sm:$0xff] }
0x1e67   :  { %9894 = vmatprep.subr.mxu0 %v6539_v31 }
0x1e68   :  { %9895 = vmatpush3.msra.mxu0 %v6539_v31  ;;  %v14009_v31 = vld [vmem:[#allocation18_spill] sm:$0xff] }
0x1e69   :  { %9896 = vmatprep.subr.mxu0 %v6538_v48 }
0x1e6a   :  { %9897 = vmatpush3.msra.mxu0 %v6538_v48  ;;  %v14010_v48 = vld [vmem:[#allocation8_spill] sm:$0xff] }
0x1e6b   :  { %9898 = vmatprep.subr.mxu0 %v6537_v38 }
0x1e6c   :  { %9899 = vmatpush3.msra.mxu0 %v6537_v38  ;;  %v14011_v38 = vld [vmem:[#allocation27_spill] sm:$0xff] }
0x1e6d   :  { %9901 = vmatmul.mubr.f32.vlgmr.msra.gmra.mxu0 %v12999_v17  ;;  %9922 = vmatprep.subr.mxu0 %v13005_v24 }
0x1e6e   :  { %9923 = vmatpush3.msra.mxu0 %v13005_v24 }
0x1e6f   :  { %9924 = vmatprep.subr.mxu0 %v13012_v37 }
0x1e70   :  { %9925 = vmatpush3.msra.mxu0 %v13012_v37 }
0x1e71   :  { %9926 = vmatprep.subr.mxu0 %v13019_v12 }
0x1e72   :  { %9927 = vmatpush3.msra.mxu0 %v13019_v12 }
0x1e73   :  { %9928 = vmatprep.subr.mxu0 %v13026_v15 }
0x1e74   :  { %9929 = vmatpush3.msra.mxu0 %v13026_v15 }
0x1e75   :  { %9944 = vmatprep.subr.msk.mxu0 %vm1704_vm9, %v13928_v51 }
0x1f2d   :  { %v9902_v57 = vpop.f32.mrf.mxu0 }
0x1f2f   :  { %v6619_v61 = vpop.f32.mrf.mxu0 }
0x1f30   :  { %9919 = vmatprep.mubr.msk.f32.mxu1 %vm2188_vm15, %v6619_v61  ;;  %v14013_v61 = vld [vmem:[#allocation10_spill] sm:$0xff] }
0x1f31   :  { %9920 = vmatmul.mubr.msk.f32.vlgmr.msra.gmra.mxu1 %vm2188_vm15, %v9902_v57  ;;  %v14012_v57 = vld [vmem:[#allocation9_spill] sm:$0xff] }
0x1f32   :  { %9934 = vmatpush3.msra.mxu1 %v13037_v41 }
0x1f33   :  { %9935 = vmatprep.subr.mxu1 %v13043_v45 }
0x1f34   :  { %9936 = vmatpush3.msra.mxu1 %v13043_v45 }
0x1f35   :  { %9937 = vmatprep.subr.mxu1 %v13050_v55 }
0x1f36   :  { %9938 = vmatpush3.msra.mxu1 %v13050_v55 }
0x1f37   :  { %9939 = vmatprep.subr.mxu1 %v13057_v14 }
0x1f38   :  { %9940 = vmatpush3.msra.mxu1 %v13057_v14 }
0x1ff1   :  { %v9921_v0 = vpop.f32.mrf.mxu1 }
0x1ff2   :  { %v6710_v40 = vmax.f32 %v9921_v0, 0.0  ;;  %v14014_v0 = vld [vmem:[#allocation11_spill] sm:$0xff] }
0x1ff3   :  { %v6700_v22 = vpop.f32.mrf.mxu1 }
0x1ff4   :  { %v6709_v6 = vmax.f32 %v6700_v22, 0.0  ;;  %v14015_v22 = vld [vmem:[#allocation12_spill] sm:$0xff] }
0x1ff6   :  { %9930 = vmatprep.mubr.msk.f32.mxu0 %vm609_vm1, %v6709_v6  ;;  %v14016_v6 = vld [vmem:[#allocation13_spill] sm:$0xff] }
0x1ff7   :  { %9931 = vmatmul.mubr.msk.f32.vlgmr.msra.gmra.mxu0 %vm609_vm1, %v6710_v40  ;;  %v14017_v40 = vld [vmem:[#allocation14_spill] sm:$0xff] }
0x1ff8   :  { %9946 = vmatprep.mubr.msk.f32.mxu0 %vm1697_vm10, %v12946_v46  ;;  %9945 = vmatpush3.msk.msra.mxu0 %vm1704_vm9, %v13928_v51 }
0x1ffb   :  { %9947 = vmatmul.mubr.msk.f32.vlgmr.msra.gmra.mxu0 %vm1697_vm10, %v13991_v27 }
0x1ffc   :  { %9981 = vmatprep.mubr.msk.f32.mxu0 %vm117_vm0, %v13992_v2  ;;  %v14018_v2 = vld [vmem:[#allocation15_spill] sm:$0xff] }
0x20b7   :  { %v9932_v54 = vpop.f32.mrf.mxu0 }
0x20b8   :  { %v6789_v56 = vadd.f32 %v9932_v54, %v13993_v58 }
0x20b9   :  { %v6783_v30 = vpop.f32.mrf.mxu0 }
0x20ba   :  { %v6784_v42 = vadd.f32 %v6783_v30, %v13994_v1  ;;  %v6793_v29 = vmax.f32 %v6789_v56, 0.0  ;;  %v14019_v30 = vld [vmem:[#allocation16_spill] sm:$0xff] }
0x20bb   :  { %v9948_v59 = vpop.f32.mrf.mxu0 }
0x20bc   :  { %v6792_v34 = vmax.f32 %v6784_v42, 0.0  ;;  %v6960_v53 = vadd.f32 %v13995_v5, %v9948_v59  ;;  %v14020_v42 = vld [vmem:[#allocation31_spill] sm:$0xff]  ;;  %v14021_v59 = vld [vmem:[#allocation32_spill] sm:$0xff] }
0x20bd   :  { %v6954_v28 = vpop.f32.mrf.mxu0 }
0x20be   :  { %v6955_v51 = vadd.f32 %v13995_v5, %v6954_v28  ;;  %6967 = vrot.lane.b32.xlu1 %v6960_v53, %s10247_s27  ;;  %9941 = vmatprep.mubr.msk.f32.mxu1 %vm609_vm1, %v6792_v34  ;;  %v14022_v34 = vld [vmem:[#allocation33_spill] sm:$0xff]  ;;  %v14023_v5 = vld [vmem:[#allocation34_spill] sm:$0xff] }
0x20bf   :  { %9977 = vmatprep.subr.mxu0 %v6960_v53  ;;  %9942 = vmatmul.mubr.msk.f32.vlgmr.msra.gmra.mxu1 %vm609_vm1, %v6793_v29  ;;  %v14025_v29 = vld [vmem:[#allocation36_spill] sm:$0xff]  ;;  %v14026_v28 = vld [vmem:[#allocation37_spill] sm:$0xff] }
0x20c0   :  { %9978 = vmatpush3.msra.mxu0 %v6960_v53  ;;  %6965 = vrot.lane.b32.xlu0 %v6955_v51, %s10247_s27  ;;  %v14024_v53 = vld [vmem:[#allocation35_spill] sm:$0xff] }
0x20c1   :  { %9979 = vmatprep.subr.mxu0 %v6955_v51  ;;  %9953 = vmatprep.mubr.msk.f32.mxu1 %vm117_vm0, %v10244_v60  ;;  %v14028_v60 = vld [vmem:[#allocation39_spill] sm:$0xff] }
0x20c2   :  { %9980 = vmatpush3.msra.mxu0 %v6955_v51  ;;  %v14027_v51 = vld [vmem:[#allocation38_spill] sm:$0xff] }
0x20c3   :  { %9982 = vmatmul.mubr.msk.f32.vlgmr.msra.gmra.mxu0 %vm117_vm0, %v13996_v21  ;;  %10040 = vmatprep.subr.mxu0 %v13997_v10  ;;  %v14029_v21 = vld [vmem:[#allocation44_spill] sm:$0xff] }
0x20c4   :  { %9984 = vmatprep.mubr.msk.f32.mxu0 %vm117_vm0, %v13998_v19  ;;  %10041 = vmatpush3.msra.mxu0 %v13997_v10  ;;  %v14030_v10 = vld [vmem:[#allocation43_spill] sm:$0xff]  ;;  %v14031_v19 = vld [vmem:[#allocation40_spill] sm:$0xff] }
0x20c5   :  { %10042 = vmatprep.subr.mxu0 %v13999_v23 }
0x20c6   :  { %10043 = vmatpush3.msra.mxu0 %v13999_v23  ;;  %v14032_v23 = vld [vmem:[#allocation41_spill] sm:$0xff] }
0x20c7   :  { %9985 = vmatmul.mubr.msk.f32.gmra.mxu0 %vm117_vm0, %v14000_v47  ;;  %10044 = vmatprep.subr.mxu0 %v14001_v3  ;;  %v14033_v47 = vld [vmem:[#allocation42_spill] sm:$0xff] }
0x20c8   :  { %9987 = vmatprep.mubr.msk.f32.mxu0 %vm117_vm0, %v14002_v26  ;;  %10045 = vmatpush3.msra.mxu0 %v14001_v3  ;;  %v10245_v3 = vld [vmem:[%s13263_s7] sm:$0xff] }
0x20c9   :  { %10046 = vmatprep.subr.mxu0 %v14003_v8 }
0x20ca   :  { %10047 = vmatpush3.msra.mxu0 %v14003_v8  ;;  %v14034_v8 = vld [vmem:[#allocation21_spill] sm:$0xff] }
0x20cb   :  { %9988 = vmatmul.mubr.msk.f32.gmra.mxu0 %vm117_vm0, %v14004_v4  ;;  %10048 = vmatprep.subr.mxu0 %v14005_v32 }
0x20cc   :  { %9990 = vmatprep.mubr.msk.f32.mxu0 %vm117_vm0, %v14006_v9  ;;  %10049 = vmatpush3.msra.mxu0 %v14005_v32  ;;  %v13167_v9 = vld [vmem:[%s13276_s17] ss:$0 sm:$0xff] }
0x20cd   :  { %10050 = vmatprep.subr.mxu0 %v14007_v33  ;;  %14035 = vst [vmem:[#allocation28_spill] sm:$0xff] %v13167_v9 }
0x20ce   :  { %10051 = vmatpush3.msra.mxu0 %v14007_v33 }
0x20cf   :  { %9991 = vmatmul.mubr.msk.f32.gmra.mxu0 %vm117_vm0, %v14008_v50  ;;  %10052 = vmatprep.subr.mxu0 %v14009_v31  ;;  %v14036_v50 = vld [vmem:[#allocation45_spill] sm:$0xff] }
0x20d0   :  { %9993 = vmatprep.mubr.msk.f32.mxu0 %vm117_vm0, %v14010_v48  ;;  %10053 = vmatpush3.msra.mxu0 %v14009_v31 }
0x20d1   :  { %10054 = vmatprep.subr.mxu0 %v14011_v38 }
0x20d2   :  { %10055 = vmatpush3.msra.mxu0 %v14011_v38 }
0x20d3   :  { %9994 = vmatmul.mubr.msk.f32.gmra.mxu0 %vm117_vm0, %v14012_v57  ;;  %10070 = vmatprep.subr.mxu0 %v13037_v41 }
0x20d4   :  { %9996 = vmatprep.mubr.msk.f32.mxu0 %vm117_vm0, %v14013_v61 }
0x20d7   :  { %9997 = vmatmul.mubr.msk.f32.gmra.mxu0 %vm117_vm0, %v14014_v0 }
0x20d8   :  { %9999 = vmatprep.mubr.msk.f32.mxu0 %vm117_vm0, %v14015_v22 }
0x20db   :  { %10000 = vmatmul.mubr.msk.f32.gmra.mxu0 %vm117_vm0, %v14016_v6 }
0x20dc   :  { %10002 = vmatprep.mubr.msk.f32.mxu0 %vm117_vm0, %v14017_v40 }
0x20df   :  { %10003 = vmatmul.mubr.msk.f32.gmra.mxu0 %vm117_vm0, %v14018_v2 }
0x2130   :  { %v6968_v54 = vpop.permute.xlu1 %6967 }
0x2131   :  { %9949 = vmatprep.subr.mxu1 %v6968_v54 }
0x2132   :  { %v6966_v56 = vpop.permute.xlu0 %6965  ;;  %9950 = vmatpush3.msra.mxu1 %v6968_v54 }
0x2133   :  { %9951 = vmatprep.subr.mxu1 %v6966_v56 }
0x2134   :  { %9952 = vmatpush3.msra.mxu1 %v6966_v56 }
0x2135   :  { %9954 = vmatmul.mubr.msk.f32.vlgmr.msra.gmra.mxu1 %vm117_vm0, %v14019_v30 }
0x2136   :  { %9956 = vmatprep.mubr.msk.f32.mxu1 %vm117_vm0, %v14020_v42 }
0x2139   :  { %9957 = vmatmul.mubr.msk.f32.gmra.mxu1 %vm117_vm0, %v14021_v59 }
0x213a   :  { %9959 = vmatprep.mubr.msk.f32.mxu1 %vm117_vm0, %v14022_v34 }
0x213d   :  { %9960 = vmatmul.mubr.msk.f32.gmra.mxu1 %vm117_vm0, %v14023_v5 }
0x213e   :  { %9962 = vmatprep.mubr.msk.f32.mxu1 %vm117_vm0, %v14024_v53 }
0x2141   :  { %9963 = vmatmul.mubr.msk.f32.gmra.mxu1 %vm117_vm0, %v14025_v29 }
0x2142   :  { %9965 = vmatprep.mubr.msk.f32.mxu1 %vm117_vm0, %v14026_v28 }
0x2145   :  { %9966 = vmatmul.mubr.msk.f32.gmra.mxu1 %vm117_vm0, %v14027_v51 }
0x2146   :  { %9968 = vmatprep.mubr.msk.f32.mxu1 %vm117_vm0, %v14028_v60 }
0x2149   :  { %9969 = vmatmul.mubr.msk.f32.gmra.mxu1 %vm117_vm0, %v14029_v21 }
0x214a   :  { %9971 = vmatprep.mubr.msk.f32.mxu1 %vm117_vm0, %v14030_v10 }
0x214d   :  { %9972 = vmatmul.mubr.msk.f32.gmra.mxu1 %vm117_vm0, %v14031_v19 }
0x214e   :  { %9974 = vmatprep.mubr.msk.f32.mxu1 %vm117_vm0, %v14032_v23 }
0x2151   :  { %9975 = vmatmul.mubr.msk.f32.gmra.mxu1 %vm117_vm0, %v14033_v47 }
0x2152   :  { %10037 = vmatprep.mubr.f32.mxu1 %v10245_v3 }
0x217f   :  { %v9943_v26 = vpop.f32.mrf.mxu1 }
0x2180   :  { %v6876_v4 = vadd.f32 %v9943_v26, %v14034_v8 }
0x2181   :  { %v6866_v32 = vpop.f32.mrf.mxu1 }
0x2182   :  { %v6878_v33 = vadd.f32 %v13167_v9, %v6876_v4  ;;  %v6875_v31 = vadd.f32 %v6866_v32, %v14036_v50 }
0x2183   :  { %v13180_v38 = vpop.f32.mrf.mxu0 }
0x2184   :  { %7997 = vst.msk [vmem:[%s13277_s18 + $0x38] sm:$0xff] %vm1697_vm10, %v6878_v33  ;;  %v6877_v48 = vadd.f32 %v13167_v9, %v6875_v31 }
0x2185   :  { %v13182_v57 = vpop.f32.mrf.mxu0 }
0x2186   :  { %7996 = vst.msk [vmem:[%s13277_s18 + $0x30] sm:$0xff] %vm1697_vm10, %v6877_v48 }
0x2187   :  { %v13184_v61 = vpop.f32.mrf.mxu0 }
0x2189   :  { %v13186_v0 = vpop.f32.mrf.mxu0 }
0x218b   :  { %v9989_v22 = vpop.f32.mrf.mxu0 }
0x218d   :  { %v13188_v6 = vpop.f32.mrf.mxu0 }
0x218f   :  { %v9992_v40 = vpop.f32.mrf.mxu0 }
0x2191   :  { %v7212_v2 = vpop.f32.mrf.mxu0 }
0x2193   :  { %v9995_v30 = vpop.f32.mrf.mxu0 }
0x2195   :  { %v7222_v34 = vpop.f32.mrf.mxu0 }
0x2197   :  { %v9998_v29 = vpop.f32.mrf.mxu0 }
0x2199   :  { %v7232_v60 = vpop.f32.mrf.mxu0 }
0x219b   :  { %v10001_v19 = vpop.f32.mrf.mxu0 }
0x219d   :  { %v7242_v3 = vpop.f32.mrf.mxu0 }
0x219f   :  { %v10004_v4 = vpop.f32.mrf.mxu0 }
0x21a1   :  { %v7252_v48 = vpop.f32.mrf.mxu0 }
0x21f5   :  { %v13190_v54 = vpop.f32.mrf.mxu1 }
0x21f7   :  { %v13192_v56 = vpop.f32.mrf.mxu1 }
0x21f9   :  { %v13194_v42 = vpop.f32.mrf.mxu1 }
0x21fb   :  { %v13196_v59 = vpop.f32.mrf.mxu1 }
0x21fd   :  { %v9961_v5 = vpop.f32.mrf.mxu1 }
0x21ff   :  { %v7057_v53 = vpop.f32.mrf.mxu1 }
0x2201   :  { %v9964_v28 = vpop.f32.mrf.mxu1 }
0x2203   :  { %v7067_v51 = vpop.f32.mrf.mxu1 }
0x2205   :  { %v9967_v21 = vpop.f32.mrf.mxu1 }
0x2206   :  { %v7228_v12 = vadd.f32 %v9995_v30, %v9967_v21 }
0x2207   :  { %v7077_v10 = vpop.f32.mrf.mxu1 }
0x2209   :  { %v9970_v23 = vpop.f32.mrf.mxu1 }
0x220a   :  { %v7238_v1 = vadd.f32 %v9998_v29, %v9970_v23 }
0x220b   :  { %v7087_v47 = vpop.f32.mrf.mxu1 }
0x220c   :  { %v7233_v45 = vadd.f32 %v7232_v60, %v7087_v47  ;;  %v7272_v37 = vmax.f32 %v7238_v1, 0.0  ;;  %v14046_v47 = vld [vmem:[#allocation20_spill] sm:$0xff] }
0x220d   :  { %v9973_v26 = vpop.f32.mrf.mxu1 }
0x220e   :  { %v7248_v33 = vadd.f32 %v10001_v19, %v9973_v26  ;;  %v7271_v26 = vmax.f32 %v7233_v45, 0.0 }
0x220f   :  { %v7097_v8 = vpop.f32.mrf.mxu1 }
0x2210   :  { %v7243_v46 = vadd.f32 %v7242_v3, %v7097_v8  ;;  %v7274_v58 = vmax.f32 %v7248_v33, 0.0  ;;  %v7223_v3 = vadd.f32 %v7222_v34, %v7077_v10 }
0x2211   :  { %v9976_v32 = vpop.f32.mrf.mxu1 }
0x2212   :  { %v7258_v50 = vadd.f32 %v10004_v4, %v9976_v32  ;;  %v7273_v41 = vmax.f32 %v7243_v46, 0.0  ;;  %v7290_v19 = vmul.f32 %v7274_v58, %v11236_v16  ;;  %v7288_v46 = vmul.f32 %v7272_v37, %v11247_v13  ;;  %v14047_v32 = vld [vmem:[#allocation28_spill] sm:$0xff] }
0x2213   :  { %v7107_v31 = vpop.f32.mrf.mxu1  ;;  %v7208_v16 = vadd.f32 %v9989_v22, %v9961_v5  ;;  %v7198_v13 = vadd.f32 %v13184_v61, %v13194_v42  ;;  %v14044_v5 = vld [vmem:[#allocation49_spill] sm:$0xff] }
0x2214   :  { %v7276_v9 = vmax.f32 %v7258_v50, 0.0  ;;  %v7253_v27 = vadd.f32 %v7252_v48, %v7107_v31  ;;  %v7289_v29 = vmul.f32 %v7273_v41, %v11243_v62  ;;  %v7203_v62 = vadd.f32 %v13188_v6, %v7057_v53  ;;  %v14048_v50 = vld [vmem:[#allocation52_spill] sm:$0xff] }
0x2215   :  { %v7266_v37 = vmax.f32 %v7208_v16, 0.0 }
0x2216   :  { %v7292_v14 = vmul.f32 %v7276_v9, %v13690_v39  ;;  %v7275_v55 = vmax.f32 %v7253_v27, 0.0  ;;  %v7218_v39 = vadd.f32 %v9992_v40, %v9964_v28  ;;  %v7270_v27 = vmax.f32 %v7228_v12, 0.0 }
0x2217   :  { %v7265_v58 = vmax.f32 %v7203_v62, 0.0  ;;  %v7264_v9 = vmax.f32 %v7198_v13, 0.0  ;;  %v7282_v22 = vmul.f32 %v7266_v37, %v11281_v25 }
0x2218   :  { %v7291_v15 = vmul.f32 %v7275_v55, %v11239_v44  ;;  %10005 = vmatprep.subr.mxu1 %v7292_v14  ;;  %v7213_v44 = vadd.f32 %v7212_v2, %v7067_v51  ;;  %v7269_v55 = vmax.f32 %v7223_v3, 0.0  ;;  %v7286_v45 = vmul.f32 %v7270_v27, %v11256_v63  ;;  %v14042_v2 = vld [vmem:[#allocation24_spill] sm:$0xff]  ;;  %v14045_v51 = vld [vmem:[#allocation50_spill] sm:$0xff] }
0x2219   :  { %10006 = vmatpush3.msra.mxu1 %v7292_v14  ;;  %v7287_v14 = vmul.f32 %v7271_v26, %v11251_v52  ;;  %v7193_v63 = vadd.f32 %v13186_v0, %v13196_v59  ;;  %v7281_v6 = vmul.f32 %v7265_v58, %v11287_v43  ;;  %v14037_v43 = vld [vmem:[#allocation53_spill] sm:$0xff] }
0x221a   :  { %10007 = vmatprep.subr.mxu1 %v7291_v15  ;;  %v7267_v41 = vmax.f32 %v7213_v44, 0.0  ;;  %v7285_v12 = vmul.f32 %v7269_v55, %v11263_v18  ;;  %v7188_v18 = vadd.f32 %v13180_v38, %v13190_v54  ;;  %v14043_v54 = vld [vmem:[#allocation26_spill] sm:$0xff] }
0x221b   :  { %10008 = vmatpush3.msra.mxu1 %v7291_v15  ;;  %v7268_v15 = vmax.f32 %v7218_v39, 0.0  ;;  %v7263_v61 = vmax.f32 %v7193_v63, 0.0 }
0x221c   :  { %10009 = vmatprep.subr.mxu1 %v7290_v19  ;;  %v7283_v1 = vmul.f32 %v7267_v41, %v11275_v35  ;;  %v7262_v0 = vmax.f32 %v7188_v18, 0.0  ;;  %v7280_v35 = vmul.f32 %v7264_v9, %v11293_v11  ;;  %v14038_v11 = vld [vmem:[#allocation54_spill] sm:$0xff] }
0x221d   :  { %10010 = vmatpush3.msra.mxu1 %v7290_v19  ;;  %v7284_v52 = vmul.f32 %v7268_v15, %v11269_v49  ;;  %v7183_v49 = vadd.f32 %v13182_v57, %v13192_v56  ;;  %v7279_v38 = vmul.f32 %v7263_v61, %v11297_v7  ;;  %v14039_v7 = vld [vmem:[#allocation22_spill] sm:$0xff] }
0x221e   :  { %10011 = vmatprep.subr.mxu1 %v7289_v29  ;;  %v7278_v25 = vmul.f32 %v7262_v0, %v11303_v36 }
0x221f   :  { %10012 = vmatpush3.msra.mxu1 %v7289_v29  ;;  %v7261_v40 = vmax.f32 %v7183_v49, 0.0 }
0x2220   :  { %10013 = vmatprep.subr.mxu1 %v7288_v46 }
0x2221   :  { %10014 = vmatpush3.msra.mxu1 %v7288_v46  ;;  %v7277_v57 = vmul.f32 %v7261_v40, %v11309_v20 }
0x2222   :  { %10015 = vmatprep.subr.mxu1 %v7287_v14 }
0x2223   :  { %10016 = vmatpush3.msra.mxu1 %v7287_v14 }
0x2224   :  { %10017 = vmatprep.subr.mxu1 %v7286_v45 }
0x2225   :  { %10018 = vmatpush3.msra.mxu1 %v7286_v45 }
0x2226   :  { %10019 = vmatprep.subr.mxu1 %v7285_v12 }
0x2227   :  { %10020 = vmatpush3.msra.mxu1 %v7285_v12 }
0x2228   :  { %10021 = vmatprep.subr.mxu1 %v7284_v52 }
0x2229   :  { %10022 = vmatpush3.msra.mxu1 %v7284_v52 }
0x222a   :  { %10023 = vmatprep.subr.mxu1 %v7283_v1 }
0x222b   :  { %10024 = vmatpush3.msra.mxu1 %v7283_v1 }
0x222c   :  { %10025 = vmatprep.subr.mxu1 %v7282_v22 }
0x222d   :  { %10026 = vmatpush3.msra.mxu1 %v7282_v22 }
0x222e   :  { %10027 = vmatprep.subr.mxu1 %v7281_v6 }
0x222f   :  { %10028 = vmatpush3.msra.mxu1 %v7281_v6 }
0x2230   :  { %10029 = vmatprep.subr.mxu1 %v7280_v35 }
0x2231   :  { %10030 = vmatpush3.msra.mxu1 %v7280_v35 }
0x2232   :  { %10031 = vmatprep.subr.mxu1 %v7279_v38 }
0x2233   :  { %10032 = vmatpush3.msra.mxu1 %v7279_v38 }
0x2234   :  { %10033 = vmatprep.subr.mxu1 %v7278_v25 }
0x2235   :  { %10034 = vmatpush3.msra.mxu1 %v7278_v25 }
0x2236   :  { %10035 = vmatprep.subr.mxu1 %v7277_v57 }
0x2237   :  { %10036 = vmatpush3.msra.mxu1 %v7277_v57 }
0x2238   :  { %10038 = vmatmul.mubr.f32.vlgmr.msra.gmra.mxu1 %v12999_v17  ;;  %10059 = vmatprep.subr.mxu1 %v13005_v24  ;;  %v14040_v17 = vld [vmem:[#allocation23_spill] sm:$0xff] }
0x2239   :  { %10060 = vmatpush3.msra.mxu1 %v13005_v24  ;;  %v14041_v24 = vld [vmem:[#allocation25_spill] sm:$0xff] }
0x223a   :  { %10061 = vmatprep.subr.mxu1 %v14037_v43 }
0x223b   :  { %10062 = vmatpush3.msra.mxu1 %v14037_v43 }
0x223c   :  { %10063 = vmatprep.subr.mxu1 %v14038_v11 }
0x223d   :  { %10064 = vmatpush3.msra.mxu1 %v14038_v11 }
0x223e   :  { %10065 = vmatprep.subr.mxu1 %v14039_v7 }
0x223f   :  { %10066 = vmatpush3.msra.mxu1 %v14039_v7 }
0x22f8   :  { %v10039_v36 = vpop.f32.mrf.mxu1 }
0x22fa   :  { %v7359_v20 = vpop.f32.mrf.mxu1 }
0x22fb   :  { %10056 = vmatprep.mubr.msk.f32.mxu0 %vm2188_vm15, %v7359_v20 }
0x22fc   :  { %10057 = vmatmul.mubr.msk.f32.vlgmr.msra.gmra.mxu0 %vm2188_vm15, %v10039_v36 }
0x22fd   :  { %10071 = vmatpush3.msra.mxu0 %v14040_v17 }
0x22fe   :  { %10072 = vmatprep.subr.mxu0 %v14041_v24 }
0x22ff   :  { %10073 = vmatpush3.msra.mxu0 %v14041_v24 }
0x2300   :  { %10074 = vmatprep.subr.mxu0 %v14042_v2 }
0x2301   :  { %10075 = vmatpush3.msra.mxu0 %v14042_v2 }
0x2302   :  { %10076 = vmatprep.subr.mxu0 %v14043_v54 }
0x2303   :  { %10077 = vmatpush3.msra.mxu0 %v14043_v54 }
0x23bc   :  { %v10058_v56 = vpop.f32.mrf.mxu0 }
0x23bd   :  { %v7450_v59 = vmax.f32 %v10058_v56, 0.0 }
0x23be   :  { %v7440_v30 = vpop.f32.mrf.mxu0 }
0x23bf   :  { %v7449_v42 = vmax.f32 %v7440_v30, 0.0 }
0x23c1   :  { %10067 = vmatprep.mubr.msk.f32.mxu1 %vm609_vm1, %v7449_v42 }
0x23c2   :  { %10068 = vmatmul.mubr.msk.f32.vlgmr.msra.gmra.mxu1 %vm609_vm1, %v7450_v59 }
0x2482   :  { %v10069_v34 = vpop.f32.mrf.mxu1 }
0x2483   :  { %v7529_v53 = vadd.f32 %v10069_v34, %v14044_v5 }
0x2484   :  { %v7523_v28 = vpop.f32.mrf.mxu1 }
0x2485   :  { %v7524_v60 = vadd.f32 %v7523_v28, %v14045_v51  ;;  %v7533_v10 = vmax.f32 %v7529_v53, 0.0 }
0x2487   :  { %v7532_v21 = vmax.f32 %v7524_v60, 0.0 }
0x2489   :  { %10078 = vmatprep.mubr.msk.f32.mxu0 %vm609_vm1, %v7532_v21 }
0x248a   :  { %10079 = vmatmul.mubr.msk.f32.vlgmr.msra.gmra.mxu0 %vm609_vm1, %v7533_v10 }
0x254a   :  { %v10080_v23 = vpop.f32.mrf.mxu0 }
0x254b   :  { %v7616_v8 = vadd.f32 %v10080_v23, %v14046_v47 }
0x254c   :  { %v7606_v4 = vpop.f32.mrf.mxu0 }
0x254d   :  { %v7618_v33 = vadd.f32 %v14047_v32, %v7616_v8  ;;  %v7615_v31 = vadd.f32 %v7606_v4, %v14048_v50 }
0x254f   :  { %8040 = vst.msk [vmem:[%s13277_s18 + $0x78] sm:$0xff] %vm1697_vm10, %v7618_v33  ;;  %v7617_v48 = vadd.f32 %v14047_v32, %v7615_v31 }
0x2551   :  { %8039 = vst.msk [vmem:[%s13277_s18 + $0x70] sm:$0xff] %vm1697_vm10, %v7617_v48 }

</bundles_post_ra>
